<compile_context>
chip_gen: v7x
topology: tpu7x:2x2x1
jax: 0.10.0
libtpu: 0.0.40
codegen_flags: <defaults>
</compile_context>

<pallas_src>
import jax
import jax.numpy as jnp
import numpy as np
from jax.experimental import pallas as pl
from jax.experimental.pallas import tpu as pltpu

K1 = 5          # conv1 kernel size
C1 = 64         # conv1 out channels
K2 = 3          # conv2 kernel size
C2 = 128        # conv2 out channels
HID = 128       # fc out features


def _round_up(v, m):
    return (v + m - 1) // m * m


def encoder_kernel(x_ref, w1_ref, b1_ref, w2_ref, b2_ref, wf_ref, bf_ref,
                   pool_ref, o_ref, h1_scr):
    # x_ref   : (R, 1)        R = BB * Lpad   (collapsed batch x padded-time)
    # w1_ref  : (K1, C1)      b1_ref : (1, C1)
    # w2_ref  : (K2, C1, C2)  b2_ref : (1, C2)
    # wf_ref  : (C2, HID)     bf_ref : (1, HID)
    # pool_ref: (BB, Rp_m)    per-batch masked-average selection matrix
    # o_ref   : (BB, HID)
    # h1_scr  : (R, C1) VMEM scratch (so MaxPool1d(2) can re-read it with a
    #           stride-2 sublane access)
    R = x_ref.shape[0]
    Rm = R - 8            # conv1 rows actually computed (tail is padding-only)
    Rp = R // 2           # pooled rows (Lpad is even -> alignment preserved)
    Rp_m = Rp - 8         # conv2 rows actually computed

    x = x_ref[...]        # (R, 1)
    w1 = w1_ref[...]      # (K1, C1)

    # ---- conv1 (Cin = 1) + bias + ReLU: K1 shifted outer products (VPU) ----
    h1 = x[0:Rm, :] * w1[0:1, :]
    for k in range(1, K1):
        h1 = h1 + x[k:k + Rm, :] * w1[k:k + 1, :]
    h1 = jnp.maximum(h1 + b1_ref[...], 0.0)                 # (Rm, C1)

    h1_scr[0:Rm, :] = h1
    h1_scr[Rm:R, :] = jnp.zeros((8, C1), jnp.float32)

    # ---- MaxPool1d(2): stride-2 sublane reads (no selection matmuls) -------
    hp = jnp.maximum(h1_scr[pl.ds(0, Rp, stride=2), :],
                     h1_scr[pl.ds(1, Rp, stride=2), :])      # (Rp, C1)

    # ---- conv2 + bias + ReLU: K2 shifted (Rp_m, C1) @ (C1, C2) matmuls -----
    acc = jnp.dot(hp[0:Rp_m, :], w2_ref[0],
                  preferred_element_type=jnp.float32)
    for k in range(1, K2):
        acc = acc + jnp.dot(hp[k:k + Rp_m, :], w2_ref[k],
                            preferred_element_type=jnp.float32)
    h2 = jnp.maximum(acc + b2_ref[...], 0.0)                 # (Rp_m, C2)

    # ---- AdaptiveAvgPool1d(1): per-batch masked mean via selection matmul --
    pooled = jnp.dot(pool_ref[...], h2,
                     preferred_element_type=jnp.float32)     # (BB, C2)

    # ---- fc1 ----------------------------------------------------------------
    o_ref[...] = (jnp.dot(pooled, wf_ref[...],
                          preferred_element_type=jnp.float32)
                  + bf_ref[...])                             # (BB, HID)


def encoder_forward(x_ncw, w1, b1, w2, b2, wf, bf, *, block_b=8):
    """x_ncw: (B, 1, L) float32 (PyTorch NCW layout)."""
    B, cin, L = x_ncw.shape
    assert cin == 1
    L1 = L - (K1 - 1)           # conv1 output length
    Lp = L1 // 2                # after maxpool(2)
    L2 = Lp - (K2 - 1)          # conv2 output length
    assert L2 >= 1, "input too short for this Encoder"

    BB = block_b
    assert BB % 8 == 0, "block_b must be a multiple of 8"
    Bp = _round_up(B, BB)
    # Per-element padded time length: multiple of 16 (keeps the stride-2
    # collapsed maxpool aligned) and >= L + 8 (so the last 8 uncomputed rows
    # of each stage always fall in the per-element padding tail).
    Lpad = _round_up(L + 8, 16)
    Lppad = Lpad // 2
    R = BB * Lpad
    Rp = BB * Lppad
    Rp_m = Rp - 8

    # (B, 1, L) -> zero-padded (Bp, Lpad) -> collapsed (Bp*Lpad, 1)   [wrapper glue]
    x2 = jnp.pad(x_ncw[:, 0, :], ((0, Bp - B), (0, Lpad - L)))
    xw = x2.reshape(Bp * Lpad, 1)

    # Average-pool selection matrix, hoisted out of the kernel (VMEM resident).
    pool_np = np.zeros((BB, Rp_m), np.float32)
    for b in range(BB):
        pool_np[b, b * Lppad: b * Lppad + L2] = 1.0 / L2
    pool = jnp.asarray(pool_np)

    out = pl.pallas_call(
        encoder_kernel,
        out_shape=jax.ShapeDtypeStruct((Bp, HID), jnp.float32),
        grid_spec=pltpu.PrefetchScalarGridSpec(
            num_scalar_prefetch=0,
            grid=(Bp // BB,),
            in_specs=[
                pl.BlockSpec((R, 1), lambda i: (i, 0)),           # x (collapsed)
                pl.BlockSpec((K1, C1), lambda i: (0, 0)),         # w1
                pl.BlockSpec((1, C1), lambda i: (0, 0)),          # b1
                pl.BlockSpec((K2, C1, C2), lambda i: (0, 0, 0)),  # w2
                pl.BlockSpec((1, C2), lambda i: (0, 0)),          # b2
                pl.BlockSpec((C2, HID), lambda i: (0, 0)),        # wf
                pl.BlockSpec((1, HID), lambda i: (0, 0)),         # bf
                pl.BlockSpec((BB, Rp_m), lambda i: (0, 0)),       # pool matrix
            ],
            out_specs=pl.BlockSpec((BB, HID), lambda i: (i, 0)),
            scratch_shapes=[pltpu.VMEM((R, C1), jnp.float32)],
        ),
        compiler_params=pltpu.CompilerParams(
            dimension_semantics=("parallel",)),
    )(xw, w1, b1, w2, b2, wf, bf, pool)
    return out[:B]                                            # (B, HID)


def encoder_reference(x_ncw, w1, b1, w2, b2, wf, bf):
    """Pure-JAX reference mirroring the PyTorch forward."""
    B, _, L = x_ncw.shape
    L1 = L - (K1 - 1)
    Lp = L1 // 2
    L2 = Lp - (K2 - 1)
    xs = x_ncw[:, 0, :]                                            # (B, L)
    patches = jnp.stack([xs[:, k:k + L1] for k in range(K1)], -1)  # (B, L1, K1)
    h1 = jax.nn.relu(jnp.einsum('btk,kc->btc', patches, w1) + b1[None])
    hp = jnp.maximum(h1[:, 0:2 * Lp:2, :], h1[:, 1:2 * Lp:2, :])   # (B, Lp, C1)
    h2 = b2[None] + sum(jnp.einsum('btc,cd->btd', hp[:, k:k + L2, :], w2[k])
                        for k in range(K2))
    h2 = jax.nn.relu(h2)                                           # (B, L2, C2)
    pooled = jnp.mean(h2, axis=1)                                  # (B, C2)
    return pooled @ wf + bf                                        # (B, HID)


if __name__ == "__main__":
    B, L = 16, 64          # grid of 2 blocks of 8 -> both TCs busy on v7x
    key = jax.random.PRNGKey(0)
    ks = jax.random.split(key, 8)

    # Deterministic synthetic parameters (shapes implied by the nn.Module).
    # PyTorch conv1.weight is (64,1,5) -> stored here as (K1, C1) = its (k, out) view.
    w1 = 0.1 * jax.random.normal(ks[0], (K1, C1), jnp.float32)
    b1 = 0.1 * jax.random.normal(ks[1], (1, C1), jnp.float32)
    # PyTorch conv2.weight is (128,64,3) -> stored here as (K2, C1, C2).
    w2 = 0.05 * jax.random.normal(ks[2], (K2, C1, C2), jnp.float32)
    b2 = 0.1 * jax.random.normal(ks[3], (1, C2), jnp.float32)
    # PyTorch fc1.weight is (128,128) -> stored here already transposed (in, out).
    wf = 0.05 * jax.random.normal(ks[4], (C2, HID), jnp.float32)
    bf = 0.1 * jax.random.normal(ks[5], (1, HID), jnp.float32)

    x = jax.random.normal(ks[6], (B, 1, L), jnp.float32)   # NCW like PyTorch

    out = jax.block_until_ready(encoder_forward(x, w1, b1, w2, b2, wf, bf))
    ref = jax.block_until_ready(encoder_reference(x, w1, b1, w2, b2, wf, bf))

    assert out.shape == (B, HID), out.shape
    np.testing.assert_allclose(np.asarray(out), np.asarray(ref),
                               rtol=1e-4, atol=1e-4)
    print("KERNEL_OK")
</pallas_src>

<mosaic_0001>
module attributes {stable_mosaic.version = 11 : i64} {
  func.func @encoder_kernel(%arg0: i32, %arg1: memref<640x1xf32, #tpu.memory_space<vmem>>, %arg2: memref<5x64xf32, #tpu.memory_space<vmem>>, %arg3: memref<1x64xf32, #tpu.memory_space<vmem>>, %arg4: memref<3x64x128xf32, #tpu.memory_space<vmem>>, %arg5: memref<1x128xf32, #tpu.memory_space<vmem>>, %arg6: memref<128x128xf32, #tpu.memory_space<vmem>>, %arg7: memref<1x128xf32, #tpu.memory_space<vmem>>, %arg8: memref<8x312xf32, #tpu.memory_space<vmem>>, %arg9: memref<8x128xf32, #tpu.memory_space<vmem>>, %arg10: memref<640x64xf32, #tpu.memory_space<vmem>>) attributes {dimension_semantics = [#tpu.dimension_semantics<parallel>], iteration_bounds = array<i64: 2>, scalar_prefetch = 0 : i64, scratch_operands = 1 : i64, tpu.core_type = #tpu.core_type<tc>, window_params = [{transform_indices = @transform_0, window_bounds = array<i64: 640, 1>}, {pipeline_mode = #tpu.pipeline_mode<synchronous>, transform_indices = @transform_1, window_bounds = array<i64: 5, 64>}, {pipeline_mode = #tpu.pipeline_mode<synchronous>, transform_indices = @transform_2, window_bounds = array<i64: 1, 64>}, {pipeline_mode = #tpu.pipeline_mode<synchronous>, transform_indices = @transform_3, window_bounds = array<i64: 3, 64, 128>}, {pipeline_mode = #tpu.pipeline_mode<synchronous>, transform_indices = @transform_4, window_bounds = array<i64: 1, 128>}, {pipeline_mode = #tpu.pipeline_mode<synchronous>, transform_indices = @transform_5, window_bounds = array<i64: 128, 128>}, {pipeline_mode = #tpu.pipeline_mode<synchronous>, transform_indices = @transform_6, window_bounds = array<i64: 1, 128>}, {pipeline_mode = #tpu.pipeline_mode<synchronous>, transform_indices = @transform_7, window_bounds = array<i64: 8, 312>}, {transform_indices = @transform_8, window_bounds = array<i64: 8, 128>}]} {
    %c0 = arith.constant 0 : index
    %c0_0 = arith.constant 0 : index
    %0 = vector.load %arg1[%c0, %c0_0] : memref<640x1xf32, #tpu.memory_space<vmem>>, vector<640x1xf32>
    %c0_1 = arith.constant 0 : index
    %c0_2 = arith.constant 0 : index
    %1 = vector.load %arg2[%c0_1, %c0_2] : memref<5x64xf32, #tpu.memory_space<vmem>>, vector<5x64xf32>
    %2 = vector.extract_strided_slice %0 {offsets = [0, 0], sizes = [632, 1], strides = [1, 1]} : vector<640x1xf32> to vector<632x1xf32>
    %3 = vector.extract_strided_slice %1 {offsets = [0, 0], sizes = [1, 64], strides = [1, 1]} : vector<5x64xf32> to vector<1x64xf32>
    %4 = vector.broadcast %2 : vector<632x1xf32> to vector<632x64xf32>
    %5 = vector.broadcast %3 : vector<1x64xf32> to vector<632x64xf32>
    %6 = arith.mulf %4, %5 : vector<632x64xf32>
    %7 = vector.extract_strided_slice %0 {offsets = [1, 0], sizes = [632, 1], strides = [1, 1]} : vector<640x1xf32> to vector<632x1xf32>
    %8 = vector.extract_strided_slice %1 {offsets = [1, 0], sizes = [1, 64], strides = [1, 1]} : vector<5x64xf32> to vector<1x64xf32>
    %9 = vector.broadcast %7 : vector<632x1xf32> to vector<632x64xf32>
    %10 = vector.broadcast %8 : vector<1x64xf32> to vector<632x64xf32>
    %11 = arith.mulf %9, %10 : vector<632x64xf32>
    %12 = arith.addf %6, %11 : vector<632x64xf32>
    %13 = vector.extract_strided_slice %0 {offsets = [2, 0], sizes = [632, 1], strides = [1, 1]} : vector<640x1xf32> to vector<632x1xf32>
    %14 = vector.extract_strided_slice %1 {offsets = [2, 0], sizes = [1, 64], strides = [1, 1]} : vector<5x64xf32> to vector<1x64xf32>
    %15 = vector.broadcast %13 : vector<632x1xf32> to vector<632x64xf32>
    %16 = vector.broadcast %14 : vector<1x64xf32> to vector<632x64xf32>
    %17 = arith.mulf %15, %16 : vector<632x64xf32>
    %18 = arith.addf %12, %17 : vector<632x64xf32>
    %19 = vector.extract_strided_slice %0 {offsets = [3, 0], sizes = [632, 1], strides = [1, 1]} : vector<640x1xf32> to vector<632x1xf32>
    %20 = vector.extract_strided_slice %1 {offsets = [3, 0], sizes = [1, 64], strides = [1, 1]} : vector<5x64xf32> to vector<1x64xf32>
    %21 = vector.broadcast %19 : vector<632x1xf32> to vector<632x64xf32>
    %22 = vector.broadcast %20 : vector<1x64xf32> to vector<632x64xf32>
    %23 = arith.mulf %21, %22 : vector<632x64xf32>
    %24 = arith.addf %18, %23 : vector<632x64xf32>
    %25 = vector.extract_strided_slice %0 {offsets = [4, 0], sizes = [632, 1], strides = [1, 1]} : vector<640x1xf32> to vector<632x1xf32>
    %26 = vector.extract_strided_slice %1 {offsets = [4, 0], sizes = [1, 64], strides = [1, 1]} : vector<5x64xf32> to vector<1x64xf32>
    %27 = vector.broadcast %25 : vector<632x1xf32> to vector<632x64xf32>
    %28 = vector.broadcast %26 : vector<1x64xf32> to vector<632x64xf32>
    %29 = arith.mulf %27, %28 : vector<632x64xf32>
    %30 = arith.addf %24, %29 : vector<632x64xf32>
    %c0_3 = arith.constant 0 : index
    %c0_4 = arith.constant 0 : index
    %31 = vector.load %arg3[%c0_3, %c0_4] : memref<1x64xf32, #tpu.memory_space<vmem>>, vector<1x64xf32>
    %32 = vector.broadcast %31 : vector<1x64xf32> to vector<632x64xf32>
    %33 = arith.addf %30, %32 : vector<632x64xf32>
    %cst = arith.constant 0.000000e+00 : f32
    %34 = vector.broadcast %cst : f32 to vector<632x64xf32>
    %35 = arith.maximumf %33, %34 : vector<632x64xf32>
    %c0_5 = arith.constant 0 : index
    %c0_6 = arith.constant 0 : index
    %36 = vector.load %arg10[%c0_5, %c0_6] : memref<640x64xf32, #tpu.memory_space<vmem>>, vector<632x64xf32>
    tpu.vector_store %arg10[%c0_5, %c0_6], %35 {strides = array<i32>} : memref<640x64xf32, #tpu.memory_space<vmem>>, vector<632x64xf32>,
    %cst_7 = arith.constant 0.000000e+00 : f32
    %37 = vector.broadcast %cst_7 : f32 to vector<8x64xf32>
    %c632 = arith.constant 632 : index
    %c0_8 = arith.constant 0 : index
    %38 = vector.load %arg10[%c632, %c0_8] : memref<640x64xf32, #tpu.memory_space<vmem>>, vector<8x64xf32>
    tpu.vector_store %arg10[%c632, %c0_8], %37 {strides = array<i32>} : memref<640x64xf32, #tpu.memory_space<vmem>>, vector<8x64xf32>,
    %c0_9 = arith.constant 0 : index
    %c0_10 = arith.constant 0 : index
    %39 = tpu.strided_load %arg10[%c0_9, %c0_10] {strides = array<i32: 2, 1>} : memref<640x64xf32, #tpu.memory_space<vmem>>, vector<320x64xf32>
    %c1 = arith.constant 1 : index
    %c0_11 = arith.constant 0 : index
    %40 = tpu.strided_load %arg10[%c1, %c0_11] {strides = array<i32: 2, 1>} : memref<640x64xf32, #tpu.memory_space<vmem>>, vector<320x64xf32>
    %41 = arith.maximumf %39, %40 : vector<320x64xf32>
    %42 = vector.extract_strided_slice %41 {offsets = [0, 0], sizes = [312, 64], strides = [1, 1]} : vector<320x64xf32> to vector<312x64xf32>
    %c0_12 = arith.constant 0 : index
    %c0_13 = arith.constant 0 : index
    %c0_14 = arith.constant 0 : index
    %43 = vector.load %arg4[%c0_12, %c0_13, %c0_14] : memref<3x64x128xf32, #tpu.memory_space<vmem>>, vector<1x64x128xf32>
    %44 = vector.shape_cast %43 : vector<1x64x128xf32> to vector<64x128xf32>
    %cst_15 = arith.constant dense<0.000000e+00> : vector<312x128xf32>
    %45 = tpu.matmul %42, %44, %cst_15 {dimension_numbers = #tpu.dot_dimension_numbers<[1], [0], [0], [1], [0, 0, 1, 1], [], []>} : vector<312x64xf32>, vector<64x128xf32>, vector<312x128xf32> -> vector<312x128xf32>
    %46 = vector.extract_strided_slice %41 {offsets = [1, 0], sizes = [312, 64], strides = [1, 1]} : vector<320x64xf32> to vector<312x64xf32>
    %c1_16 = arith.constant 1 : index
    %c0_17 = arith.constant 0 : index
    %c0_18 = arith.constant 0 : index
    %47 = vector.load %arg4[%c1_16, %c0_17, %c0_18] : memref<3x64x128xf32, #tpu.memory_space<vmem>>, vector<1x64x128xf32>
    %48 = vector.shape_cast %47 : vector<1x64x128xf32> to vector<64x128xf32>
    %cst_19 = arith.constant dense<0.000000e+00> : vector<312x128xf32>
    %49 = tpu.matmul %46, %48, %cst_19 {dimension_numbers = #tpu.dot_dimension_numbers<[1], [0], [0], [1], [0, 0, 1, 1], [], []>} : vector<312x64xf32>, vector<64x128xf32>, vector<312x128xf32> -> vector<312x128xf32>
    %50 = arith.addf %45, %49 : vector<312x128xf32>
    %51 = vector.extract_strided_slice %41 {offsets = [2, 0], sizes = [312, 64], strides = [1, 1]} : vector<320x64xf32> to vector<312x64xf32>
    %c2 = arith.constant 2 : index
    %c0_20 = arith.constant 0 : index
    %c0_21 = arith.constant 0 : index
    %52 = vector.load %arg4[%c2, %c0_20, %c0_21] : memref<3x64x128xf32, #tpu.memory_space<vmem>>, vector<1x64x128xf32>
    %53 = vector.shape_cast %52 : vector<1x64x128xf32> to vector<64x128xf32>
    %cst_22 = arith.constant dense<0.000000e+00> : vector<312x128xf32>
    %54 = tpu.matmul %51, %53, %cst_22 {dimension_numbers = #tpu.dot_dimension_numbers<[1], [0], [0], [1], [0, 0, 1, 1], [], []>} : vector<312x64xf32>, vector<64x128xf32>, vector<312x128xf32> -> vector<312x128xf32>
    %55 = arith.addf %50, %54 : vector<312x128xf32>
    %c0_23 = arith.constant 0 : index
    %c0_24 = arith.constant 0 : index
    %56 = vector.load %arg5[%c0_23, %c0_24] : memref<1x128xf32, #tpu.memory_space<vmem>>, vector<1x128xf32>
    %57 = vector.broadcast %56 : vector<1x128xf32> to vector<312x128xf32>
    %58 = arith.addf %55, %57 : vector<312x128xf32>
    %cst_25 = arith.constant 0.000000e+00 : f32
    %59 = vector.broadcast %cst_25 : f32 to vector<312x128xf32>
    %60 = arith.maximumf %58, %59 : vector<312x128xf32>
    %c0_26 = arith.constant 0 : index
    %c0_27 = arith.constant 0 : index
    %61 = vector.load %arg8[%c0_26, %c0_27] : memref<8x312xf32, #tpu.memory_space<vmem>>, vector<8x312xf32>
    %cst_28 = arith.constant dense<0.000000e+00> : vector<8x128xf32>
    %62 = tpu.matmul %61, %60, %cst_28 {dimension_numbers = #tpu.dot_dimension_numbers<[1], [0], [0], [1], [0, 0, 1, 1], [], []>} : vector<8x312xf32>, vector<312x128xf32>, vector<8x128xf32> -> vector<8x128xf32>
    %c0_29 = arith.constant 0 : index
    %c0_30 = arith.constant 0 : index
    %63 = vector.load %arg6[%c0_29, %c0_30] : memref<128x128xf32, #tpu.memory_space<vmem>>, vector<128x128xf32>
    %cst_31 = arith.constant dense<0.000000e+00> : vector<8x128xf32>
    %64 = tpu.matmul %62, %63, %cst_31 {dimension_numbers = #tpu.dot_dimension_numbers<[1], [0], [0], [1], [0, 0, 1, 1], [], []>} : vector<8x128xf32>, vector<128x128xf32>, vector<8x128xf32> -> vector<8x128xf32>
    %c0_32 = arith.constant 0 : index
    %c0_33 = arith.constant 0 : index
    %65 = vector.load %arg7[%c0_32, %c0_33] : memref<1x128xf32, #tpu.memory_space<vmem>>, vector<1x128xf32>
    %66 = vector.broadcast %65 : vector<1x128xf32> to vector<8x128xf32>
    %67 = arith.addf %64, %66 : vector<8x128xf32>
    %c0_34 = arith.constant 0 : index
    %c0_35 = arith.constant 0 : index
    %68 = vector.load %arg9[%c0_34, %c0_35] : memref<8x128xf32, #tpu.memory_space<vmem>>, vector<8x128xf32>
    tpu.vector_store %arg9[%c0_34, %c0_35], %67 {strides = array<i32>} : memref<8x128xf32, #tpu.memory_space<vmem>>, vector<8x128xf32>,
    return
  }
  func.func @transform_0(%arg0: i32) -> (i32, i32) {
    %c0_i32 = arith.constant 0 : i32
    %c0_i32_0 = arith.constant 0 : i32
    return %arg0, %c0_i32 : i32, i32
  }
  func.func @transform_1(%arg0: i32) -> (i32, i32) {
    %c0_i32 = arith.constant 0 : i32
    %c0_i32_0 = arith.constant 0 : i32
    %c0_i32_1 = arith.constant 0 : i32
    return %c0_i32, %c0_i32_0 : i32, i32
  }
  func.func @transform_2(%arg0: i32) -> (i32, i32) {
    %c0_i32 = arith.constant 0 : i32
    %c0_i32_0 = arith.constant 0 : i32
    %c0_i32_1 = arith.constant 0 : i32
    return %c0_i32, %c0_i32_0 : i32, i32
  }
  func.func @transform_3(%arg0: i32) -> (i32, i32, i32) {
    %c0_i32 = arith.constant 0 : i32
    %c0_i32_0 = arith.constant 0 : i32
    %c0_i32_1 = arith.constant 0 : i32
    %c0_i32_2 = arith.constant 0 : i32
    return %c0_i32, %c0_i32_0, %c0_i32_1 : i32, i32, i32
  }
  func.func @transform_4(%arg0: i32) -> (i32, i32) {
    %c0_i32 = arith.constant 0 : i32
    %c0_i32_0 = arith.constant 0 : i32
    %c0_i32_1 = arith.constant 0 : i32
    return %c0_i32, %c0_i32_0 : i32, i32
  }
  func.func @transform_5(%arg0: i32) -> (i32, i32) {
    %c0_i32 = arith.constant 0 : i32
    %c0_i32_0 = arith.constant 0 : i32
    %c0_i32_1 = arith.constant 0 : i32
    return %c0_i32, %c0_i32_0 : i32, i32
  }
  func.func @transform_6(%arg0: i32) -> (i32, i32) {
    %c0_i32 = arith.constant 0 : i32
    %c0_i32_0 = arith.constant 0 : i32
    %c0_i32_1 = arith.constant 0 : i32
    return %c0_i32, %c0_i32_0 : i32, i32
  }
  func.func @transform_7(%arg0: i32) -> (i32, i32) {
    %c0_i32 = arith.constant 0 : i32
    %c0_i32_0 = arith.constant 0 : i32
    %c0_i32_1 = arith.constant 0 : i32
    return %c0_i32, %c0_i32_0 : i32, i32
  }
  func.func @transform_8(%arg0: i32) -> (i32, i32) {
    %c0_i32 = arith.constant 0 : i32
    %c0_i32_0 = arith.constant 0 : i32
    return %arg0, %c0_i32 : i32, i32
  }
}

</mosaic_0001>

<bundles_post_ra>
// kernel: tpu_custom_call.1
= control target key start
LH: loop header
LB: loop body
LE: loop exit
PB: predicated region body
PF: predicated region fallthrough
CT: control target
= control target key end

     0   :  { %13 = vsyncpa [#allocation4], 0  ;;  %s9331_s0 = inlined_call_operand.vmem [shape: f32[1280,1], index: 0, kind: input, shape index: {}]   ;;  %s9332_s1 = inlined_call_operand.vmem [shape: f32[5,64], index: 1, kind: input, shape index: {}]   ;;  %s9333_s2 = inlined_call_operand.vmem [shape: f32[1,64], index: 2, kind: input, shape index: {}]   ;;  %s9334_s3 = inlined_call_operand.vmem [shape: f32[3,64,128], index: 3, kind: input, shape index: {}]   ;;  %s9335_s4 = inlined_call_operand.vmem [shape: f32[1,128], index: 4, kind: input, shape index: {}]   ;;  %s9336_s5 = inlined_call_operand.vmem [shape: f32[128,128], index: 5, kind: input, shape index: {}]   ;;  %s9337_s6 = inlined_call_operand.vmem [shape: f32[1,128], index: 6, kind: input, shape index: {}]   ;;  %s9338_s7 = inlined_call_operand.vmem [shape: f32[8,312], index: 7, kind: input, shape index: {}]   ;;  %s9339_s8 = inlined_call_operand.hbm [shape: f32[16,128], index: 8, kind: output, shape index: {}]  }
   0x1   :  { %15 = vsyncpa [#allocation4 + $0x1], 0  ;;  %s5989_s27 = smov 0   ;;  %s5991_s28 = smov 0  }
   0x2   :  { %s5993_s29 = smov 0   ;;  %s5995_s30 = smov 0  }
   0x3 LB: > { %s6010_s9 = sadd.s32 4294967295, %s5937_s30   ;;  %s4919_s10 = sadd.s32 4294967294, %s5937_s30   ;;  %s5937_s30 = sphi %s5995_s30, %s9651_s30   ;;  %s5933_s29 = sphi %s5993_s29, %s9650_s29   ;;  %s5929_s28 = sphi %s5991_s28, %s9649_s28   ;;  %s5925_s27 = sphi %s5989_s27, %s9648_s27  }
   0x4   : > { %s6014_s11 = sadd.s32 1, %s5937_s30   ;;  %s201_s12 = sadd.s32 1, %s5933_s29 }
   0x5   : > { %s198_s13 = ssub.s32 %s5937_s30, %s6014_s11  ;;  %p211_p0 = scmp.ne.s32.totalorder %s5933_s29, %s5929_s28 }
   0x6   : > { %p199_p1 = scmp.eq.s32.totalorder %s198_s13, 0  ;;  %p212_p2 = scmp.eq.s32.totalorder %s6010_s9, 1 }
   0x7   : > { %p217_p3 = scmp.ne.s32.totalorder %s5929_s28, %s5925_s27  ;;  %p218_p4 = scmp.eq.s32.totalorder %s4919_s10, 1 }
   0x8   : > { %s6025_s14 = scalar_select %p199_p1, %s5933_s29, %s201_s12  }
   0x9   : > { %p6027_p5 = por %p212_p2, %p211_p0  ;;  %p6031_p6 = por %p218_p4, %p217_p3 }
   0xa   : > { %p4922_p7 = scmp.ge.s32.totalorder %s5937_s30, 1  ;;  %p266_p8 = scmp.lt.s32.totalorder %s5937_s30, 3 }
   0xc   : > { %p267_p9 = pnand %p4922_p7, %p266_p8 }
   0xe   : > { %270 = sbr.rel (%p267_p9) target bundleno = 1430 (0x596), region = 52 }
  0x15   : > { %s300_s17 = smul.u32 80, %s6010_s9  ;;  %v5939_v0 = vmov 0   ;;  %v4926_v29 = vld [vmem:[%s9334_s3 + $0x40] sm:$0xff]  ;;  %v4927_v30 = vld [vmem:[%s9334_s3 + $0x48] sm:$0xff]  ;;  %v9340_v32 = vmov 0.0|0.0   ;;  %v4928_v37 = vld [vmem:[%s9334_s3 + $0x50] sm:$0xff] }
  0x16   : > { %5871 = vset.pattern.permute.xlu1 %v5939_v0  ;;  %5870 = vset.pattern.permute.xlu0 %v5939_v0  ;;  %v5719_v31 = vpack.c.bf16 %v4927_v30, %v4926_v29  ;;  %v4929_v38 = vld [vmem:[%s9334_s3 + $0x58] sm:$0xff]  ;;  %v4930_v46 = vld [vmem:[%s9334_s3 + $0x60] sm:$0xff]  ;;  %v4931_v47 = vld [vmem:[%s9334_s3 + $0x68] sm:$0xff]  ;;  %vm2963_vm0 = vcmask 523264   ;;  %vm5941_vm1 = vmmov 0   ;;  %v9363_v60 = vmov 0.0  }
  0x17   : > { %p301_p10 = scmp.lt.s32.totalorder %s300_s17, 159  ;;  %5718 = vmatprep.subr.bf16.mxu0 %v9340_v32  ;;  %5819 = vmatprep.subr.bf16.mxu1 %v9340_v32  ;;  %v5722_v39 = vpack.c.bf16 %v4929_v38, %v4928_v37  ;;  %v5725_v48 = vpack.c.bf16 %v4931_v47, %v4930_v46  ;;  %v4932_v53 = vld [vmem:[%s9334_s3 + $0x70] sm:$0xff]  ;;  %v4933_v54 = vld [vmem:[%s9334_s3 + $0x78] sm:$0xff]  ;;  %3043 = vst.msk [vmem:[#allocation2 + $0x278] sm:$0xff] %vm2963_vm0, %v9363_v60  ;;  %vm1034_vm2 = vcmask 1046528   ;;  %vm1516_vm3 = vcmask 1045504  }
  0x18   : > { %5720 = vmatpush3.bf16.msra.mxu0 %v5719_v31  ;;  %5823 = vmatpush3.bf16.msra.mxu1 %v5719_v31  ;;  %v5728_v55 = vpack.c.bf16 %v4933_v54, %v4932_v53  ;;  %vm1998_vm4 = vcmask 1044480   ;;  %vm2480_vm5 = vcmask 1043456   ;;  %vm4608_vm6 = vcmask 457728   ;;  %s5063_s20 = sshll.u32 %s6010_s9, 7  ;;  %s5943_s9 = smov [#allocation3]  }
  0x19   : > { %s9653_s17 = smov (!%p301_p10, %s300_s17), 159  ;;  %5721 = vmatprep.subr.bf16.mxu0 %v9340_v32  ;;  %5820 = vmatprep.subr.bf16.mxu1 %v9340_v32  ;;  %s9289_s26 = scalar_lea.hbm %s9339_s8, %s5063_s20 }
  0x1a   : > { %s4924_s18 = sshll.u32 %s9653_s17, 3  ;;  %5283 = vmatprep.mubr.msk.f32.mxu0 %vm5941_vm1, %v9363_v60  ;;  %5361 = vmatprep.mubr.msk.f32.mxu1 %vm5941_vm1, %v9363_v60  ;;  %s5879_s13 = sshll.u32 %s5943_s9, 4  ;;  %s5880_s13 = int_to_ptr.vmem [resolvable:$false] %s5879_s13 }
  0x1b   : > { %s6041_s21 = scalar_lea.vmem %s9331_s0, %s4924_s18 }
  0x1c   : > { %v308_v1 = vld [vmem:[%s6041_s21 + $0x10] sm:$0xff]  ;;  %v306_v2 = vld [vmem:[%s6041_s21] sm:$0xff]  ;;  %v309_v3 = vld [vmem:[%s6041_s21 + $0x18] sm:$0xff]  ;;  %5723 = vmatpush3.bf16.msra.mxu0 %v5722_v39  ;;  %5824 = vmatpush3.bf16.msra.mxu1 %v5722_v39 }
  0x1d   : > { %399 = vperm.xlu1 %5871, %v308_v1   ;;  %389 = vperm.xlu0 %5870, %v306_v2   ;;  %v307_v4 = vld [vmem:[%s6041_s21 + $0x8] sm:$0xff]  ;;  %v310_v6 = vld [vmem:[%s6041_s21 + $0x20] sm:$0xff]  ;;  %v313_v7 = vld [vmem:[%s6041_s21 + $0x38] sm:$0xff] }
  0x1e   : > { %v311_v5 = vld [vmem:[%s6041_s21 + $0x28] sm:$0xff]  ;;  %v312_v8 = vld [vmem:[%s6041_s21 + $0x30] sm:$0xff]  ;;  %v314_v10 = vld [vmem:[%s6041_s21 + $0x40] sm:$0xff]  ;;  %5724 = vmatprep.subr.bf16.mxu0 %v9340_v32  ;;  %5821 = vmatprep.subr.bf16.mxu1 %v9340_v32 }
  0x1f   : > { %v315_v9 = vld [vmem:[%s6041_s21 + $0x48] sm:$0xff]  ;;  %v317_v11 = vld [vmem:[%s6041_s21 + $0x58] sm:$0xff]  ;;  %v316_v12 = vld [vmem:[%s6041_s21 + $0x50] sm:$0xff] }
  0x20   : > { %v319_v13 = vld [vmem:[%s6041_s21 + $0x68] sm:$0xff]  ;;  %v318_v14 = vld [vmem:[%s6041_s21 + $0x60] sm:$0xff]  ;;  %v321_v15 = vld [vmem:[%s6041_s21 + $0x78] sm:$0xff]  ;;  %5726 = vmatpush3.bf16.msra.mxu0 %v5725_v48  ;;  %5825 = vmatpush3.bf16.msra.mxu1 %v5725_v48 }
  0x21   : > { %404 = vperm.xlu1 %5871, %v309_v3   ;;  %394 = vperm.xlu0 %5870, %v307_v4   ;;  %v320_v16 = vld [vmem:[%s6041_s21 + $0x70] sm:$0xff]  ;;  %v323_v17 = vld [vmem:[%s6041_s21 + $0x88] sm:$0xff]  ;;  %v322_v18 = vld [vmem:[%s6041_s21 + $0x80] sm:$0xff] }
  0x22   : > { %v325_v19 = vld [vmem:[%s6041_s21 + $0x98] sm:$0xff]  ;;  %v324_v20 = vld [vmem:[%s6041_s21 + $0x90] sm:$0xff]  ;;  %v327_v21 = vld [vmem:[%s6041_s21 + $0xa8] sm:$0xff]  ;;  %5727 = vmatprep.subr.bf16.mxu0 %v9340_v32  ;;  %5822 = vmatprep.subr.bf16.mxu1 %v9340_v32 }
  0x23   : > { %v326_v22 = vld [vmem:[%s6041_s21 + $0xa0] sm:$0xff]  ;;  %v329_v23 = vld [vmem:[%s6041_s21 + $0xb8] sm:$0xff]  ;;  %v328_v24 = vld [vmem:[%s6041_s21 + $0xb0] sm:$0xff] }
  0x24   : > { %v331_v25 = vld [vmem:[%s6041_s21 + $0xc8] sm:$0xff]  ;;  %v330_v26 = vld [vmem:[%s6041_s21 + $0xc0] sm:$0xff]  ;;  %v333_v27 = vld [vmem:[%s6041_s21 + $0xd8] sm:$0xff]  ;;  %5729 = vmatpush3.bf16.msra.mxu0 %v5728_v55  ;;  %5826 = vmatpush3.bf16.msra.mxu1 %v5728_v55 }
  0x25   : > { %414 = vperm.xlu1 %5871, %v311_v5   ;;  %409 = vperm.xlu0 %5870, %v310_v6   ;;  %v332_v28 = vld [vmem:[%s6041_s21 + $0xd0] sm:$0xff]  ;;  %v358_v33 = vld [vmem:[%s6041_s21 + $0x1a0] sm:$0xff]  ;;  %v359_v36 = vld [vmem:[%s6041_s21 + $0x1a8] sm:$0xff] }
  0x26   : > { %v334_v34 = vld [vmem:[%s6041_s21 + $0xe0] sm:$0xff]  ;;  %v360_v35 = vld [vmem:[%s6041_s21 + $0x1b0] sm:$0xff]  ;;  %v361_v41 = vld [vmem:[%s6041_s21 + $0x1b8] sm:$0xff]  ;;  %5730 = vmatprep.subr.bf16.mxu1 %v9340_v32  ;;  %5742 = vmatprep.subr.bf16.mxu0 %v9340_v32 }
  0x27   : > { %v362_v40 = vld [vmem:[%s6041_s21 + $0x1c0] sm:$0xff]  ;;  %v336_v42 = vld [vmem:[%s6041_s21 + $0xf0] sm:$0xff]  ;;  %v335_v43 = vld [vmem:[%s6041_s21 + $0xe8] sm:$0xff] }
  0x28   : > { %v364_v44 = vld [vmem:[%s6041_s21 + $0x1d0] sm:$0xff]  ;;  %v363_v45 = vld [vmem:[%s6041_s21 + $0x1c8] sm:$0xff]  ;;  %v338_v49 = vld [vmem:[%s6041_s21 + $0x100] sm:$0xff] }
  0x29   : > { %424 = vperm.xlu1 %5871, %v313_v7   ;;  %419 = vperm.xlu0 %5870, %v312_v8   ;;  %v337_v50 = vld [vmem:[%s6041_s21 + $0xf8] sm:$0xff]  ;;  %v366_v51 = vld [vmem:[%s6041_s21 + $0x1e0] sm:$0xff]  ;;  %v340_v56 = vld [vmem:[%s6041_s21 + $0x110] sm:$0xff] }
  0x2a   : > { %v365_v52 = vld [vmem:[%s6041_s21 + $0x1d8] sm:$0xff]  ;;  %v339_v57 = vld [vmem:[%s6041_s21 + $0x108] sm:$0xff]  ;;  %v368_v58 = vld [vmem:[%s6041_s21 + $0x1f0] sm:$0xff] }
  0x2b   : > { %v367_v59 = vld [vmem:[%s6041_s21 + $0x1e8] sm:$0xff]  ;;  %v342_v61 = vld [vmem:[%s6041_s21 + $0x120] sm:$0xff]  ;;  %v341_v62 = vld [vmem:[%s6041_s21 + $0x118] sm:$0xff] }
  0x2c   : > { %v370_v63 = vld [vmem:[%s6041_s21 + $0x200] sm:$0xff]  ;;  %v369_v0 = vld [vmem:[%s6041_s21 + $0x1f8] sm:$0xff]  ;;  %v344_v1 = vld [vmem:[%s6041_s21 + $0x130] sm:$0xff] }
  0x2d   : > { %434 = vperm.xlu1 %5871, %v315_v9   ;;  %429 = vperm.xlu0 %5870, %v314_v10   ;;  %v343_v2 = vld [vmem:[%s6041_s21 + $0x128] sm:$0xff]  ;;  %v372_v3 = vld [vmem:[%s6041_s21 + $0x210] sm:$0xff]  ;;  %v346_v5 = vld [vmem:[%s6041_s21 + $0x140] sm:$0xff] }
  0x2e   : > { %v371_v4 = vld [vmem:[%s6041_s21 + $0x208] sm:$0xff]  ;;  %v345_v6 = vld [vmem:[%s6041_s21 + $0x138] sm:$0xff]  ;;  %v374_v7 = vld [vmem:[%s6041_s21 + $0x220] sm:$0xff] }
  0x2f   : > { %v373_v8 = vld [vmem:[%s6041_s21 + $0x218] sm:$0xff]  ;;  %v348_v9 = vld [vmem:[%s6041_s21 + $0x150] sm:$0xff]  ;;  %v347_v10 = vld [vmem:[%s6041_s21 + $0x148] sm:$0xff] }
  0x30   : > { %v377_v29 = vld [vmem:[%s6041_s21 + $0x238] sm:$0xff]  ;;  %v351_v46 = vld [vmem:[%s6041_s21 + $0x168] sm:$0xff] }
  0x31   : > { %444 = vperm.xlu1 %5871, %v317_v11   ;;  %439 = vperm.xlu0 %5870, %v316_v12   ;;  %v782_v11 = vlaneseq  ;;  %v376_v12 = vld [vmem:[%s6041_s21 + $0x230] sm:$0xff] }
  0x35   : > { %454 = vperm.xlu1 %5871, %v319_v13   ;;  %449 = vperm.xlu0 %5870, %v318_v14   ;;  %v375_v13 = vld [vmem:[%s6041_s21 + $0x228] sm:$0xff]  ;;  %v783_v14 = vshrl.u32 %v782_v11, 7 }
  0x39   : > { %464 = vperm.xlu1 %5871, %v321_v15   ;;  %459 = vperm.xlu0 %5870, %v320_v16   ;;  %v350_v15 = vld [vmem:[%s6041_s21 + $0x160] sm:$0xff]  ;;  %v349_v16 = vld [vmem:[%s6041_s21 + $0x158] sm:$0xff] }
  0x3d   : > { %474 = vperm.xlu1 %5871, %v323_v17   ;;  %469 = vperm.xlu0 %5870, %v322_v18   ;;  %v784_v17 = vsub.s32 0, %v783_v14  ;;  %v872_v18 = vsub.s32 1, %v783_v14 }
  0x41   : > { %484 = vperm.xlu1 %5871, %v325_v19   ;;  %479 = vperm.xlu0 %5870, %v324_v20   ;;  %v1354_v19 = vsub.s32 2, %v783_v14  ;;  %v386_v20 = vld [vmem:[%s9332_s1] sm:$0x1f] }
  0x45   : > { %494 = vperm.xlu1 %5871, %v327_v21   ;;  %489 = vperm.xlu0 %5870, %v326_v22   ;;  %v1836_v21 = vsub.s32 3, %v783_v14  ;;  %v2318_v22 = vsub.s32 4, %v783_v14 }
  0x49   : > { %504 = vperm.xlu1 %5871, %v329_v23   ;;  %499 = vperm.xlu0 %5870, %v328_v24   ;;  %v6150_v23 = vrot.slane %v386_v20, %v784_v17  ;;  %v6152_v24 = vrot.slane %v386_v20, %v872_v18  ;;  %v354_v17 = vld [vmem:[%s6041_s21 + $0x180] sm:$0xff] }
  0x4d   : > { %514 = vperm.xlu1 %5871, %v331_v25   ;;  %509 = vperm.xlu0 %5870, %v330_v26   ;;  %v6154_v25 = vrot.slane %v386_v20, %v1354_v19  ;;  %v378_v26 = vld [vmem:[%s6041_s21 + $0x240] sm:$0xff] }
  0x51   : > { %524 = vperm.xlu1 %5871, %v333_v27   ;;  %519 = vperm.xlu0 %5870, %v332_v28   ;;  %v6157_v27 = vrot.slane %v386_v20, %v1836_v21  ;;  %v6159_v28 = vrot.slane %v386_v20, %v2318_v22  ;;  %v353_v22 = vld [vmem:[%s6041_s21 + $0x178] sm:$0xff] }
  0x55   : > { %649 = vperm.xlu1 %5871, %v358_v33   ;;  %529 = vperm.xlu0 %5870, %v334_v34  }
  0x59   : > { %659 = vperm.xlu1 %5871, %v360_v35   ;;  %654 = vperm.xlu0 %5870, %v359_v36  }
  0x5d   : > { %669 = vperm.xlu1 %5871, %v362_v40   ;;  %664 = vperm.xlu0 %5870, %v361_v41   ;;  %v352_v41 = vld [vmem:[%s6041_s21 + $0x170] sm:$0xff] }
  0x61   : > { %539 = vperm.xlu1 %5871, %v336_v42   ;;  %534 = vperm.xlu0 %5870, %v335_v43  }
  0x65   : > { %679 = vperm.xlu1 %5871, %v364_v44   ;;  %674 = vperm.xlu0 %5870, %v363_v45  }
  0x69   : > { %549 = vperm.xlu1 %5871, %v338_v49   ;;  %544 = vperm.xlu0 %5870, %v337_v50  }
  0x6d   : > { %689 = vperm.xlu1 %5871, %v366_v51   ;;  %684 = vperm.xlu0 %5870, %v365_v52  }
  0x71   : > { %559 = vperm.xlu1 %5871, %v340_v56   ;;  %554 = vperm.xlu0 %5870, %v339_v57  }
  0x75   : > { %699 = vperm.xlu1 %5871, %v368_v58   ;;  %694 = vperm.xlu0 %5870, %v367_v59  }
  0x79   : > { %569 = vperm.xlu1 %5871, %v342_v61   ;;  %564 = vperm.xlu0 %5870, %v341_v62   ;;  %v380_v62 = vld [vmem:[%s6041_s21 + $0x250] sm:$0xff] }
  0x7d   : > { %709 = vperm.xlu1 %5871, %v370_v63   ;;  %704 = vperm.xlu0 %5870, %v369_v0  }
  0x81   : > { %579 = vperm.xlu1 %5871, %v344_v1   ;;  %574 = vperm.xlu0 %5870, %v343_v2  }
  0x85   : > { %719 = vperm.xlu1 %5871, %v372_v3   ;;  %714 = vperm.xlu0 %5870, %v371_v4   ;;  %v379_v3 = vld [vmem:[%s6041_s21 + $0x248] sm:$0xff] }
  0x89   : > { %589 = vperm.xlu1 %5871, %v346_v5   ;;  %584 = vperm.xlu0 %5870, %v345_v6  }
  0x8d   : > { %729 = vperm.xlu1 %5871, %v374_v7   ;;  %724 = vperm.xlu0 %5870, %v373_v8  }
  0x91   : > { %599 = vperm.xlu1 %5871, %v348_v9   ;;  %594 = vperm.xlu0 %5870, %v347_v10  }
  0x95   : > { %739 = vperm.xlu1 %5871, %v376_v12   ;;  %734 = vperm.xlu0 %5870, %v375_v13  }
  0x99   : > { %609 = vperm.xlu1 %5871, %v350_v15   ;;  %604 = vperm.xlu0 %5870, %v349_v16  }
  0x9c   : > { %v400_v30 = vpop.permute.xlu1 %399  ;;  %v390_v31 = vpop.permute.xlu0 %389 }
  0x9d   : > { %v788_v33 = vmul.f32 %v6150_v23, %v400_v30  ;;  %v876_v34 = vmul.f32 %v6152_v24, %v400_v30  ;;  %v1358_v35 = vmul.f32 %v6154_v25, %v400_v30  ;;  %v1840_v36 = vmul.f32 %v6157_v27, %v400_v30  ;;  %749 = vperm.xlu1 %5871, %v378_v26  }
  0x9e   : > { %v6167_v37 = vmul.f32 %v6159_v28, %v400_v30  ;;  %v786_v38 = vmul.f32 %v6150_v23, %v390_v31  ;;  %v874_v39 = vmul.f32 %v6152_v24, %v390_v31  ;;  %v1356_v40 = vmul.f32 %v6154_v25, %v390_v31  ;;  %744 = vperm.xlu0 %5870, %v377_v29  }
  0x9f   : > { %v1038_v42 = vrot.slane %v876_v34, 1  ;;  %v1520_v43 = vrot.slane %v1358_v35, 2  ;;  %v2002_v44 = vrot.slane %v1840_v36, 3  ;;  %v1838_v45 = vmul.f32 %v6157_v27, %v390_v31 }
  0xa0   : > { %v2484_v47 = vrot.slane %v6167_v37, 4  ;;  %v1035_v48 = vrot.slane %v874_v39, 1  ;;  %v1517_v49 = vrot.slane %v1356_v40, 2  ;;  %v2320_v50 = vmul.f32 %v6159_v28, %v390_v31  ;;  %v405_v51 = vpop.permute.xlu1 %404  ;;  %v395_v52 = vpop.permute.xlu0 %394 }
  0xa1   : > { %v1999_v53 = vrot.slane %v1838_v45, 3  ;;  %v6178_v54 = vmul.f32 %v6150_v23, %v405_v51  ;;  %v6181_v55 = vmul.f32 %v6152_v24, %v405_v51  ;;  %v6184_v56 = vmul.f32 %v6154_v25, %v405_v51  ;;  %619 = vperm.xlu1 %5871, %v352_v41  }
  0xa2   : > { %v2481_v57 = vrot.slane %v2320_v50, 4  ;;  %v6187_v58 = vmul.f32 %v6157_v27, %v405_v51  ;;  %v6190_v59 = vmul.f32 %v6159_v28, %v405_v51  ;;  %v787_v61 = vmul.f32 %v6150_v23, %v395_v52  ;;  %614 = vperm.xlu0 %5870, %v351_v46  }
  0xa3   : > { %v1040_v63 = vrot.slane %v6181_v55, 1  ;;  %v1522_v0 = vrot.slane %v6184_v56, 2  ;;  %v875_v1 = vmul.f32 %v6152_v24, %v395_v52  ;;  %v1357_v2 = vmul.f32 %v6154_v25, %v395_v52 }
  0xa4   : > { %v2004_v4 = vrot.slane %v6187_v58, 3  ;;  %v2486_v5 = vrot.slane %v6190_v59, 4  ;;  %v1839_v6 = vmul.f32 %v6157_v27, %v395_v52  ;;  %v2321_v7 = vmul.f32 %v6159_v28, %v395_v52  ;;  %v415_v16 = vpop.permute.xlu1 %414 }
  0xa5   : > { %v1041_v8 = vsel %vm1034_vm2, %v1038_v42, %v1040_v63  ;;  %v1523_v9 = vsel %vm1516_vm3, %v1520_v43, %v1522_v0  ;;  %v1036_v10 = vrot.slane %v875_v1, 1  ;;  %v1518_v11 = vrot.slane %v1357_v2, 2  ;;  %759 = vperm.xlu1 %5871, %v380_v62  }
  0xa6   : > { %v1275_v12 = vadd.f32 %v1041_v8, %v788_v33  ;;  %v2005_v13 = vsel %vm1998_vm4, %v2002_v44, %v2004_v4  ;;  %v2487_v14 = vsel %vm2480_vm5, %v2484_v47, %v2486_v5  ;;  %v2000_v15 = vrot.slane %v1839_v6, 3  ;;  %754 = vperm.xlu0 %5870, %v379_v3  }
  0xa7   : > { %v1037_v18 = vsel %vm1034_vm2, %v1035_v48, %v1036_v10  ;;  %v1039_v19 = vsel %vm1034_vm2, %v1036_v10, %v1038_v42  ;;  %v1519_v20 = vsel %vm1516_vm3, %v1517_v49, %v1518_v11  ;;  %v1521_v21 = vsel %vm1516_vm3, %v1518_v11, %v1520_v43  ;;  %v382_v42 = vld [vmem:[%s6041_s21 + $0x260] sm:$0xff]  ;;  %v381_v49 = vld [vmem:[%s6041_s21 + $0x258] sm:$0xff] }
  0xa8   : > { %v1757_v26 = vadd.f32 %v1523_v9, %v1275_v12  ;;  %v1273_v29 = vadd.f32 %v1037_v18, %v786_v38  ;;  %v1274_v30 = vadd.f32 %v1039_v19, %v787_v61  ;;  %v2001_v31 = vsel %vm1998_vm4, %v1999_v53, %v2000_v15  ;;  %v410_v38 = vpop.permute.xlu0 %409  ;;  %v6236_v43 = vld [vmem:[%s9333_s2] ss:$0 sm:$0xff]  ;;  %v355_v12 = vld [vmem:[%s6041_s21 + $0x188] sm:$0xff] }
  0xa9   : > { %v2003_v33 = vsel %vm1998_vm4, %v2000_v15, %v2002_v44  ;;  %v2482_v34 = vrot.slane %v2321_v7, 4  ;;  %v6224_v35 = vmul.f32 %v6150_v23, %v415_v16  ;;  %v6227_v36 = vmul.f32 %v6152_v24, %v415_v16  ;;  %629 = vperm.xlu1 %5871, %v354_v17   ;;  %v356_v7 = vld [vmem:[%s6041_s21 + $0x190] sm:$0xff]  ;;  %v425_v17 = vpop.permute.xlu1 %424 }
  0xaa   : > { %v2239_v37 = vadd.f32 %v2005_v13, %v1757_v26  ;;  %v1755_v39 = vadd.f32 %v1519_v20, %v1273_v29  ;;  %v1756_v40 = vadd.f32 %v1521_v21, %v1274_v30  ;;  %v6230_v41 = vmul.f32 %v6154_v25, %v415_v16  ;;  %624 = vperm.xlu0 %5870, %v353_v22  }
  0xab   : > { %v2483_v44 = vsel %vm2480_vm5, %v2481_v57, %v2482_v34  ;;  %v2485_v45 = vsel %vm2480_vm5, %v2482_v34, %v2484_v47  ;;  %v1044_v46 = vrot.slane %v6227_v36, 1  ;;  %v6242_v48 = vmul.f32 %v6157_v27, %v415_v16 }
  0xac   : > { %v2721_v50 = vadd.f32 %v2487_v14, %v2239_v37  ;;  %v2237_v51 = vadd.f32 %v2001_v31, %v1755_v39  ;;  %v2238_v52 = vadd.f32 %v2003_v33, %v1756_v40  ;;  %v1526_v53 = vrot.slane %v6230_v41, 2  ;;  %v384_v31 = vld [vmem:[%s6041_s21 + $0x270] sm:$0xff]  ;;  %v383_v37 = vld [vmem:[%s6041_s21 + $0x268] sm:$0xff] }
  0xad   : > { %v2008_v61 = vrot.slane %v6242_v48, 3  ;;  %v6248_v62 = vmul.f32 %v6159_v28, %v415_v16  ;;  %v790_v47 = vmul.f32 %v6150_v23, %v410_v38  ;;  %v878_v57 = vmul.f32 %v6152_v24, %v410_v38  ;;  %769 = vperm.xlu1 %5871, %v382_v42  }
  0xae   : > { %v2807_v1 = vadd.f32 %v6236_v43, %v2721_v50  ;;  %v2719_v2 = vadd.f32 %v2483_v44, %v2237_v51  ;;  %v2720_v3 = vadd.f32 %v2485_v45, %v2238_v52  ;;  %v1360_v6 = vmul.f32 %v6154_v25, %v410_v38  ;;  %764 = vperm.xlu0 %5870, %v381_v49   ;;  %v435_v49 = vpop.permute.xlu1 %434  ;;  %v385_v50 = vld [vmem:[%s6041_s21 + $0x278] sm:$0xff] }
  0xaf   : > { %v2490_v8 = vrot.slane %v6248_v62, 4  ;;  %v1042_v9 = vrot.slane %v878_v57, 1  ;;  %v1842_v10 = vmul.f32 %v6157_v27, %v410_v38  ;;  %v2324_v11 = vmul.f32 %v6159_v28, %v410_v38 }
  0xb0   : > { %v2886_v13 = vmax.f32 %v2807_v1, 0.0  ;;  %v2805_v14 = vadd.f32 %v6236_v43, %v2719_v2  ;;  %v2806_v15 = vadd.f32 %v6236_v43, %v2720_v3  ;;  %v1524_v16 = vrot.slane %v1360_v6, 2  ;;  %v357_v1 = vld [vmem:[%s6041_s21 + $0x198] sm:$0xff]  ;;  %s297_s21 = sand.u32 1, %s5929_s28  }
  0xb1   : > { %v1043_v18 = vsel %vm1034_vm2, %v1040_v63, %v1042_v9  ;;  %v1045_v19 = vsel %vm1034_vm2, %v1042_v9, %v1044_v46  ;;  %v2006_v20 = vrot.slane %v1842_v10, 3  ;;  %v2488_v21 = vrot.slane %v2324_v11, 4  ;;  %639 = vperm.xlu1 %5871, %v356_v7   ;;  %s4923_s17 = sshll.u32 %s297_s21, 3  ;;  %s4847_s10 = scalar_lea.sflag [#allocation4], %s297_s21 }
  0xb2   : > { %2966 = vst.msk [vmem:[#allocation2 + $0x10] sm:$0xff] %vm2963_vm0, %v2886_v13  ;;  %v2884_v22 = vmax.f32 %v2805_v14, 0.0  ;;  %v2885_v26 = vmax.f32 %v2806_v15, 0.0  ;;  %v1276_v29 = vadd.f32 %v1043_v18, %v6178_v54  ;;  %v1277_v30 = vadd.f32 %v1045_v19, %v790_v47  ;;  %634 = vperm.xlu0 %5870, %v355_v12   ;;  %v420_v54 = vpop.permute.xlu0 %419  ;;  %s299_s22 = scalar_lea.vmem [#allocation3], %s4923_s17  ;;  %s5881_s17 = scalar_lea.vmem %s5880_s13, 256 }
  0xb3   : > { %v1525_v55 = vsel %vm1516_vm3, %v1522_v0, %v1524_v16  ;;  %v1527_v63 = vsel %vm1516_vm3, %v1524_v16, %v1526_v53  ;;  %v2007_v33 = vsel %vm1998_vm4, %v2004_v4, %v2006_v20  ;;  %v2009_v34 = vsel %vm1998_vm4, %v2006_v20, %v2008_v61  ;;  %s4860_s23 = sshll.u32 %s299_s22, 4  ;;  %s9291_s23 = int_to_ptr.vmem [resolvable:$true] %s4860_s23 }
  0xb4   : > { %2964 = vst.msk [vmem:[#allocation2] sm:$0xff] %vm2963_vm0, %v2884_v22  ;;  %2965 = vst.msk [vmem:[#allocation2 + $0x8] sm:$0xff] %vm2963_vm0, %v2885_v26  ;;  %v1758_v56 = vadd.f32 %v1525_v55, %v1276_v29  ;;  %v1759_v0 = vadd.f32 %v1527_v63, %v1277_v30  ;;  %v2489_v39 = vsel %vm2480_vm5, %v2486_v5, %v2488_v21  ;;  %s5875_s12 = scalar_lea.vmem %s9291_s23, 128  ;;  %p5882_p0 = scmp.lt.s32.totalorder %s9291_s23, %s5880_s13 }
  0xb5   : > { %v2491_v58 = vsel %vm2480_vm5, %v2488_v21, %v2490_v8  ;;  %v6292_v4 = vmul.f32 %v6150_v23, %v425_v17  ;;  %v6295_v40 = vmul.f32 %v6152_v24, %v425_v17  ;;  %v6298_v38 = vmul.f32 %v6154_v25, %v425_v17  ;;  %779 = vperm.xlu1 %5871, %v384_v31   ;;  %p5876_p11 = scmp.ne.s32.totalorder %s9291_s23, %s5875_s12  ;;  %p5883_p1 = scmp.lt.s32.totalorder %s5881_s17, %s5875_s12 }
  0xb6   : > { %v6301_v42 = vmul.f32 %v6157_v27, %v425_v17  ;;  %v2240_v59 = vadd.f32 %v2007_v33, %v1758_v56  ;;  %v2241_v5 = vadd.f32 %v2009_v34, %v1759_v0  ;;  %v6304_v44 = vmul.f32 %v6159_v28, %v425_v17  ;;  %774 = vperm.xlu0 %5870, %v383_v37   ;;  %v430_v55 = vpop.permute.xlu0 %429  ;;  %v445_v56 = vpop.permute.xlu1 %444 }
  0xb7   : > { %v792_v45 = vmul.f32 %v6150_v23, %v420_v54  ;;  %v1048_v51 = vrot.slane %v6295_v40, 1  ;;  %v1530_v52 = vrot.slane %v6298_v38, 2  ;;  %v880_v57 = vmul.f32 %v6152_v24, %v420_v54  ;;  %p5877_p12 = pnand %p5876_p11, %p6027_p5  ;;  %p5884_p2 = por %p5883_p1, %p5882_p0 }
  0xb8   : > { %v2012_v47 = vrot.slane %v6301_v42, 3  ;;  %v2722_v2 = vadd.f32 %v2489_v39, %v2240_v59  ;;  %v2723_v3 = vadd.f32 %v2491_v58, %v2241_v5  ;;  %v2494_v6 = vrot.slane %v6304_v44, 4 }
  0xb9   : > { %v1362_v7 = vmul.f32 %v6154_v25, %v420_v54  ;;  %v1046_v9 = vrot.slane %v880_v57, 1  ;;  %v1844_v10 = vmul.f32 %v6157_v27, %v420_v54  ;;  %v2326_v11 = vmul.f32 %v6159_v28, %v420_v54  ;;  %867 = vperm.xlu1 %5871, %v385_v50   ;;  %p5878_p13 = pneg %p5877_p12 }
  0xba   : > { %v6318_v12 = vmul.f32 %v6150_v23, %v435_v49  ;;  %v2808_v13 = vadd.f32 %v6236_v43, %v2722_v2  ;;  %v2809_v14 = vadd.f32 %v6236_v43, %v2723_v3  ;;  %v6323_v16 = vmul.f32 %v6152_v24, %v435_v49  ;;  %644 = vperm.xlu0 %5870, %v357_v1  }
  0xbb   : > { %v1528_v15 = vrot.slane %v1362_v7, 2  ;;  %v1047_v17 = vsel %vm1034_vm2, %v1044_v46, %v1046_v9  ;;  %v1049_v18 = vsel %vm1034_vm2, %v1046_v9, %v1048_v51  ;;  %v2010_v19 = vrot.slane %v1844_v10, 3  ;;  %p5885_p3 = pnand %p5884_p2, %p5878_p13 }
  0xbc   : > { %v2492_v20 = vrot.slane %v2326_v11, 4  ;;  %v2887_v21 = vmax.f32 %v2808_v13, 0.0  ;;  %v2888_v22 = vmax.f32 %v2809_v14, 0.0  ;;  %v1278_v26 = vadd.f32 %v1047_v17, %v6224_v35 }
  0xbd   : > { %v1279_v29 = vadd.f32 %v1049_v18, %v792_v45  ;;  %v1529_v30 = vsel %vm1516_vm3, %v1526_v53, %v1528_v15  ;;  %v1531_v31 = vsel %vm1516_vm3, %v1528_v15, %v1530_v52  ;;  %v2011_v36 = vsel %vm1998_vm4, %v2008_v61, %v2010_v19 }
  0xbe   : > { %v2013_v46 = vsel %vm1998_vm4, %v2010_v19, %v2012_v47  ;;  %2967 = vst.msk [vmem:[#allocation2 + $0x18] sm:$0xff] %vm2963_vm0, %v2887_v21  ;;  %2968 = vst.msk [vmem:[#allocation2 + $0x20] sm:$0xff] %vm2963_vm0, %v2888_v22  ;;  %v1760_v35 = vadd.f32 %v1529_v30, %v1278_v26  ;;  %v2493_v53 = vsel %vm2480_vm5, %v2490_v8, %v2492_v20  ;;  %v1052_v61 = vrot.slane %v6323_v16, 1 }
  0xbf   : > { %v1761_v41 = vadd.f32 %v1531_v31, %v1279_v29  ;;  %v2495_v48 = vsel %vm2480_vm5, %v2492_v20, %v2494_v6  ;;  %v6352_v63 = vmul.f32 %v6154_v25, %v435_v49  ;;  %v6355_v33 = vmul.f32 %v6157_v27, %v435_v49  ;;  %v440_v29 = vpop.permute.xlu0 %439 }
  0xc0   : > { %v6358_v34 = vmul.f32 %v6159_v28, %v435_v49  ;;  %v2242_v54 = vadd.f32 %v2011_v36, %v1760_v35  ;;  %v794_v62 = vmul.f32 %v6150_v23, %v430_v55  ;;  %v882_v8 = vmul.f32 %v6152_v24, %v430_v55  ;;  %v455_v35 = vpop.permute.xlu1 %454 }
  0xc1   : > { %v2243_v37 = vadd.f32 %v2013_v46, %v1761_v41  ;;  %v1534_v0 = vrot.slane %v6352_v63, 2  ;;  %v2016_v39 = vrot.slane %v6355_v33, 3  ;;  %v1364_v40 = vmul.f32 %v6154_v25, %v430_v55 }
  0xc2   : > { %v2498_v58 = vrot.slane %v6358_v34, 4  ;;  %v2724_v59 = vadd.f32 %v2493_v53, %v2242_v54  ;;  %v1050_v45 = vrot.slane %v882_v8, 1  ;;  %v1846_v49 = vmul.f32 %v6157_v27, %v430_v55 }
  0xc3   : > { %v2725_v5 = vadd.f32 %v2495_v48, %v2243_v37  ;;  %v1532_v50 = vrot.slane %v1364_v40, 2  ;;  %v2328_v57 = vmul.f32 %v6159_v28, %v430_v55  ;;  %v6369_v1 = vmul.f32 %v6150_v23, %v445_v56 }
  0xc4   : > { %v6372_v2 = vmul.f32 %v6152_v24, %v445_v56  ;;  %v2810_v3 = vadd.f32 %v6236_v43, %v2724_v59  ;;  %v1051_v9 = vsel %vm1034_vm2, %v1048_v51, %v1050_v45  ;;  %v1053_v10 = vsel %vm1034_vm2, %v1050_v45, %v1052_v61 }
  0xc5   : > { %v2811_v7 = vadd.f32 %v6236_v43, %v2725_v5  ;;  %v1280_v11 = vadd.f32 %v1051_v9, %v6292_v4  ;;  %v1281_v13 = vadd.f32 %v1053_v10, %v794_v62  ;;  %v1533_v14 = vsel %vm1516_vm3, %v1530_v52, %v1532_v50 }
  0xc6   : > { %v1535_v15 = vsel %vm1516_vm3, %v1532_v50, %v1534_v0  ;;  %v2889_v17 = vmax.f32 %v2810_v3, 0.0  ;;  %v2014_v19 = vrot.slane %v1846_v49, 3  ;;  %v2496_v20 = vrot.slane %v2328_v57, 4 }
  0xc7   : > { %v2890_v18 = vmax.f32 %v2811_v7, 0.0  ;;  %v1762_v21 = vadd.f32 %v1533_v14, %v1280_v11  ;;  %v1763_v22 = vadd.f32 %v1535_v15, %v1281_v13  ;;  %v1056_v51 = vrot.slane %v6372_v2, 1 }
  0xc8   : > { %v6387_v26 = vmul.f32 %v6154_v25, %v445_v56  ;;  %2969 = vst.msk [vmem:[#allocation2 + $0x28] sm:$0xff] %vm2963_vm0, %v2889_v17  ;;  %v2015_v4 = vsel %vm1998_vm4, %v2012_v47, %v2014_v19  ;;  %v2017_v38 = vsel %vm1998_vm4, %v2014_v19, %v2016_v39  ;;  %v2497_v52 = vsel %vm2480_vm5, %v2494_v6, %v2496_v20 }
  0xc9   : > { %2970 = vst.msk [vmem:[#allocation2 + $0x30] sm:$0xff] %vm2963_vm0, %v2890_v18  ;;  %v2499_v30 = vsel %vm2480_vm5, %v2496_v20, %v2498_v58  ;;  %v2244_v31 = vadd.f32 %v2015_v4, %v1762_v21  ;;  %v2245_v36 = vadd.f32 %v2017_v38, %v1763_v22  ;;  %v6405_v42 = vmul.f32 %v6157_v27, %v445_v56  ;;  %v465_v4 = vpop.permute.xlu1 %464 }
  0xca   : > { %v1538_v46 = vrot.slane %v6387_v26, 2  ;;  %v6408_v47 = vmul.f32 %v6159_v28, %v445_v56  ;;  %v796_v55 = vmul.f32 %v6150_v23, %v440_v29  ;;  %v884_v44 = vmul.f32 %v6152_v24, %v440_v29 }
  0xcb   : > { %v1366_v6 = vmul.f32 %v6154_v25, %v440_v29  ;;  %v2726_v41 = vadd.f32 %v2497_v52, %v2244_v31  ;;  %v2727_v53 = vadd.f32 %v2499_v30, %v2245_v36  ;;  %v2020_v48 = vrot.slane %v6405_v42, 3 }
  0xcc   : > { %v1848_v63 = vmul.f32 %v6157_v27, %v440_v29  ;;  %v2502_v54 = vrot.slane %v6408_v47, 4  ;;  %v1054_v37 = vrot.slane %v884_v44, 1  ;;  %v2330_v8 = vmul.f32 %v6159_v28, %v440_v29 }
  0xcd   : > { %v1536_v62 = vrot.slane %v1366_v6, 2  ;;  %v2812_v56 = vadd.f32 %v6236_v43, %v2726_v41  ;;  %v2813_v40 = vadd.f32 %v6236_v43, %v2727_v53  ;;  %v6420_v5 = vmul.f32 %v6150_v23, %v455_v35 }
  0xce   : > { %v2018_v59 = vrot.slane %v1848_v63, 3  ;;  %v1055_v45 = vsel %vm1034_vm2, %v1052_v61, %v1054_v37  ;;  %v1057_v49 = vsel %vm1034_vm2, %v1054_v37, %v1056_v51  ;;  %v2500_v11 = vrot.slane %v2330_v8, 4 }
  0xcf   : > { %v1537_v50 = vsel %vm1516_vm3, %v1534_v0, %v1536_v62  ;;  %v1539_v57 = vsel %vm1516_vm3, %v1536_v62, %v1538_v46  ;;  %v2891_v3 = vmax.f32 %v2812_v56, 0.0  ;;  %v2892_v7 = vmax.f32 %v2813_v40, 0.0 }
  0xd0   : > { %v1282_v9 = vadd.f32 %v1055_v45, %v6318_v12  ;;  %v1283_v10 = vadd.f32 %v1057_v49, %v796_v55  ;;  %v2019_v16 = vsel %vm1998_vm4, %v2016_v39, %v2018_v59  ;;  %v2021_v61 = vsel %vm1998_vm4, %v2018_v59, %v2020_v48  ;;  %v450_v39 = vpop.permute.xlu0 %449 }
  0xd1   : > { %v6440_v0 = vmul.f32 %v6152_v24, %v455_v35  ;;  %2971 = vst.msk [vmem:[#allocation2 + $0x38] sm:$0xff] %vm2963_vm0, %v2891_v3  ;;  %2972 = vst.msk [vmem:[#allocation2 + $0x40] sm:$0xff] %vm2963_vm0, %v2892_v7  ;;  %v6445_v12 = vmul.f32 %v6154_v25, %v455_v35  ;;  %v6448_v33 = vmul.f32 %v6157_v27, %v455_v35 }
  0xd2   : > { %v1764_v13 = vadd.f32 %v1537_v50, %v1282_v9  ;;  %v1765_v14 = vadd.f32 %v1539_v57, %v1283_v10  ;;  %v2501_v15 = vsel %vm2480_vm5, %v2498_v58, %v2500_v11  ;;  %v2503_v17 = vsel %vm2480_vm5, %v2500_v11, %v2502_v54 }
  0xd3   : > { %v1060_v18 = vrot.slane %v6440_v0, 1  ;;  %v6458_v19 = vmul.f32 %v6159_v28, %v455_v35  ;;  %v1542_v22 = vrot.slane %v6445_v12, 2  ;;  %v2024_v29 = vrot.slane %v6448_v33, 3 }
  0xd4   : > { %v2246_v20 = vadd.f32 %v2019_v16, %v1764_v13  ;;  %v2247_v21 = vadd.f32 %v2021_v61, %v1765_v14  ;;  %v798_v58 = vmul.f32 %v6150_v23, %v450_v39  ;;  %v886_v38 = vmul.f32 %v6152_v24, %v450_v39  ;;  %v460_v3 = vpop.permute.xlu0 %459  ;;  %v475_v13 = vpop.permute.xlu1 %474 }
  0xd5   : > { %v2506_v34 = vrot.slane %v6458_v19, 4  ;;  %v1368_v52 = vmul.f32 %v6154_v25, %v450_v39  ;;  %v1850_v36 = vmul.f32 %v6157_v27, %v450_v39  ;;  %v2332_v55 = vmul.f32 %v6159_v28, %v450_v39 }
  0xd6   : > { %v2728_v30 = vadd.f32 %v2501_v15, %v2246_v20  ;;  %v2729_v31 = vadd.f32 %v2503_v17, %v2247_v21  ;;  %v1058_v44 = vrot.slane %v886_v38, 1  ;;  %v6469_v35 = vmul.f32 %v6150_v23, %v465_v4 }
  0xd7   : > { %v1540_v6 = vrot.slane %v1368_v52, 2  ;;  %v6472_v41 = vmul.f32 %v6152_v24, %v465_v4  ;;  %v2022_v37 = vrot.slane %v1850_v36, 3  ;;  %v2504_v62 = vrot.slane %v2332_v55, 4 }
  0xd8   : > { %v2814_v53 = vadd.f32 %v6236_v43, %v2728_v30  ;;  %v2815_v63 = vadd.f32 %v6236_v43, %v2729_v31  ;;  %v1059_v8 = vsel %vm1034_vm2, %v1056_v51, %v1058_v44  ;;  %v1061_v56 = vsel %vm1034_vm2, %v1058_v44, %v1060_v18 }
  0xd9   : > { %v1541_v40 = vsel %vm1516_vm3, %v1538_v46, %v1540_v6  ;;  %v1543_v59 = vsel %vm1516_vm3, %v1540_v6, %v1542_v22  ;;  %v1284_v50 = vadd.f32 %v1059_v8, %v6369_v1  ;;  %v1285_v57 = vadd.f32 %v1061_v56, %v798_v58 }
  0xda   : > { %v2893_v45 = vmax.f32 %v2814_v53, 0.0  ;;  %v2894_v49 = vmax.f32 %v2815_v63, 0.0  ;;  %v2023_v2 = vsel %vm1998_vm4, %v2020_v48, %v2022_v37  ;;  %v2025_v51 = vsel %vm1998_vm4, %v2022_v37, %v2024_v29 }
  0xdb   : > { %v2505_v26 = vsel %vm2480_vm5, %v2502_v54, %v2504_v62  ;;  %v2507_v46 = vsel %vm2480_vm5, %v2504_v62, %v2506_v34  ;;  %v1766_v1 = vadd.f32 %v1541_v40, %v1284_v50  ;;  %v1767_v42 = vadd.f32 %v1543_v59, %v1285_v57  ;;  %v470_v62 = vpop.permute.xlu0 %469 }
  0xdc   : > { %2973 = vst.msk [vmem:[#allocation2 + $0x48] sm:$0xff] %vm2963_vm0, %v2893_v45  ;;  %2974 = vst.msk [vmem:[#allocation2 + $0x50] sm:$0xff] %vm2963_vm0, %v2894_v49  ;;  %v1064_v48 = vrot.slane %v6472_v41, 1  ;;  %v6503_v7 = vmul.f32 %v6154_v25, %v465_v4  ;;  %v6506_v9 = vmul.f32 %v6157_v27, %v465_v4  ;;  %v6509_v47 = vmul.f32 %v6159_v28, %v465_v4 }
  0xdd   : > { %v800_v54 = vmul.f32 %v6150_v23, %v460_v3  ;;  %v888_v10 = vmul.f32 %v6152_v24, %v460_v3  ;;  %v2248_v16 = vadd.f32 %v2023_v2, %v1766_v1  ;;  %v2249_v61 = vadd.f32 %v2025_v51, %v1767_v42 }
  0xde   : > { %v1546_v11 = vrot.slane %v6503_v7, 2  ;;  %v1370_v0 = vmul.f32 %v6154_v25, %v460_v3  ;;  %v2028_v14 = vrot.slane %v6506_v9, 3  ;;  %v2510_v39 = vrot.slane %v6509_v47, 4  ;;  %v3124_v47 = vld [vmem:[#allocation2 + $0x1] ss:$2 sm:$0xff] }
  0xdf   : > { %v1062_v15 = vrot.slane %v888_v10, 1  ;;  %v1852_v17 = vmul.f32 %v6157_v27, %v460_v3  ;;  %v2730_v20 = vadd.f32 %v2505_v26, %v2248_v16  ;;  %v2731_v21 = vadd.f32 %v2507_v46, %v2249_v61  ;;  %v485_v26 = vpop.permute.xlu1 %484 }
  0xe0   : > { %v1544_v4 = vrot.slane %v1370_v0, 2  ;;  %v2334_v58 = vmul.f32 %v6159_v28, %v460_v3  ;;  %v6524_v31 = vmul.f32 %v6150_v23, %v475_v13  ;;  %v6545_v59 = vmul.f32 %v6154_v25, %v475_v13 }
  0xe1   : > { %v1063_v38 = vsel %vm1034_vm2, %v1060_v18, %v1062_v15  ;;  %v1065_v52 = vsel %vm1034_vm2, %v1062_v15, %v1064_v48  ;;  %v2026_v30 = vrot.slane %v1852_v17, 3  ;;  %v2816_v36 = vadd.f32 %v6236_v43, %v2730_v20 }
  0xe2   : > { %v2817_v55 = vadd.f32 %v6236_v43, %v2731_v21  ;;  %v1286_v44 = vadd.f32 %v1063_v38, %v6420_v5  ;;  %v1287_v6 = vadd.f32 %v1065_v52, %v800_v54  ;;  %v1545_v53 = vsel %vm1516_vm3, %v1542_v22, %v1544_v4 }
  0xe3   : > { %v1547_v18 = vsel %vm1516_vm3, %v1544_v4, %v1546_v11  ;;  %v2027_v63 = vsel %vm1998_vm4, %v2024_v29, %v2026_v30  ;;  %v2029_v37 = vsel %vm1998_vm4, %v2026_v30, %v2028_v14  ;;  %v2895_v8 = vmax.f32 %v2816_v36, 0.0 }
  0xe4   : > { %v2896_v5 = vmax.f32 %v2817_v55, 0.0  ;;  %v1768_v56 = vadd.f32 %v1545_v53, %v1286_v44  ;;  %v1769_v40 = vadd.f32 %v1547_v18, %v1287_v6  ;;  %v2508_v12 = vrot.slane %v2334_v58, 4  ;;  %v480_v53 = vpop.permute.xlu0 %479 }
  0xe5   : > { %v6542_v22 = vmul.f32 %v6152_v24, %v475_v13  ;;  %v6548_v33 = vmul.f32 %v6157_v27, %v475_v13  ;;  %2975 = vst.msk [vmem:[#allocation2 + $0x58] sm:$0xff] %vm2963_vm0, %v2895_v8  ;;  %v6553_v49 = vmul.f32 %v6159_v28, %v475_v13  ;;  %v802_v50 = vmul.f32 %v6150_v23, %v470_v62 }
  0xe6   : > { %2976 = vst.msk [vmem:[#allocation2 + $0x60] sm:$0xff] %vm2963_vm0, %v2896_v5  ;;  %v2250_v29 = vadd.f32 %v2027_v63, %v1768_v56  ;;  %v2251_v45 = vadd.f32 %v2029_v37, %v1769_v40  ;;  %v2509_v57 = vsel %vm2480_vm5, %v2506_v34, %v2508_v12  ;;  %v2511_v3 = vsel %vm2480_vm5, %v2508_v12, %v2510_v39  ;;  %v3044_v5 = vld [vmem:[#allocation2] ss:$2 sm:$0xff] }
  0xe7   : > { %v1068_v2 = vrot.slane %v6542_v22, 1  ;;  %v1550_v51 = vrot.slane %v6545_v59, 2  ;;  %v2032_v42 = vrot.slane %v6548_v33, 3  ;;  %v2514_v54 = vrot.slane %v6553_v49, 4 }
  0xe8   : > { %v2732_v46 = vadd.f32 %v2509_v57, %v2250_v29  ;;  %v2733_v1 = vadd.f32 %v2511_v3, %v2251_v45  ;;  %v890_v10 = vmul.f32 %v6152_v24, %v470_v62  ;;  %v1372_v19 = vmul.f32 %v6154_v25, %v470_v62  ;;  %v3046_v29 = vld [vmem:[#allocation2 + $0x10] ss:$2 sm:$0xff]  ;;  %v3126_v45 = vld [vmem:[#allocation2 + $0x11] ss:$2 sm:$0xff] }
  0xe9   : > { %v1854_v34 = vmul.f32 %v6157_v27, %v470_v62  ;;  %v2336_v16 = vmul.f32 %v6159_v28, %v470_v62  ;;  %v6573_v13 = vmul.f32 %v6150_v23, %v485_v26  ;;  %v6576_v15 = vmul.f32 %v6152_v24, %v485_v26 }
  0xea   : > { %v2818_v61 = vadd.f32 %v6236_v43, %v2732_v46  ;;  %v2819_v0 = vadd.f32 %v6236_v43, %v2733_v1  ;;  %v1066_v17 = vrot.slane %v890_v10, 1  ;;  %v1548_v20 = vrot.slane %v1372_v19, 2 }
  0xeb   : > { %v2030_v21 = vrot.slane %v1854_v34, 3  ;;  %v2512_v4 = vrot.slane %v2336_v16, 4  ;;  %v1072_v52 = vrot.slane %v6576_v15, 1  ;;  %v6580_v30 = vmul.f32 %v6154_v25, %v485_v26 }
  0xec   : > { %v2897_v58 = vmax.f32 %v2818_v61, 0.0  ;;  %v2898_v38 = vmax.f32 %v2819_v0, 0.0  ;;  %v1067_v36 = vsel %vm1034_vm2, %v1064_v48, %v1066_v17  ;;  %v1069_v55 = vsel %vm1034_vm2, %v1066_v17, %v1068_v2 }
  0xed   : > { %v1549_v44 = vsel %vm1516_vm3, %v1546_v11, %v1548_v20  ;;  %v1551_v6 = vsel %vm1516_vm3, %v1548_v20, %v1550_v51  ;;  %v1288_v41 = vadd.f32 %v1067_v36, %v6469_v35  ;;  %v1289_v48 = vadd.f32 %v1069_v55, %v802_v50 }
  0xee   : > { %2977 = vst.msk [vmem:[#allocation2 + $0x68] sm:$0xff] %vm2963_vm0, %v2897_v58  ;;  %2978 = vst.msk [vmem:[#allocation2 + $0x70] sm:$0xff] %vm2963_vm0, %v2898_v38  ;;  %v2031_v18 = vsel %vm1998_vm4, %v2028_v14, %v2030_v21  ;;  %v2033_v7 = vsel %vm1998_vm4, %v2030_v21, %v2032_v42  ;;  %v2513_v11 = vsel %vm2480_vm5, %v2510_v39, %v2512_v4  ;;  %v1554_v37 = vrot.slane %v6580_v30, 2 }
  0xef   : > { %v2515_v63 = vsel %vm2480_vm5, %v2512_v4, %v2514_v54  ;;  %v6611_v35 = vmul.f32 %v6157_v27, %v485_v26  ;;  %v1770_v9 = vadd.f32 %v1549_v44, %v1288_v41  ;;  %v1771_v62 = vadd.f32 %v1551_v6, %v1289_v48  ;;  %v490_v48 = vpop.permute.xlu0 %489 }
  0xf0   : > { %v6614_v14 = vmul.f32 %v6159_v28, %v485_v26  ;;  %v804_v8 = vmul.f32 %v6150_v23, %v480_v53  ;;  %v892_v56 = vmul.f32 %v6152_v24, %v480_v53  ;;  %v1374_v40 = vmul.f32 %v6154_v25, %v480_v53 }
  0xf1   : > { %v2036_v39 = vrot.slane %v6611_v35, 3  ;;  %v1856_v12 = vmul.f32 %v6157_v27, %v480_v53  ;;  %v2252_v50 = vadd.f32 %v2031_v18, %v1770_v9  ;;  %v2253_v57 = vadd.f32 %v2033_v7, %v1771_v62 }
  0xf2   : > { %v2518_v3 = vrot.slane %v6614_v14, 4  ;;  %v2338_v26 = vmul.f32 %v6159_v28, %v480_v53  ;;  %v1070_v46 = vrot.slane %v892_v56, 1  ;;  %v1552_v1 = vrot.slane %v1374_v40, 2  ;;  %v3128_v56 = vld [vmem:[#allocation2 + $0x21] ss:$2 sm:$0xff] }
  0xf3   : > { %v2034_v10 = vrot.slane %v1856_v12, 3  ;;  %v6623_v19 = vmax.f32 %v3044_v5, %v3124_v47  ;;  %v2734_v34 = vadd.f32 %v2513_v11, %v2252_v50  ;;  %v2735_v16 = vadd.f32 %v2515_v63, %v2253_v57  ;;  %v3048_v47 = vld [vmem:[#allocation2 + $0x20] ss:$2 sm:$0xff] }
  0xf4   : > { %v2516_v61 = vrot.slane %v2338_v26, 4  ;;  %v6625_v0 = vmax.f32 %v3046_v29, %v3126_v45  ;;  %v1071_v17 = vsel %vm1034_vm2, %v1068_v2, %v1070_v46  ;;  %v1073_v20 = vsel %vm1034_vm2, %v1070_v46, %v1072_v52  ;;  %v495_v2 = vpop.permute.xlu1 %494 }
  0xf5   : > { %v1553_v21 = vsel %vm1516_vm3, %v1550_v51, %v1552_v1  ;;  %v1555_v4 = vsel %vm1516_vm3, %v1552_v1, %v1554_v37  ;;  %v2820_v58 = vadd.f32 %v6236_v43, %v2734_v34  ;;  %v2821_v38 = vadd.f32 %v6236_v43, %v2735_v16 }
  0xf6   : > { %v1290_v22 = vadd.f32 %v1071_v17, %v6524_v31  ;;  %v1291_v36 = vadd.f32 %v1073_v20, %v804_v8  ;;  %v2035_v55 = vsel %vm1998_vm4, %v2032_v42, %v2034_v10  ;;  %v2037_v59 = vsel %vm1998_vm4, %v2034_v10, %v2036_v39 }
  0xf7   : > { %v2517_v51 = vsel %vm2480_vm5, %v2514_v54, %v2516_v61  ;;  %v2519_v44 = vsel %vm2480_vm5, %v2516_v61, %v2518_v3  ;;  %v2899_v6 = vmax.f32 %v2820_v58, 0.0  ;;  %v2900_v31 = vmax.f32 %v2821_v38, 0.0 }
  0xf8   : > { %v1772_v53 = vadd.f32 %v1553_v21, %v1290_v22  ;;  %v1773_v41 = vadd.f32 %v1555_v4, %v1291_v36  ;;  %v3300_v33 = vrot.slane %v6623_v19, 1  ;;  %v3301_v42 = vrot.slane %v6625_v0, 1  ;;  %v505_v50 = vpop.permute.xlu1 %504 }
  0xf9   : > { %v6657_v18 = vmul.f32 %v6150_v23, %v495_v2  ;;  %v6660_v49 = vmul.f32 %v6152_v24, %v495_v2  ;;  %2979 = vst.msk [vmem:[#allocation2 + $0x78] sm:$0xff] %vm2963_vm0, %v2899_v6  ;;  %2980 = vst.msk [vmem:[#allocation2 + $0x80] sm:$0xff] %vm2963_vm0, %v2900_v31  ;;  %v6665_v11 = vmul.f32 %v6154_v25, %v495_v2 }
  0xfa   : > { %v2254_v54 = vadd.f32 %v2035_v55, %v1772_v53  ;;  %v2255_v7 = vadd.f32 %v2037_v59, %v1773_v41  ;;  %v6668_v63 = vmul.f32 %v6157_v27, %v495_v2  ;;  %v3302_v9 = vsel %vm1034_vm2, %v3300_v33, %v3301_v42 }
  0xfb   : > { %v1076_v62 = vrot.slane %v6660_v49, 1  ;;  %v6673_v8 = vmul.f32 %v6159_v28, %v495_v2  ;;  %v806_v5 = vmul.f32 %v6150_v23, %v490_v48  ;;  %5284 = vmatmul.mubr.msk.f32.vlgmr.msra.gmra.mrb[0].mxu0 %vm2963_vm0, %v3302_v9  ;;  %v1558_v29 = vrot.slane %v6665_v11, 2 }
  0xfc   : > { %v2736_v40 = vadd.f32 %v2517_v51, %v2254_v54  ;;  %v2737_v12 = vadd.f32 %v2519_v44, %v2255_v7  ;;  %v2040_v45 = vrot.slane %v6668_v63, 3  ;;  %v894_v26 = vmul.f32 %v6152_v24, %v490_v48  ;;  %5286 = vmatprep.mubr.msk.f32.mxu0 %vm5941_vm1, %v9363_v60  ;;  %v3050_v54 = vld [vmem:[#allocation2 + $0x30] ss:$2 sm:$0xff]  ;;  %v3130_v7 = vld [vmem:[#allocation2 + $0x31] ss:$2 sm:$0xff] }
  0xfd   : > { %v2522_v57 = vrot.slane %v6673_v8, 4  ;;  %v1376_v46 = vmul.f32 %v6154_v25, %v490_v48  ;;  %v1858_v1 = vmul.f32 %v6157_v27, %v490_v48  ;;  %v2340_v16 = vmul.f32 %v6159_v28, %v490_v48 }
  0xfe   : > { %v2822_v10 = vadd.f32 %v6236_v43, %v2736_v40  ;;  %v2823_v34 = vadd.f32 %v6236_v43, %v2737_v12  ;;  %v6688_v61 = vmax.f32 %v3048_v47, %v3128_v56  ;;  %v1074_v17 = vrot.slane %v894_v26, 1 }
  0xff   : > { %v1556_v20 = vrot.slane %v1376_v46, 2  ;;  %v2038_v21 = vrot.slane %v1858_v1, 3  ;;  %v6691_v4 = vmul.f32 %v6150_v23, %v505_v50  ;;  %v2520_v22 = vrot.slane %v2340_v16, 4 }
 0x100   : > { %v2901_v58 = vmax.f32 %v2822_v10, 0.0  ;;  %v2902_v38 = vmax.f32 %v2823_v34, 0.0  ;;  %v3303_v36 = vrot.slane %v6688_v61, 1  ;;  %v1075_v2 = vsel %vm1034_vm2, %v1072_v52, %v1074_v17 }
 0x101   : > { %v1077_v55 = vsel %vm1034_vm2, %v1074_v17, %v1076_v62  ;;  %v1557_v59 = vsel %vm1516_vm3, %v1554_v37, %v1556_v20  ;;  %v1559_v51 = vsel %vm1516_vm3, %v1556_v20, %v1558_v29  ;;  %v1292_v15 = vadd.f32 %v1075_v2, %v6573_v13  ;;  %v500_v37 = vpop.permute.xlu0 %499 }
 0x102   : > { %2981 = vst.msk [vmem:[#allocation2 + $0x88] sm:$0xff] %vm2963_vm0, %v2901_v58  ;;  %2982 = vst.msk [vmem:[#allocation2 + $0x90] sm:$0xff] %vm2963_vm0, %v2902_v38  ;;  %v1293_v44 = vadd.f32 %v1077_v55, %v806_v5  ;;  %v2039_v52 = vsel %vm1998_vm4, %v2036_v39, %v2038_v21  ;;  %v2041_v30 = vsel %vm1998_vm4, %v2038_v21, %v2040_v45  ;;  %v515_v55 = vpop.permute.xlu1 %514 }
 0x103   : > { %v2521_v6 = vsel %vm2480_vm5, %v2518_v3, %v2520_v22  ;;  %v2523_v31 = vsel %vm2480_vm5, %v2520_v22, %v2522_v57  ;;  %v3304_v13 = vsel %vm1034_vm2, %v3301_v42, %v3303_v36  ;;  %v6725_v35 = vmul.f32 %v6152_v24, %v505_v50 }
 0x104   : > { %v1774_v39 = vadd.f32 %v1557_v59, %v1292_v15  ;;  %v1775_v53 = vadd.f32 %v1559_v51, %v1293_v44  ;;  %5287 = vmatmul.mubr.msk.f32.gmra.mrb[2].mxu0 %vm2963_vm0, %v3304_v13  ;;  %v6729_v41 = vmul.f32 %v6154_v25, %v505_v50  ;;  %v6732_v14 = vmul.f32 %v6157_v27, %v505_v50 }
 0x105   : > { %v1080_v3 = vrot.slane %v6725_v35, 1  ;;  %v6736_v48 = vmul.f32 %v6159_v28, %v505_v50  ;;  %v808_v33 = vmul.f32 %v6150_v23, %v500_v37  ;;  %v896_v42 = vmul.f32 %v6152_v24, %v500_v37  ;;  %5289 = vmatprep.mubr.msk.f32.mxu0 %vm5941_vm1, %v9363_v60  ;;  %v510_v13 = vpop.permute.xlu0 %509 }
 0x106   : > { %v2256_v9 = vadd.f32 %v2039_v52, %v1774_v39  ;;  %v2257_v5 = vadd.f32 %v2041_v30, %v1775_v53  ;;  %v1562_v47 = vrot.slane %v6729_v41, 2  ;;  %v2044_v56 = vrot.slane %v6732_v14, 3 }
 0x107   : > { %v2526_v40 = vrot.slane %v6736_v48, 4  ;;  %v1078_v12 = vrot.slane %v896_v42, 1  ;;  %v1378_v50 = vmul.f32 %v6154_v25, %v500_v37  ;;  %v1860_v26 = vmul.f32 %v6157_v27, %v500_v37 }
 0x108   : > { %v2738_v46 = vadd.f32 %v2521_v6, %v2256_v9  ;;  %v2739_v1 = vadd.f32 %v2523_v31, %v2257_v5  ;;  %v2342_v10 = vmul.f32 %v6159_v28, %v500_v37  ;;  %v6748_v34 = vmax.f32 %v3050_v54, %v3130_v7  ;;  %v3052_v5 = vld [vmem:[#allocation2 + $0x40] ss:$2 sm:$0xff] }
 0x109   : > { %v1079_v16 = vsel %vm1034_vm2, %v1076_v62, %v1078_v12  ;;  %v1081_v17 = vsel %vm1034_vm2, %v1078_v12, %v1080_v3  ;;  %v1560_v20 = vrot.slane %v1378_v50, 2  ;;  %v2042_v21 = vrot.slane %v1860_v26, 3 }
 0x10a   : > { %v2824_v58 = vadd.f32 %v6236_v43, %v2738_v46  ;;  %v2825_v38 = vadd.f32 %v6236_v43, %v2739_v1  ;;  %v1294_v22 = vadd.f32 %v1079_v16, %v6657_v18  ;;  %v1295_v2 = vadd.f32 %v1081_v17, %v808_v33 }
 0x10b   : > { %v1561_v49 = vsel %vm1516_vm3, %v1558_v29, %v1560_v20  ;;  %v1563_v62 = vsel %vm1516_vm3, %v1560_v20, %v1562_v47  ;;  %v2043_v59 = vsel %vm1998_vm4, %v2040_v45, %v2042_v21  ;;  %v2045_v51 = vsel %vm1998_vm4, %v2042_v21, %v2044_v56 }
 0x10c   : > { %v2903_v15 = vmax.f32 %v2824_v58, 0.0  ;;  %v2904_v18 = vmax.f32 %v2825_v38, 0.0  ;;  %v1776_v44 = vadd.f32 %v1561_v49, %v1294_v22  ;;  %v1777_v52 = vadd.f32 %v1563_v62, %v1295_v2  ;;  %v525_v49 = vpop.permute.xlu1 %524 }
 0x10d   : > { %v2524_v30 = vrot.slane %v2342_v10, 4  ;;  %v3305_v11 = vrot.slane %v6748_v34, 1  ;;  %v6773_v29 = vmul.f32 %v6150_v23, %v515_v55  ;;  %v6776_v37 = vmul.f32 %v6152_v24, %v515_v55 }
 0x10e   : > { %2983 = vst.msk [vmem:[#allocation2 + $0x98] sm:$0xff] %vm2963_vm0, %v2903_v15  ;;  %2984 = vst.msk [vmem:[#allocation2 + $0xa0] sm:$0xff] %vm2963_vm0, %v2904_v18  ;;  %v2258_v63 = vadd.f32 %v2043_v59, %v1776_v44  ;;  %v2259_v45 = vadd.f32 %v2045_v51, %v1777_v52  ;;  %v6781_v6 = vmul.f32 %v6154_v25, %v515_v55 }
 0x10f   : > { %v6784_v31 = vmul.f32 %v6157_v27, %v515_v55  ;;  %v2525_v39 = vsel %vm2480_vm5, %v2522_v57, %v2524_v30  ;;  %v2527_v53 = vsel %vm2480_vm5, %v2524_v30, %v2526_v40  ;;  %v3306_v33 = vsel %vm1034_vm2, %v3303_v36, %v3305_v11  ;;  %v3132_v57 = vld [vmem:[#allocation2 + $0x41] ss:$2 sm:$0xff] }
 0x110   : > { %v1084_v42 = vrot.slane %v6776_v37, 1  ;;  %v2740_v54 = vadd.f32 %v2525_v39, %v2258_v63  ;;  %v2741_v7 = vadd.f32 %v2527_v53, %v2259_v45  ;;  %5290 = vmatmul.mubr.msk.f32.gmra.mrb[4].mxu0 %vm2963_vm0, %v3306_v33  ;;  %v1566_v9 = vrot.slane %v6781_v6, 2 }
 0x111   : > { %v2048_v8 = vrot.slane %v6784_v31, 3  ;;  %v6800_v12 = vmul.f32 %v6159_v28, %v515_v55  ;;  %v810_v50 = vmul.f32 %v6150_v23, %v510_v13  ;;  %v898_v26 = vmul.f32 %v6152_v24, %v510_v13  ;;  %5292 = vmatprep.mubr.msk.f32.mxu0 %vm5941_vm1, %v9363_v60 }
 0x112   : > { %v1380_v36 = vmul.f32 %v6154_v25, %v510_v13  ;;  %v2826_v46 = vadd.f32 %v6236_v43, %v2740_v54  ;;  %v2827_v1 = vadd.f32 %v6236_v43, %v2741_v7  ;;  %v1862_v10 = vmul.f32 %v6157_v27, %v510_v13  ;;  %v3054_v7 = vld [vmem:[#allocation2 + $0x50] ss:$2 sm:$0xff] }
 0x113   : > { %v2344_v16 = vmul.f32 %v6159_v28, %v510_v13  ;;  %v2530_v17 = vrot.slane %v6800_v12, 4  ;;  %v1082_v20 = vrot.slane %v898_v26, 1  ;;  %v6812_v58 = vmax.f32 %v3052_v5, %v3132_v57  ;;  %v3134_v5 = vld [vmem:[#allocation2 + $0x51] ss:$2 sm:$0xff]  ;;  %v650_v57 = vpop.permute.xlu1 %649 }
 0x114   : > { %v1564_v21 = vrot.slane %v1380_v36, 2  ;;  %v2905_v38 = vmax.f32 %v2826_v46, 0.0  ;;  %v2906_v22 = vmax.f32 %v2827_v1, 0.0  ;;  %v2046_v2 = vrot.slane %v1862_v10, 3 }
 0x115   : > { %v2528_v55 = vrot.slane %v2344_v16, 4  ;;  %v1083_v62 = vsel %vm1034_vm2, %v1080_v3, %v1082_v20  ;;  %v1085_v43 = vsel %vm1034_vm2, %v1082_v20, %v1084_v42  ;;  %v6843_v52 = vmul.f32 %v6150_v23, %v525_v49 }
 0x116   : > { %v1565_v59 = vsel %vm1516_vm3, %v1562_v47, %v1564_v21  ;;  %v1567_v51 = vsel %vm1516_vm3, %v1564_v21, %v1566_v9  ;;  %2985 = vst.msk [vmem:[#allocation2 + $0xa8] sm:$0xff] %vm2963_vm0, %v2905_v38  ;;  %2986 = vst.msk [vmem:[#allocation2 + $0xb0] sm:$0xff] %vm2963_vm0, %v2906_v22  ;;  %v1296_v35 = vadd.f32 %v1083_v62, %v6691_v4  ;;  %v520_v47 = vpop.permute.xlu0 %519  ;;  %v3307_v4 = vrot.slane %v6812_v58, 1 }
 0x117   : > { %v1297_v15 = vadd.f32 %v1085_v43, %v810_v50  ;;  %v2047_v3 = vsel %vm1998_vm4, %v2044_v56, %v2046_v2  ;;  %v2049_v41 = vsel %vm1998_vm4, %v2046_v2, %v2048_v8  ;;  %v2529_v18 = vsel %vm2480_vm5, %v2526_v40, %v2528_v55  ;;  %v6878_v2 = vld [vmem:[%s9333_s2] ss:$0 sm:$0xff] }
 0x118   : > { %v2531_v44 = vsel %vm2480_vm5, %v2528_v55, %v2530_v17  ;;  %v1778_v14 = vadd.f32 %v1565_v59, %v1296_v35  ;;  %v6846_v30 = vmul.f32 %v6152_v24, %v525_v49  ;;  %v6849_v63 = vmul.f32 %v6154_v25, %v525_v49 }
 0x119   : > { %v1779_v56 = vadd.f32 %v1567_v51, %v1297_v15  ;;  %v3308_v48 = vsel %vm1034_vm2, %v3305_v11, %v3307_v4  ;;  %v6853_v40 = vmul.f32 %v6157_v27, %v525_v49  ;;  %v6856_v45 = vmul.f32 %v6159_v28, %v525_v49 }
 0x11a   : > { %v812_v13 = vmul.f32 %v6150_v23, %v520_v47  ;;  %v2260_v39 = vadd.f32 %v2047_v3, %v1778_v14  ;;  %5293 = vmatmul.mubr.msk.f32.gmra.mrb[6].mxu0 %vm2963_vm0, %v3308_v48  ;;  %v1088_v33 = vrot.slane %v6846_v30, 1  ;;  %v1570_v54 = vrot.slane %v6849_v63, 2  ;;  %v530_v37 = vpop.permute.xlu0 %529 }
 0x11b   : > { %v2261_v53 = vadd.f32 %v2049_v41, %v1779_v56  ;;  %v2052_v11 = vrot.slane %v6853_v40, 3  ;;  %v2534_v50 = vrot.slane %v6856_v45, 4  ;;  %v900_v26 = vmul.f32 %v6152_v24, %v520_v47  ;;  %5295 = vmatprep.mubr.msk.f32.mxu0 %vm5941_vm1, %v9363_v60 }
 0x11c   : > { %v1382_v36 = vmul.f32 %v6154_v25, %v520_v47  ;;  %v2742_v46 = vadd.f32 %v2529_v18, %v2260_v39  ;;  %v1864_v10 = vmul.f32 %v6157_v27, %v520_v47  ;;  %v2346_v16 = vmul.f32 %v6159_v28, %v520_v47 }
 0x11d   : > { %v2743_v1 = vadd.f32 %v2531_v44, %v2261_v53  ;;  %v1086_v20 = vrot.slane %v900_v26, 1  ;;  %v6870_v38 = vmax.f32 %v3054_v7, %v3134_v5  ;;  %v6873_v22 = vmul.f32 %v6150_v23, %v650_v57  ;;  %v3056_v5 = vld [vmem:[#allocation2 + $0x60] ss:$2 sm:$0xff]  ;;  %v3136_v26 = vld [vmem:[#allocation2 + $0x61] ss:$2 sm:$0xff] }
 0x11e   : > { %v1568_v21 = vrot.slane %v1382_v36, 2  ;;  %v2828_v55 = vadd.f32 %v6878_v2, %v2742_v46  ;;  %v2050_v62 = vrot.slane %v1864_v10, 3  ;;  %v2532_v43 = vrot.slane %v2346_v16, 4  ;;  %v660_v36 = vpop.permute.xlu1 %659  ;;  %v655_v30 = vpop.permute.xlu0 %654 }
 0x11f   : > { %v2829_v49 = vadd.f32 %v6878_v2, %v2743_v1  ;;  %v1087_v59 = vsel %vm1034_vm2, %v1084_v42, %v1086_v20  ;;  %v1089_v51 = vsel %vm1034_vm2, %v1086_v20, %v1088_v33  ;;  %v6911_v14 = vmul.f32 %v6152_v24, %v650_v57 }
 0x120   : > { %v1569_v35 = vsel %vm1516_vm3, %v1566_v9, %v1568_v21  ;;  %v1571_v15 = vsel %vm1516_vm3, %v1568_v21, %v1570_v54  ;;  %v2907_v3 = vmax.f32 %v2828_v55, 0.0  ;;  %v1298_v47 = vadd.f32 %v1087_v59, %v6773_v29 }
 0x121   : > { %v2908_v41 = vmax.f32 %v2829_v49, 0.0  ;;  %v1299_v18 = vadd.f32 %v1089_v51, %v812_v13  ;;  %v2051_v42 = vsel %vm1998_vm4, %v2048_v8, %v2050_v62  ;;  %v2053_v6 = vsel %vm1998_vm4, %v2050_v62, %v2052_v11 }
 0x122   : > { %v2533_v9 = vsel %vm2480_vm5, %v2530_v17, %v2532_v43  ;;  %v2535_v44 = vsel %vm2480_vm5, %v2532_v43, %v2534_v50  ;;  %2987 = vst.msk [vmem:[#allocation2 + $0xb8] sm:$0xff] %vm2963_vm0, %v2907_v3  ;;  %v1780_v29 = vadd.f32 %v1569_v35, %v1298_v47  ;;  %v3309_v8 = vrot.slane %v6870_v38, 1 }
 0x123   : > { %2988 = vst.msk [vmem:[#allocation2 + $0xc0] sm:$0xff] %vm2963_vm0, %v2908_v41  ;;  %v1781_v31 = vadd.f32 %v1571_v15, %v1299_v18  ;;  %v6914_v56 = vmul.f32 %v6154_v25, %v650_v57  ;;  %v6917_v12 = vmul.f32 %v6157_v27, %v650_v57  ;;  %v6920_v17 = vmul.f32 %v6159_v28, %v650_v57 }
 0x124   : > { %v6923_v48 = vmul.f32 %v6150_v23, %v530_v37  ;;  %v2262_v13 = vadd.f32 %v2051_v42, %v1780_v29  ;;  %v3310_v53 = vsel %vm1034_vm2, %v3307_v4, %v3309_v8  ;;  %v9345_v7 = vrot.slane %v6911_v14, 1 }
 0x125   : > { %v2263_v39 = vadd.f32 %v2053_v6, %v1781_v31  ;;  %5296 = vmatmul.mubr.msk.f32.gmra.mrb[8].mxu0 %vm2963_vm0, %v3310_v53  ;;  %v9344_v46 = vrot.slane %v6914_v56, 2  ;;  %v9343_v1 = vrot.slane %v6917_v12, 3  ;;  %v9342_v57 = vrot.slane %v6920_v17, 4  ;;  %v670_v53 = vpop.permute.xlu1 %669 }
 0x126   : > { %v6932_v10 = vmul.f32 %v6152_v24, %v530_v37  ;;  %v2744_v16 = vadd.f32 %v2533_v9, %v2262_v13  ;;  %v6935_v4 = vmul.f32 %v6154_v25, %v530_v37  ;;  %v6938_v21 = vmul.f32 %v6157_v27, %v530_v37  ;;  %5298 = vmatprep.mubr.msk.f32.mxu0 %vm5941_vm1, %v9363_v60  ;;  %v3058_v13 = vld [vmem:[#allocation2 + $0x70] ss:$2 sm:$0xff] }
 0x127   : > { %v2745_v20 = vadd.f32 %v2535_v44, %v2263_v39  ;;  %v6944_v49 = vmul.f32 %v6159_v28, %v530_v37  ;;  %v6946_v62 = vmax.f32 %v3056_v5, %v3136_v26  ;;  %v6949_v43 = vmul.f32 %v6150_v23, %v660_v36  ;;  %v3138_v39 = vld [vmem:[#allocation2 + $0x71] ss:$2 sm:$0xff] }
 0x128   : > { %v9349_v55 = vrot.slane %v6932_v10, 1  ;;  %v2830_v59 = vadd.f32 %v6878_v2, %v2744_v16  ;;  %v9348_v35 = vrot.slane %v6935_v4, 2  ;;  %v9347_v15 = vrot.slane %v6938_v21, 3 }
 0x129   : > { %v2831_v51 = vadd.f32 %v6878_v2, %v2745_v20  ;;  %v9346_v41 = vrot.slane %v6944_v49, 4  ;;  %v3311_v47 = vrot.slane %v6946_v62, 1  ;;  %v6963_v18 = vmul.f32 %v6152_v24, %v660_v36 }
 0x12a   : > { %v1091_v3 = vsel %vm1034_vm2, %v1088_v33, %v9349_v55  ;;  %v2909_v37 = vmax.f32 %v2830_v59, 0.0  ;;  %v1573_v9 = vsel %vm1516_vm3, %v1570_v54, %v9348_v35  ;;  %v2055_v33 = vsel %vm1998_vm4, %v2052_v11, %v9347_v15 }
 0x12b   : > { %v2910_v42 = vmax.f32 %v2831_v51, 0.0  ;;  %v1300_v6 = vadd.f32 %v1091_v3, %v6843_v52  ;;  %v2537_v44 = vsel %vm2480_vm5, %v2534_v50, %v9346_v41  ;;  %v3312_v52 = vsel %vm1034_vm2, %v3309_v8, %v3311_v47 }
 0x12c   : > { %v1142_v29 = vrot.slane %v6963_v18, 1  ;;  %2989 = vst.msk [vmem:[#allocation2 + $0xc8] sm:$0xff] %vm2963_vm0, %v2909_v37  ;;  %5299 = vmatmul.mubr.msk.f32.gmra.mrb[10].mxu0 %vm2963_vm0, %v3312_v52  ;;  %v6987_v40 = vmul.f32 %v6154_v25, %v660_v36  ;;  %v6990_v54 = vmul.f32 %v6157_v27, %v660_v36  ;;  %v6993_v45 = vmul.f32 %v6159_v28, %v660_v36 }
 0x12d   : > { %2990 = vst.msk [vmem:[#allocation2 + $0xd0] sm:$0xff] %vm2963_vm0, %v2910_v42  ;;  %v1782_v63 = vadd.f32 %v1573_v9, %v1300_v6  ;;  %v839_v11 = vmul.f32 %v6150_v23, %v655_v30  ;;  %v927_v50 = vmul.f32 %v6152_v24, %v655_v30  ;;  %v1409_v31 = vmul.f32 %v6154_v25, %v655_v30 }
 0x12e   : > { %v1891_v8 = vmul.f32 %v6157_v27, %v655_v30  ;;  %5301 = vmatprep.mubr.msk.f32.mxu0 %vm5941_vm1, %v9363_v60  ;;  %v1624_v26 = vrot.slane %v6987_v40, 2  ;;  %v2106_v36 = vrot.slane %v6990_v54, 3  ;;  %v2588_v16 = vrot.slane %v6993_v45, 4  ;;  %v3062_v45 = vld [vmem:[#allocation2 + $0x90] ss:$2 sm:$0xff] }
 0x12f   : > { %v2264_v5 = vadd.f32 %v2055_v33, %v1782_v63  ;;  %v1140_v20 = vrot.slane %v927_v50, 1  ;;  %v1622_v59 = vrot.slane %v1409_v31, 2  ;;  %v2373_v3 = vmul.f32 %v6159_v28, %v655_v30 }
 0x130   : > { %v2104_v51 = vrot.slane %v1891_v8, 3  ;;  %v7005_v42 = vmax.f32 %v3058_v13, %v3138_v39  ;;  %v7008_v6 = vmul.f32 %v6150_v23, %v670_v53  ;;  %v7011_v9 = vmul.f32 %v6152_v24, %v670_v53 }
 0x131   : > { %v2746_v37 = vadd.f32 %v2537_v44, %v2264_v5  ;;  %v1141_v33 = vsel %vm1034_vm2, %v9345_v7, %v1140_v20  ;;  %v1143_v52 = vsel %vm1034_vm2, %v1140_v20, %v1142_v29  ;;  %v1623_v30 = vsel %vm1516_vm3, %v9344_v46, %v1622_v59 }
 0x132   : > { %v1625_v44 = vsel %vm1516_vm3, %v1622_v59, %v1624_v26  ;;  %v1325_v40 = vadd.f32 %v1141_v33, %v6873_v22  ;;  %v1326_v50 = vadd.f32 %v1143_v52, %v839_v11  ;;  %v2105_v31 = vsel %vm1998_vm4, %v9343_v1, %v2104_v51  ;;  %v665_v22 = vpop.permute.xlu0 %664 }
 0x133   : > { %v2832_v63 = vadd.f32 %v6878_v2, %v2746_v37  ;;  %v2107_v8 = vsel %vm1998_vm4, %v2104_v51, %v2106_v36  ;;  %v2586_v13 = vrot.slane %v2373_v3, 4  ;;  %v3313_v39 = vrot.slane %v7005_v42, 1 }
 0x134   : > { %v1146_v5 = vrot.slane %v7011_v9, 1  ;;  %v1807_v59 = vadd.f32 %v1623_v30, %v1325_v40  ;;  %v1808_v32 = vadd.f32 %v1625_v44, %v1326_v50  ;;  %v7034_v37 = vmul.f32 %v6154_v25, %v670_v53  ;;  %v3060_v40 = vld [vmem:[#allocation2 + $0x80] ss:$2 sm:$0xff]  ;;  %v3140_v50 = vld [vmem:[#allocation2 + $0x81] ss:$2 sm:$0xff] }
 0x135   : > { %v2911_v20 = vmax.f32 %v2832_v63, 0.0  ;;  %v2587_v11 = vsel %vm2480_vm5, %v9342_v57, %v2586_v13  ;;  %v2589_v51 = vsel %vm2480_vm5, %v2586_v13, %v2588_v16  ;;  %v3314_v3 = vsel %vm1034_vm2, %v3311_v47, %v3313_v39 }
 0x136   : > { %v7044_v33 = vmul.f32 %v6157_v27, %v670_v53  ;;  %v2289_v52 = vadd.f32 %v2105_v31, %v1807_v59  ;;  %v2290_v30 = vadd.f32 %v2107_v8, %v1808_v32  ;;  %5302 = vmatmul.mubr.msk.f32.gmra.mrb[12].mxu0 %vm2963_vm0, %v3314_v3  ;;  %v1628_v44 = vrot.slane %v7034_v37, 2  ;;  %v540_v32 = vpop.permute.xlu1 %539 }
 0x137   : > { %2991 = vst.msk [vmem:[#allocation2 + $0xd8] sm:$0xff] %vm2963_vm0, %v2911_v20  ;;  %v7050_v63 = vmul.f32 %v6159_v28, %v670_v53  ;;  %v841_v47 = vmul.f32 %v6150_v23, %v665_v22  ;;  %v929_v57 = vmul.f32 %v6152_v24, %v665_v22  ;;  %v1411_v1 = vmul.f32 %v6154_v25, %v665_v22 }
 0x138   : > { %v2110_v13 = vrot.slane %v7044_v33, 3  ;;  %5304 = vmatprep.mubr.msk.f32.mxu0 %vm5941_vm1, %v9363_v60  ;;  %v2771_v31 = vadd.f32 %v2587_v11, %v2289_v52  ;;  %v2772_v8 = vadd.f32 %v2589_v51, %v2290_v30  ;;  %v1893_v53 = vmul.f32 %v6157_v27, %v665_v22 }
 0x139   : > { %v9350_v20 = vrot.slane %v7050_v63, 4  ;;  %v1144_v59 = vrot.slane %v929_v57, 1  ;;  %v1626_v3 = vrot.slane %v1411_v1, 2  ;;  %v2375_v46 = vmul.f32 %v6159_v28, %v665_v22 }
 0x13a   : > { %v7061_v7 = vmax.f32 %v3060_v40, %v3140_v50  ;;  %v2857_v41 = vadd.f32 %v6878_v2, %v2771_v31  ;;  %v2858_v15 = vadd.f32 %v6878_v2, %v2772_v8  ;;  %v2108_v35 = vrot.slane %v1893_v53, 3 }
 0x13b   : > { %v7066_v55 = vmul.f32 %v6150_v23, %v540_v32  ;;  %v1145_v11 = vsel %vm1034_vm2, %v1142_v29, %v1144_v59  ;;  %v1147_v1 = vsel %vm1034_vm2, %v1144_v59, %v1146_v5  ;;  %v1627_v57 = vsel %vm1516_vm3, %v1624_v26, %v1626_v3 }
 0x13c   : > { %v1629_v22 = vsel %vm1516_vm3, %v1626_v3, %v1628_v44  ;;  %v2936_v51 = vmax.f32 %v2857_v41, 0.0  ;;  %v2937_v52 = vmax.f32 %v2858_v15, 0.0  ;;  %v1327_v30 = vadd.f32 %v1145_v11, %v6949_v43  ;;  %v3142_v11 = vld [vmem:[#allocation2 + $0x91] ss:$2 sm:$0xff] }
 0x13d   : > { %v1328_v40 = vadd.f32 %v1147_v1, %v841_v47  ;;  %v2109_v18 = vsel %vm1998_vm4, %v2106_v36, %v2108_v35  ;;  %v2111_v29 = vsel %vm1998_vm4, %v2108_v35, %v2110_v13  ;;  %v2590_v50 = vrot.slane %v2375_v46, 4  ;;  %v535_v36 = vpop.permute.xlu0 %534 }
 0x13e   : > { %v3315_v26 = vrot.slane %v7061_v7, 1  ;;  %3016 = vst.msk [vmem:[#allocation2 + $0x1a0] sm:$0xff] %vm2963_vm0, %v2936_v51  ;;  %3017 = vst.msk [vmem:[#allocation2 + $0x1a8] sm:$0xff] %vm2963_vm0, %v2937_v52  ;;  %v1809_v41 = vadd.f32 %v1627_v57, %v1327_v30  ;;  %v7089_v43 = vmul.f32 %v6152_v24, %v540_v32  ;;  %v7092_v54 = vmul.f32 %v6154_v25, %v540_v32 }
 0x13f   : > { %v1810_v15 = vadd.f32 %v1629_v22, %v1328_v40  ;;  %v2591_v35 = vsel %vm2480_vm5, %v2588_v16, %v2590_v50  ;;  %v2593_v46 = vsel %vm2480_vm5, %v2590_v50, %v9350_v20  ;;  %v7102_v31 = vmul.f32 %v6157_v27, %v540_v32 }
 0x140   : > { %v3316_v47 = vsel %vm1034_vm2, %v3313_v39, %v3315_v26  ;;  %v2291_v8 = vadd.f32 %v2109_v18, %v1809_v41  ;;  %v9354_v59 = vrot.slane %v7089_v43, 1  ;;  %v9353_v3 = vrot.slane %v7092_v54, 2 }
 0x141   : > { %v2292_v53 = vadd.f32 %v2111_v29, %v1810_v15  ;;  %5305 = vmatmul.mubr.msk.f32.gmra.mrb[14].mxu0 %vm2963_vm0, %v3316_v47  ;;  %v9352_v16 = vrot.slane %v7102_v31, 3  ;;  %v7109_v1 = vmul.f32 %v6159_v28, %v540_v32  ;;  %v815_v39 = vmul.f32 %v6150_v23, %v535_v36 }
 0x142   : > { %v903_v57 = vmul.f32 %v6152_v24, %v535_v36  ;;  %5307 = vmatprep.mubr.msk.f32.mxu0 %vm5941_vm1, %v9363_v60  ;;  %v2773_v22 = vadd.f32 %v2591_v35, %v2291_v8  ;;  %v1385_v52 = vmul.f32 %v6154_v25, %v535_v36  ;;  %v1867_v30 = vmul.f32 %v6157_v27, %v535_v36 }
 0x143   : > { %v2774_v51 = vadd.f32 %v2593_v46, %v2292_v53  ;;  %v9351_v40 = vrot.slane %v7109_v1, 4  ;;  %v2349_v29 = vmul.f32 %v6159_v28, %v535_v36  ;;  %v7119_v32 = vmax.f32 %v3062_v45, %v3142_v11  ;;  %v680_v36 = vpop.permute.xlu1 %679 }
 0x144   : > { %v1092_v18 = vrot.slane %v903_v57, 1  ;;  %v2859_v50 = vadd.f32 %v6878_v2, %v2773_v22  ;;  %v1574_v15 = vrot.slane %v1385_v52, 2  ;;  %v2056_v47 = vrot.slane %v1867_v30, 3 }
 0x145   : > { %v2860_v41 = vadd.f32 %v6878_v2, %v2774_v51  ;;  %v9446_v35 = vrot.slane %v6932_v10, 1  ;;  %v2538_v53 = vrot.slane %v2349_v29, 4  ;;  %v3317_v57 = vrot.slane %v7119_v32, 1 }
 0x146   : > { %v1095_v8 = vsel %vm1034_vm2, %v1092_v18, %v9354_v59  ;;  %v2938_v45 = vmax.f32 %v2859_v50, 0.0  ;;  %v9447_v51 = vrot.slane %v6935_v4, 2  ;;  %v1577_v10 = vsel %vm1516_vm3, %v1574_v15, %v9353_v3 }
 0x147   : > { %v1093_v46 = vsel %vm1034_vm2, %v9446_v35, %v1092_v18  ;;  %v2939_v11 = vmax.f32 %v2860_v41, 0.0  ;;  %v1302_v20 = vadd.f32 %v1095_v8, %v815_v39  ;;  %v9448_v30 = vrot.slane %v6938_v21, 3  ;;  %v675_v41 = vpop.permute.xlu0 %674 }
 0x148   : > { %v1301_v22 = vadd.f32 %v1093_v46, %v6923_v48  ;;  %v1575_v52 = vsel %vm1516_vm3, %v9447_v51, %v1574_v15  ;;  %v2059_v29 = vsel %vm1998_vm4, %v2056_v47, %v9352_v16  ;;  %3018 = vst.msk [vmem:[#allocation2 + $0x1b0] sm:$0xff] %vm2963_vm0, %v2938_v45  ;;  %v9449_v39 = vrot.slane %v6944_v49, 4  ;;  %v3064_v51 = vld [vmem:[#allocation2 + $0xa0] ss:$2 sm:$0xff] }
 0x149   : > { %v2057_v18 = vsel %vm1998_vm4, %v9448_v30, %v2056_v47  ;;  %3019 = vst.msk [vmem:[#allocation2 + $0x1b8] sm:$0xff] %vm2963_vm0, %v2939_v11  ;;  %v1784_v4 = vadd.f32 %v1577_v10, %v1302_v20  ;;  %v2541_v21 = vsel %vm2480_vm5, %v2538_v53, %v9351_v40  ;;  %v3318_v15 = vsel %vm1034_vm2, %v3315_v26, %v3317_v57  ;;  %v550_v10 = vpop.permute.xlu1 %549 }
 0x14a   : > { %v1783_v48 = vadd.f32 %v1575_v52, %v1301_v22  ;;  %v2539_v50 = vsel %vm2480_vm5, %v9449_v39, %v2538_v53  ;;  %v7155_v47 = vmul.f32 %v6150_v23, %v680_v36  ;;  %v7158_v35 = vmul.f32 %v6152_v24, %v680_v36  ;;  %5308 = vmatmul.mubr.msk.f32.gmra.mrb[16].mxu0 %vm2963_vm0, %v3318_v15  ;;  %v3144_v52 = vld [vmem:[#allocation2 + $0xa1] ss:$2 sm:$0xff] }
 0x14b   : > { %v7161_v20 = vmul.f32 %v6154_v25, %v680_v36  ;;  %v2266_v46 = vadd.f32 %v2059_v29, %v1784_v4  ;;  %v7165_v8 = vmul.f32 %v6157_v27, %v680_v36  ;;  %v7168_v53 = vmul.f32 %v6159_v28, %v680_v36  ;;  %5310 = vmatprep.mubr.msk.f32.mxu0 %vm5941_vm1, %v9363_v60 }
 0x14c   : > { %v2265_v49 = vadd.f32 %v2057_v18, %v1783_v48  ;;  %v9358_v26 = vrot.slane %v7158_v35, 1  ;;  %v843_v11 = vmul.f32 %v6150_v23, %v675_v41  ;;  %v931_v22 = vmul.f32 %v6152_v24, %v675_v41 }
 0x14d   : > { %v9357_v45 = vrot.slane %v7161_v20, 2  ;;  %v2748_v18 = vadd.f32 %v2541_v21, %v2266_v46  ;;  %v9356_v29 = vrot.slane %v7165_v8, 3  ;;  %v9355_v36 = vrot.slane %v7168_v53, 4 }
 0x14e   : > { %v2747_v30 = vadd.f32 %v2539_v50, %v2265_v49  ;;  %v1148_v48 = vrot.slane %v931_v22, 1  ;;  %v1413_v4 = vmul.f32 %v6154_v25, %v675_v41  ;;  %v1895_v39 = vmul.f32 %v6157_v27, %v675_v41 }
 0x14f   : > { %v2377_v15 = vmul.f32 %v6159_v28, %v675_v41  ;;  %v2834_v16 = vadd.f32 %v6878_v2, %v2748_v18  ;;  %v7183_v3 = vmax.f32 %v3064_v51, %v3144_v52  ;;  %v7186_v50 = vmul.f32 %v6150_v23, %v550_v10 }
 0x150   : > { %v2833_v40 = vadd.f32 %v6878_v2, %v2747_v30  ;;  %v1149_v21 = vsel %vm1034_vm2, %v1146_v5, %v1148_v48  ;;  %v1151_v49 = vsel %vm1034_vm2, %v1148_v48, %v9358_v26  ;;  %v1630_v46 = vrot.slane %v1413_v4, 2  ;;  %v545_v48 = vpop.permute.xlu0 %544 }
 0x151   : > { %9450 = vst [vmem:[#allocation6_spill] sm:$0xff] %v7183_v3  ;;  %v2112_v22 = vrot.slane %v1895_v39, 3  ;;  %v2913_v59 = vmax.f32 %v2834_v16, 0.0  ;;  %v1329_v30 = vadd.f32 %v1149_v21, %v7008_v6  ;;  %v1330_v18 = vadd.f32 %v1151_v49, %v843_v11  ;;  %v3066_v49 = vld [vmem:[#allocation2 + $0xb0] ss:$2 sm:$0xff] }
 0x152   : > { %v2912_v41 = vmax.f32 %v2833_v40, 0.0  ;;  %v1631_v51 = vsel %vm1516_vm3, %v1628_v44, %v1630_v46  ;;  %v1633_v9 = vsel %vm1516_vm3, %v1630_v46, %v9357_v45  ;;  %v2594_v16 = vrot.slane %v2377_v15, 4 }
 0x153   : > { %v2113_v5 = vsel %vm1998_vm4, %v2110_v13, %v2112_v22  ;;  %v2115_v40 = vsel %vm1998_vm4, %v2112_v22, %v9356_v29  ;;  %2993 = vst.msk [vmem:[#allocation2 + $0xe8] sm:$0xff] %vm2963_vm0, %v2913_v59  ;;  %v1811_v6 = vadd.f32 %v1631_v51, %v1329_v30  ;;  %v1812_v37 = vadd.f32 %v1633_v9, %v1330_v18  ;;  %v3146_v30 = vld [vmem:[#allocation2 + $0xb1] ss:$2 sm:$0xff]  ;;  %v690_v18 = vpop.permute.xlu1 %689 }
 0x154   : > { %2992 = vst.msk [vmem:[#allocation2 + $0xe0] sm:$0xff] %vm2963_vm0, %v2912_v41  ;;  %v3319_v44 = vrot.slane %v7183_v3, 1  ;;  %v7211_v11 = vmul.f32 %v6152_v24, %v550_v10  ;;  %v7214_v33 = vmul.f32 %v6154_v25, %v550_v10  ;;  %v7217_v13 = vmul.f32 %v6157_v27, %v550_v10 }
 0x155   : > { %v7220_v52 = vmul.f32 %v6159_v28, %v550_v10  ;;  %v2293_v4 = vadd.f32 %v2113_v5, %v1811_v6  ;;  %v2294_v59 = vadd.f32 %v2115_v40, %v1812_v37  ;;  %v9451_v39 = vrot.slane %v7050_v63, 4 }
 0x156   : > { %v2597_v21 = vsel %vm2480_vm5, %v2594_v16, %v9355_v36  ;;  %v3320_v46 = vsel %vm1034_vm2, %v3317_v57, %v3319_v44  ;;  %v9362_v22 = vrot.slane %v7211_v11, 1  ;;  %v9361_v10 = vrot.slane %v7214_v33, 2 }
 0x157   : > { %v2595_v15 = vsel %vm2480_vm5, %v9451_v39, %v2594_v16  ;;  %v9360_v41 = vrot.slane %v7217_v13, 3  ;;  %v2776_v51 = vadd.f32 %v2597_v21, %v2294_v59  ;;  %5311 = vmatmul.mubr.msk.f32.gmra.mrb[18].mxu0 %vm2963_vm0, %v3320_v46  ;;  %v9359_v9 = vrot.slane %v7220_v52, 4 }
 0x158   : > { %v2775_v63 = vadd.f32 %v2595_v15, %v2293_v4  ;;  %v817_v5 = vmul.f32 %v6150_v23, %v545_v48  ;;  %v905_v40 = vmul.f32 %v6152_v24, %v545_v48  ;;  %v1387_v57 = vmul.f32 %v6154_v25, %v545_v48  ;;  %5313 = vmatprep.mubr.msk.f32.mxu0 %vm5941_vm1, %v9363_v60 }
 0x159   : > { %v1869_v6 = vmul.f32 %v6157_v27, %v545_v48  ;;  %v2351_v37 = vmul.f32 %v6159_v28, %v545_v48  ;;  %v2862_v4 = vadd.f32 %v6878_v2, %v2776_v51  ;;  %v7245_v59 = vmax.f32 %v3066_v49, %v3146_v30 }
 0x15a   : > { %v2861_v16 = vadd.f32 %v6878_v2, %v2775_v63  ;;  %v7248_v39 = vmul.f32 %v6150_v23, %v690_v18  ;;  %v1096_v15 = vrot.slane %v905_v40, 1  ;;  %v1578_v21 = vrot.slane %v1387_v57, 2 }
 0x15b   : > { %9452 = vst [vmem:[#allocation7_spill] sm:$0xff] %v7245_v59  ;;  %v2060_v46 = vrot.slane %v1869_v6, 3  ;;  %v2542_v36 = vrot.slane %v2351_v37, 4  ;;  %v2941_v45 = vmax.f32 %v2862_v4, 0.0  ;;  %v3321_v48 = vrot.slane %v7245_v59, 1  ;;  %v685_v4 = vpop.permute.xlu0 %684 }
 0x15c   : > { %v2940_v29 = vmax.f32 %v2861_v16, 0.0  ;;  %v7252_v26 = vmul.f32 %v6152_v24, %v690_v18  ;;  %v9453_v63 = vrot.slane %v7089_v43, 1  ;;  %v1099_v49 = vsel %vm1034_vm2, %v1096_v15, %v9362_v22 }
 0x15d   : > { %v9454_v30 = vrot.slane %v7092_v54, 2  ;;  %v1581_v57 = vsel %vm1516_vm3, %v1578_v21, %v9361_v10  ;;  %3021 = vst.msk [vmem:[#allocation2 + $0x1c8] sm:$0xff] %vm2963_vm0, %v2941_v45  ;;  %v1304_v6 = vadd.f32 %v1099_v49, %v817_v5  ;;  %v9455_v37 = vrot.slane %v7102_v31, 3  ;;  %v3068_v49 = vld [vmem:[#allocation2 + $0xc0] ss:$2 sm:$0xff] }
 0x15e   : > { %v1097_v51 = vsel %vm1034_vm2, %v9453_v63, %v1096_v15  ;;  %3020 = vst.msk [vmem:[#allocation2 + $0x1c0] sm:$0xff] %vm2963_vm0, %v2940_v29  ;;  %v2063_v54 = vsel %vm1998_vm4, %v2060_v46, %v9360_v41  ;;  %v9456_v15 = vrot.slane %v7109_v1, 4  ;;  %v2545_v45 = vsel %vm2480_vm5, %v2542_v36, %v9359_v9 }
 0x15f   : > { %v1579_v40 = vsel %vm1516_vm3, %v9454_v30, %v1578_v21  ;;  %v1303_v43 = vadd.f32 %v1097_v51, %v7066_v55  ;;  %v2061_v16 = vsel %vm1998_vm4, %v9455_v37, %v2060_v46  ;;  %v3322_v55 = vsel %vm1034_vm2, %v3319_v44, %v3321_v48  ;;  %v3148_v30 = vld [vmem:[#allocation2 + $0xc1] ss:$2 sm:$0xff] }
 0x160   : > { %v2543_v21 = vsel %vm2480_vm5, %v9456_v15, %v2542_v36  ;;  %v9365_v31 = vrot.slane %v7252_v26, 1  ;;  %v1786_v5 = vadd.f32 %v1581_v57, %v1304_v6  ;;  %5314 = vmatmul.mubr.msk.f32.gmra.mrb[20].mxu0 %vm2963_vm0, %v3322_v55  ;;  %v7287_v46 = vmul.f32 %v6154_v25, %v690_v18 }
 0x161   : > { %v1785_v29 = vadd.f32 %v1579_v40, %v1303_v43  ;;  %v7290_v1 = vmul.f32 %v6157_v27, %v690_v18  ;;  %v7293_v63 = vmul.f32 %v6159_v28, %v690_v18  ;;  %v845_v36 = vmul.f32 %v6150_v23, %v685_v4  ;;  %5316 = vmatprep.mubr.msk.f32.mxu0 %vm5941_vm1, %v9363_v60  ;;  %v560_v60 = vpop.permute.xlu1 %559 }
 0x162   : > { %v933_v51 = vmul.f32 %v6152_v24, %v685_v4  ;;  %v1415_v44 = vmul.f32 %v6154_v25, %v685_v4  ;;  %v2268_v57 = vadd.f32 %v2063_v54, %v1786_v5  ;;  %v9368_v43 = vrot.slane %v7287_v46, 2 }
 0x163   : > { %v2267_v40 = vadd.f32 %v2061_v16, %v1785_v29  ;;  %v9367_v6 = vrot.slane %v7290_v1, 3  ;;  %v9366_v18 = vrot.slane %v7293_v63, 4  ;;  %v1897_v55 = vmul.f32 %v6157_v27, %v685_v4 }
 0x164   : > { %v1152_v37 = vrot.slane %v933_v51, 1  ;;  %v1634_v15 = vrot.slane %v1415_v44, 2  ;;  %v2750_v41 = vadd.f32 %v2545_v45, %v2268_v57  ;;  %v2379_v10 = vmul.f32 %v6159_v28, %v685_v4 }
 0x165   : > { %v2749_v9 = vadd.f32 %v2543_v21, %v2267_v40  ;;  %v7305_v22 = vmax.f32 %v3068_v49, %v3148_v30  ;;  %v9458_v16 = vrot.slane %v7158_v35, 1  ;;  %v9459_v5 = vrot.slane %v7161_v20, 2 }
 0x166   : > { %v1155_v29 = vsel %vm1034_vm2, %v1152_v37, %v9365_v31  ;;  %v1637_v21 = vsel %vm1516_vm3, %v1634_v15, %v9368_v43  ;;  %v2836_v45 = vadd.f32 %v6878_v2, %v2750_v41  ;;  %v2116_v49 = vrot.slane %v1897_v55, 3  ;;  %v555_v31 = vpop.permute.xlu0 %554 }
 0x167   : > { %9457 = vst [vmem:[#allocation8_spill] sm:$0xff] %v7305_v22  ;;  %v1153_v54 = vsel %vm1034_vm2, %v9458_v16, %v1152_v37  ;;  %v1635_v51 = vsel %vm1516_vm3, %v9459_v5, %v1634_v15  ;;  %v2835_v4 = vadd.f32 %v6878_v2, %v2749_v9  ;;  %v1332_v44 = vadd.f32 %v1155_v29, %v845_v36 }
 0x168   : > { %v1331_v35 = vadd.f32 %v1153_v54, %v7155_v47  ;;  %v2598_v30 = vrot.slane %v2379_v10, 4  ;;  %v9369_v40 = vrot.slane %v7305_v22, 1  ;;  %v7324_v57 = vmul.f32 %v6150_v23, %v560_v60 }
 0x169   : > { %v2914_v20 = vmax.f32 %v2835_v4, 0.0  ;;  %v2915_v37 = vmax.f32 %v2836_v45, 0.0  ;;  %v1814_v5 = vadd.f32 %v1637_v21, %v1332_v44  ;;  %v9460_v15 = vrot.slane %v7165_v8, 3 }
 0x16a   : > { %v1813_v16 = vadd.f32 %v1635_v51, %v1331_v35  ;;  %v2119_v47 = vsel %vm1998_vm4, %v2116_v49, %v9367_v6  ;;  %v9461_v10 = vrot.slane %v7168_v53, 4  ;;  %v2601_v36 = vsel %vm2480_vm5, %v2598_v30, %v9366_v18 }
 0x16b   : > { %v2117_v9 = vsel %vm1998_vm4, %v9460_v15, %v2116_v49  ;;  %2994 = vst.msk [vmem:[#allocation2 + $0xf0] sm:$0xff] %vm2963_vm0, %v2914_v20  ;;  %2995 = vst.msk [vmem:[#allocation2 + $0xf8] sm:$0xff] %vm2963_vm0, %v2915_v37  ;;  %v2296_v8 = vadd.f32 %v2119_v47, %v1814_v5  ;;  %v3324_v54 = vsel %vm1034_vm2, %v3321_v48, %v9369_v40  ;;  %v9462_v49 = vmov 0.0   ;;  %v3150_v20 = vld [vmem:[#allocation2 + $0xd1] ss:$2 sm:$0xff]  ;;  %v700_v37 = vpop.permute.xlu1 %699 }
 0x16c   : > { %v2599_v41 = vsel %vm2480_vm5, %v9461_v10, %v2598_v30  ;;  %v2295_v55 = vadd.f32 %v2117_v9, %v1813_v16  ;;  %v7346_v53 = vmul.f32 %v6152_v24, %v560_v60  ;;  %5317 = vmatmul.mubr.msk.f32.gmra.mrb[22].mxu0 %vm2963_vm0, %v3324_v54  ;;  %v7350_v29 = vmul.f32 %v6154_v25, %v560_v60  ;;  %v3070_v30 = vld [vmem:[#allocation2 + $0xd0] ss:$2 sm:$0xff] }
 0x16d   : > { %v7353_v51 = vmul.f32 %v6157_v27, %v560_v60  ;;  %v7356_v21 = vmul.f32 %v6159_v28, %v560_v60  ;;  %v819_v4 = vmul.f32 %v6150_v23, %v555_v31  ;;  %v2778_v35 = vadd.f32 %v2601_v36, %v2296_v8  ;;  %5319 = vmatprep.mubr.msk.f32.mxu0 %vm5941_vm1, %v9462_v49 }
 0x16e   : > { %v2777_v45 = vadd.f32 %v2599_v41, %v2295_v55  ;;  %v9374_v48 = vrot.slane %v7346_v53, 1  ;;  %v907_v44 = vmul.f32 %v6152_v24, %v555_v31  ;;  %v9373_v16 = vrot.slane %v7350_v29, 2 }
 0x16f   : > { %v9372_v5 = vrot.slane %v7353_v51, 3  ;;  %v9371_v60 = vrot.slane %v7356_v21, 4  ;;  %v1389_v15 = vmul.f32 %v6154_v25, %v555_v31  ;;  %v2864_v47 = vadd.f32 %v6878_v2, %v2778_v35 }
 0x170   : > { %v2863_v9 = vadd.f32 %v6878_v2, %v2777_v45  ;;  %v1100_v10 = vrot.slane %v907_v44, 1  ;;  %v1871_v41 = vmul.f32 %v6157_v27, %v555_v31  ;;  %v2353_v55 = vmul.f32 %v6159_v28, %v555_v31 }
 0x171   : > { %v1582_v36 = vrot.slane %v1389_v15, 2  ;;  %v7371_v8 = vmax.f32 %v3070_v30, %v3150_v20  ;;  %v7374_v54 = vmul.f32 %v6150_v23, %v700_v37  ;;  %v2943_v6 = vmax.f32 %v2864_v47, 0.0  ;;  %v695_v47 = vpop.permute.xlu0 %694 }
 0x172   : > { %v2942_v18 = vmax.f32 %v2863_v9, 0.0  ;;  %v9464_v43 = vrot.slane %v7211_v11, 1  ;;  %v1103_v45 = vsel %vm1034_vm2, %v1100_v10, %v9374_v48  ;;  %v9465_v31 = vrot.slane %v7214_v33, 2 }
 0x173   : > { %9463 = vst [vmem:[#allocation9_spill] sm:$0xff] %v7371_v8  ;;  %v1306_v44 = vadd.f32 %v1103_v45, %v819_v4  ;;  %v1585_v20 = vsel %vm1516_vm3, %v1582_v36, %v9373_v16  ;;  %3023 = vst.msk [vmem:[#allocation2 + $0x1d8] sm:$0xff] %vm2963_vm0, %v2943_v6  ;;  %v2064_v11 = vrot.slane %v1871_v41, 3  ;;  %v9370_v15 = vrot.slane %v7371_v8, 1 }
 0x174   : > { %v1101_v40 = vsel %vm1034_vm2, %v9464_v43, %v1100_v10  ;;  %v1583_v30 = vsel %vm1516_vm3, %v9465_v31, %v1582_v36  ;;  %3022 = vst.msk [vmem:[#allocation2 + $0x1d0] sm:$0xff] %vm2963_vm0, %v2942_v18  ;;  %v2546_v43 = vrot.slane %v2353_v55, 4  ;;  %v7393_v9 = vmul.f32 %v6152_v24, %v700_v37 }
 0x175   : > { %v1305_v35 = vadd.f32 %v1101_v40, %v7186_v50  ;;  %v1788_v40 = vadd.f32 %v1585_v20, %v1306_v44  ;;  %v7396_v33 = vmul.f32 %v6154_v25, %v700_v37  ;;  %v7399_v4 = vmul.f32 %v6157_v27, %v700_v37 }
 0x176   : > { %v9466_v18 = vrot.slane %v7217_v13, 3  ;;  %v2067_v10 = vsel %vm1998_vm4, %v2064_v11, %v9372_v5  ;;  %v9467_v41 = vrot.slane %v7220_v52, 4  ;;  %v2549_v55 = vsel %vm2480_vm5, %v2546_v43, %v9371_v60 }
 0x177   : > { %v1787_v50 = vadd.f32 %v1583_v30, %v1305_v35  ;;  %v2270_v35 = vadd.f32 %v2067_v10, %v1788_v40  ;;  %v9468_v13 = vrot.slane %v7305_v22, 1  ;;  %v9377_v31 = vrot.slane %v7393_v9, 1  ;;  %v570_v30 = vpop.permute.xlu1 %569 }
 0x178   : > { %v2065_v6 = vsel %vm1998_vm4, %v9466_v18, %v2064_v11  ;;  %v2547_v36 = vsel %vm2480_vm5, %v9467_v41, %v2546_v43  ;;  %v9376_v52 = vrot.slane %v7396_v33, 2  ;;  %v9375_v20 = vrot.slane %v7399_v4, 3 }
 0x179   : > { %v2269_v45 = vadd.f32 %v2065_v6, %v1787_v50  ;;  %v3326_v44 = vsel %vm1034_vm2, %v9468_v13, %v9370_v15  ;;  %v7423_v11 = vmul.f32 %v6159_v28, %v700_v37  ;;  %v847_v43 = vmul.f32 %v6150_v23, %v695_v47 }
 0x17a   : > { %5320 = vmatmul.mubr.msk.f32.gmra.mrb[24].mxu0 %vm2963_vm0, %v3326_v44  ;;  %v2752_v40 = vadd.f32 %v2549_v55, %v2270_v35  ;;  %v935_v18 = vmul.f32 %v6152_v24, %v695_v47  ;;  %v1417_v6 = vmul.f32 %v6154_v25, %v695_v47  ;;  %v1899_v41 = vmul.f32 %v6157_v27, %v695_v47 }
 0x17b   : > { %v2751_v50 = vadd.f32 %v2547_v36, %v2269_v45  ;;  %5322 = vmatprep.mubr.msk.f32.mxu0 %vm5941_vm1, %v9462_v49  ;;  %v2381_v13 = vmul.f32 %v6159_v28, %v695_v47  ;;  %v7434_v37 = vmul.f32 %v6150_v23, %v570_v30  ;;  %v7439_v60 = vmul.f32 %v6152_v24, %v570_v30 }
 0x17c   : > { %v2838_v36 = vadd.f32 %v6878_v2, %v2752_v40  ;;  %v1156_v55 = vrot.slane %v935_v18, 1  ;;  %v1638_v45 = vrot.slane %v1417_v6, 2  ;;  %v2120_v35 = vrot.slane %v1899_v41, 3 }
 0x17d   : > { %v2837_v44 = vadd.f32 %v6878_v2, %v2751_v50  ;;  %v2602_v15 = vrot.slane %v2381_v13, 4  ;;  %v7442_v5 = vmul.f32 %v6154_v25, %v570_v30  ;;  %v9469_v47 = vrot.slane %v7252_v26, 1 }
 0x17e   : > { %v2917_v48 = vmax.f32 %v2838_v36, 0.0  ;;  %v1159_v50 = vsel %vm1034_vm2, %v1156_v55, %v9377_v31  ;;  %v9470_v6 = vrot.slane %v7287_v46, 2  ;;  %v1641_v13 = vsel %vm1516_vm3, %v1638_v45, %v9376_v52 }
 0x17f   : > { %v2916_v16 = vmax.f32 %v2837_v44, 0.0  ;;  %v1157_v10 = vsel %vm1034_vm2, %v9469_v47, %v1156_v55  ;;  %v1334_v18 = vadd.f32 %v1159_v50, %v847_v43  ;;  %v565_v44 = vpop.permute.xlu0 %564  ;;  %v9471_v26 = vrot.slane %v7290_v1, 3 }
 0x180   : > { %v1333_v40 = vadd.f32 %v1157_v10, %v7248_v39  ;;  %v1639_v41 = vsel %vm1516_vm3, %v9470_v6, %v1638_v45  ;;  %2997 = vst.msk [vmem:[#allocation2 + $0x108] sm:$0xff] %vm2963_vm0, %v2917_v48  ;;  %v2123_v39 = vsel %vm1998_vm4, %v2120_v35, %v9375_v20  ;;  %v9472_v46 = vrot.slane %v7293_v63, 4 }
 0x181   : > { %2996 = vst.msk [vmem:[#allocation2 + $0x100] sm:$0xff] %vm2963_vm0, %v2916_v16  ;;  %v2121_v36 = vsel %vm1998_vm4, %v9471_v26, %v2120_v35  ;;  %v9473_v10 = vrot.slane %v7423_v11, 4  ;;  %v1816_v16 = vadd.f32 %v1641_v13, %v1334_v18  ;;  %v9383_v48 = vrot.slane %v7439_v60, 1  ;;  %v3096_v18 = vld [vmem:[#allocation2 + $0x1a0] ss:$2 sm:$0xff] }
 0x182   : > { %v2603_v43 = vsel %vm2480_vm5, %v9472_v46, %v2602_v15  ;;  %v1815_v45 = vadd.f32 %v1639_v41, %v1333_v40  ;;  %v7474_v47 = vmul.f32 %v6157_v27, %v570_v30  ;;  %v7477_v50 = vmul.f32 %v6159_v28, %v570_v30  ;;  %v3176_v41 = vld [vmem:[#allocation2 + $0x1a1] ss:$2 sm:$0xff] }
 0x183   : > { %v2605_v55 = vsel %vm2480_vm5, %v2602_v15, %v9473_v10  ;;  %v821_v63 = vmul.f32 %v6150_v23, %v565_v44  ;;  %v909_v35 = vmul.f32 %v6152_v24, %v565_v44  ;;  %v2298_v26 = vadd.f32 %v2123_v39, %v1816_v16 }
 0x184   : > { %v2297_v6 = vadd.f32 %v2121_v36, %v1815_v45  ;;  %v1391_v15 = vmul.f32 %v6154_v25, %v565_v44  ;;  %v1873_v40 = vmul.f32 %v6157_v27, %v565_v44  ;;  %v9382_v13 = vrot.slane %v7474_v47, 3 }
 0x185   : > { %v1104_v10 = vrot.slane %v909_v35, 1  ;;  %v2355_v30 = vmul.f32 %v6159_v28, %v565_v44  ;;  %v2780_v52 = vadd.f32 %v2605_v55, %v2298_v26  ;;  %v9474_v36 = vrot.slane %v7346_v53, 1  ;;  %v3098_v55 = vld [vmem:[#allocation2 + $0x1b0] ss:$2 sm:$0xff]  ;;  %v710_v26 = vpop.permute.xlu1 %709 }
 0x186   : > { %v2779_v20 = vadd.f32 %v2603_v43, %v2297_v6  ;;  %v1586_v31 = vrot.slane %v1391_v15, 2  ;;  %v2068_v1 = vrot.slane %v1873_v40, 3  ;;  %v7492_v22 = vmax.f32 %v3096_v18, %v3176_v41  ;;  %v3178_v6 = vld [vmem:[#allocation2 + $0x1b1] ss:$2 sm:$0xff] }
 0x187   : > { %v1105_v39 = vsel %vm1034_vm2, %v9474_v36, %v1104_v10  ;;  %v1107_v45 = vsel %vm1034_vm2, %v1104_v10, %v9383_v48  ;;  %v2550_v16 = vrot.slane %v2355_v30, 4  ;;  %v2866_v35 = vadd.f32 %v6878_v2, %v2780_v52 }
 0x188   : > { %v2865_v46 = vadd.f32 %v6878_v2, %v2779_v20  ;;  %v1307_v44 = vadd.f32 %v1105_v39, %v7324_v57  ;;  %v1308_v43 = vadd.f32 %v1107_v45, %v821_v63  ;;  %v9475_v53 = vrot.slane %v7350_v29, 2  ;;  %v705_v45 = vpop.permute.xlu0 %704 }
 0x189   : > { %v9476_v40 = vrot.slane %v7442_v5, 2  ;;  %v9477_v18 = vrot.slane %v7353_v51, 3  ;;  %v2071_v2 = vsel %vm1998_vm4, %v2068_v1, %v9382_v13  ;;  %v2945_v52 = vmax.f32 %v2866_v35, 0.0 }
 0x18a   : > { %v1587_v15 = vsel %vm1516_vm3, %v9475_v53, %v1586_v31  ;;  %v2944_v57 = vmax.f32 %v2865_v46, 0.0  ;;  %v9478_v29 = vrot.slane %v7356_v21, 4  ;;  %v9479_v36 = vrot.slane %v7477_v50, 4 }
 0x18b   : > { %v1589_v10 = vsel %vm1516_vm3, %v1586_v31, %v9476_v40  ;;  %v2069_v20 = vsel %vm1998_vm4, %v9477_v18, %v2068_v1  ;;  %v1789_v63 = vadd.f32 %v1587_v15, %v1307_v44  ;;  %v7515_v39 = vmax.f32 %v3098_v55, %v3178_v6  ;;  %3025 = vst.msk [vmem:[#allocation2 + $0x1e8] sm:$0xff] %vm2963_vm0, %v2945_v52  ;;  %v3152_v18 = vld [vmem:[#allocation2 + $0xe1] ss:$2 sm:$0xff] }
 0x18c   : > { %v1790_v41 = vadd.f32 %v1589_v10, %v1308_v43  ;;  %v2551_v30 = vsel %vm2480_vm5, %v9478_v29, %v2550_v16  ;;  %v2553_v31 = vsel %vm2480_vm5, %v2550_v16, %v9479_v36  ;;  %v9380_v51 = vrot.slane %v7492_v22, 1  ;;  %3024 = vst.msk [vmem:[#allocation2 + $0x1e0] sm:$0xff] %vm2963_vm0, %v2944_v57  ;;  %v3072_v10 = vld [vmem:[#allocation2 + $0xe0] ss:$2 sm:$0xff] }
 0x18d   : > { %9480 = vst [vmem:[#allocation10_spill] sm:$0xff] %v7515_v39  ;;  %v2271_v1 = vadd.f32 %v2069_v20, %v1789_v63  ;;  %v7521_v35 = vmul.f32 %v6150_v23, %v710_v26  ;;  %v7524_v21 = vmul.f32 %v6152_v24, %v710_v26  ;;  %v9381_v44 = vrot.slane %v7515_v39, 1  ;;  %v580_v20 = vpop.permute.xlu1 %579  ;;  %v7549_v63 = vld [vmem:[%s9333_s2] ss:$0 sm:$0xff] }
 0x18e   : > { %v2272_v46 = vadd.f32 %v2071_v2, %v1790_v41  ;;  %v7528_v16 = vmul.f32 %v6154_v25, %v710_v26  ;;  %v7531_v43 = vmul.f32 %v6157_v27, %v710_v26  ;;  %v7534_v55 = vmul.f32 %v6159_v28, %v710_v26 }
 0x18f   : > { %v2753_v6 = vadd.f32 %v2551_v30, %v2271_v1  ;;  %v9386_v15 = vrot.slane %v7524_v21, 1  ;;  %v849_v40 = vmul.f32 %v6150_v23, %v705_v45  ;;  %v3354_v2 = vsel %vm1034_vm2, %v9380_v51, %v9381_v44 }
 0x190   : > { %v2754_v53 = vadd.f32 %v2553_v31, %v2272_v46  ;;  %v9385_v57 = vrot.slane %v7528_v16, 2  ;;  %5362 = vmatmul.mubr.msk.f32.vlgmr.msra.gmra.mrb[0].mxu1 %vm2963_vm0, %v3354_v2  ;;  %v937_v30 = vmul.f32 %v6152_v24, %v705_v45  ;;  %v1419_v36 = vmul.f32 %v6154_v25, %v705_v45 }
 0x191   : > { %v2839_v41 = vadd.f32 %v7549_v63, %v2753_v6  ;;  %v1901_v31 = vmul.f32 %v6157_v27, %v705_v45  ;;  %v2383_v1 = vmul.f32 %v6159_v28, %v705_v45  ;;  %v7558_v46 = vmax.f32 %v3072_v10, %v3152_v18  ;;  %5364 = vmatprep.mubr.msk.f32.mxu1 %vm5941_vm1, %v9462_v49  ;;  %v720_v3 = vpop.permute.xlu1 %719 }
 0x192   : > { %v2840_v29 = vadd.f32 %v7549_v63, %v2754_v53  ;;  %v7561_v51 = vmul.f32 %v6150_v23, %v580_v20  ;;  %v1160_v44 = vrot.slane %v937_v30, 1  ;;  %v1642_v2 = vrot.slane %v1419_v36, 2 }
 0x193   : > { %9481 = vst [vmem:[#allocation11_spill] sm:$0xff] %v7558_v46  ;;  %v2918_v6 = vmax.f32 %v2839_v41, 0.0  ;;  %v2124_v13 = vrot.slane %v1901_v31, 3  ;;  %v2606_v48 = vrot.slane %v2383_v1, 4  ;;  %v9384_v52 = vrot.slane %v7558_v46, 1 }
 0x194   : > { %v2919_v53 = vmax.f32 %v2840_v29, 0.0  ;;  %v7567_v26 = vmul.f32 %v6152_v24, %v580_v20  ;;  %v9482_v45 = vrot.slane %v7393_v9, 1  ;;  %v1163_v18 = vsel %vm1034_vm2, %v1160_v44, %v9386_v15 }
 0x195   : > { %2998 = vst.msk [vmem:[#allocation2 + $0x110] sm:$0xff] %vm2963_vm0, %v2918_v6  ;;  %v9483_v41 = vrot.slane %v7396_v33, 2  ;;  %v1645_v30 = vsel %vm1516_vm3, %v1642_v2, %v9385_v57  ;;  %v1336_v31 = vadd.f32 %v1163_v18, %v849_v40  ;;  %v9484_v1 = vrot.slane %v7399_v4, 3 }
 0x196   : > { %2999 = vst.msk [vmem:[#allocation2 + $0x118] sm:$0xff] %vm2963_vm0, %v2919_v53  ;;  %v1161_v10 = vsel %vm1034_vm2, %v9482_v45, %v1160_v44  ;;  %v9485_v6 = vrot.slane %v7531_v43, 3  ;;  %v575_v44 = vpop.permute.xlu0 %574  ;;  %v9486_v33 = vrot.slane %v7423_v11, 4  ;;  %v7604_v11 = vmul.f32 %v6154_v25, %v580_v20 }
 0x197   : > { %v1643_v29 = vsel %vm1516_vm3, %v9483_v41, %v1642_v2  ;;  %v1335_v36 = vadd.f32 %v1161_v10, %v7374_v54  ;;  %v2125_v9 = vsel %vm1998_vm4, %v9484_v1, %v2124_v13  ;;  %v9487_v41 = vrot.slane %v7534_v55, 4 }
 0x198   : > { %v2127_v53 = vsel %vm1998_vm4, %v2124_v13, %v9485_v6  ;;  %v2607_v45 = vsel %vm2480_vm5, %v9486_v33, %v2606_v48  ;;  %v9488_v54 = vrot.slane %v7371_v8, 1  ;;  %v1818_v18 = vadd.f32 %v1645_v30, %v1336_v31 }
 0x199   : > { %v2609_v2 = vsel %vm2480_vm5, %v2606_v48, %v9487_v41  ;;  %v1817_v10 = vadd.f32 %v1643_v29, %v1335_v36  ;;  %v7607_v13 = vmul.f32 %v6157_v27, %v580_v20  ;;  %v7610_v48 = vmul.f32 %v6159_v28, %v580_v20  ;;  %v3100_v41 = vld [vmem:[#allocation2 + $0x1c0] ss:$2 sm:$0xff]  ;;  %v3180_v29 = vld [vmem:[#allocation2 + $0x1c1] ss:$2 sm:$0xff] }
 0x19a   : > { %v3328_v4 = vsel %vm1034_vm2, %v9488_v54, %v9384_v52  ;;  %v823_v1 = vmul.f32 %v6150_v23, %v575_v44  ;;  %v911_v6 = vmul.f32 %v6152_v24, %v575_v44  ;;  %v1393_v33 = vmul.f32 %v6154_v25, %v575_v44  ;;  %v715_v20 = vpop.permute.xlu0 %714 }
 0x19b   : > { %5323 = vmatmul.mubr.msk.f32.gmra.mrb[26].mxu0 %vm2963_vm0, %v3328_v4  ;;  %v2299_v30 = vadd.f32 %v2125_v9, %v1817_v10  ;;  %v2300_v36 = vadd.f32 %v2127_v53, %v1818_v18  ;;  %v9395_v31 = vrot.slane %v7604_v11, 2  ;;  %v9394_v54 = vrot.slane %v7607_v13, 3 }
 0x19c   : > { %5325 = vmatprep.mubr.msk.f32.mxu0 %vm5941_vm1, %v9462_v49  ;;  %v1108_v4 = vrot.slane %v911_v6, 1  ;;  %v1590_v52 = vrot.slane %v1393_v33, 2  ;;  %v1875_v57 = vmul.f32 %v6157_v27, %v575_v44  ;;  %v2357_v8 = vmul.f32 %v6159_v28, %v575_v44 }
 0x19d   : > { %v2781_v15 = vadd.f32 %v2607_v45, %v2299_v30  ;;  %v2782_v40 = vadd.f32 %v2609_v2, %v2300_v36  ;;  %v7622_v59 = vmax.f32 %v3100_v41, %v3180_v29  ;;  %v9490_v9 = vrot.slane %v7439_v60, 1 }
 0x19e   : > { %v9491_v10 = vrot.slane %v7567_v26, 1  ;;  %v9492_v6 = vrot.slane %v7442_v5, 2  ;;  %v1593_v45 = vsel %vm1516_vm3, %v1590_v52, %v9395_v31  ;;  %v2072_v29 = vrot.slane %v1875_v57, 3 }
 0x19f   : > { %9489 = vst [vmem:[#allocation12_spill] sm:$0xff] %v7622_v59  ;;  %v1109_v53 = vsel %vm1034_vm2, %v9490_v9, %v1108_v4  ;;  %v2867_v44 = vadd.f32 %v7549_v63, %v2781_v15  ;;  %v2868_v2 = vadd.f32 %v7549_v63, %v2782_v40  ;;  %v2554_v30 = vrot.slane %v2357_v8, 4 }
 0x1a0   : > { %v1111_v18 = vsel %vm1034_vm2, %v1108_v4, %v9491_v10  ;;  %v1591_v33 = vsel %vm1516_vm3, %v9492_v6, %v1590_v52  ;;  %v1309_v60 = vadd.f32 %v1109_v53, %v7434_v37  ;;  %v9393_v36 = vrot.slane %v7622_v59, 1 }
 0x1a1   : > { %v1310_v41 = vadd.f32 %v1111_v18, %v823_v1  ;;  %v7641_v4 = vmul.f32 %v6150_v23, %v720_v3  ;;  %v2946_v5 = vmax.f32 %v2867_v44, 0.0  ;;  %v2947_v9 = vmax.f32 %v2868_v2, 0.0 }
 0x1a2   : > { %v1791_v10 = vadd.f32 %v1591_v33, %v1309_v60  ;;  %v9493_v52 = vrot.slane %v7474_v47, 3  ;;  %v2075_v37 = vsel %vm1998_vm4, %v2072_v29, %v9394_v54  ;;  %v9494_v8 = vrot.slane %v7477_v50, 4 }
 0x1a3   : > { %v1792_v6 = vadd.f32 %v1593_v45, %v1310_v41  ;;  %v9495_v40 = vrot.slane %v7610_v48, 4  ;;  %3026 = vst.msk [vmem:[#allocation2 + $0x1f0] sm:$0xff] %vm2963_vm0, %v2946_v5  ;;  %3027 = vst.msk [vmem:[#allocation2 + $0x1f8] sm:$0xff] %vm2963_vm0, %v2947_v9  ;;  %v9496_v18 = vrot.slane %v7515_v39, 1  ;;  %v7663_v50 = vmul.f32 %v6152_v24, %v720_v3  ;;  %v3074_v9 = vld [vmem:[#allocation2 + $0xf0] ss:$2 sm:$0xff] }
 0x1a4   : > { %v2073_v15 = vsel %vm1998_vm4, %v9493_v52, %v2072_v29  ;;  %v2555_v57 = vsel %vm2480_vm5, %v9494_v8, %v2554_v30  ;;  %v7667_v45 = vmul.f32 %v6154_v25, %v720_v3  ;;  %v7670_v44 = vmul.f32 %v6157_v27, %v720_v3 }
 0x1a5   : > { %v2557_v1 = vsel %vm2480_vm5, %v2554_v30, %v9495_v40  ;;  %v2273_v53 = vadd.f32 %v2073_v15, %v1791_v10  ;;  %v2274_v47 = vadd.f32 %v2075_v37, %v1792_v6  ;;  %v3356_v33 = vsel %vm1034_vm2, %v9496_v18, %v9393_v36  ;;  %v3154_v10 = vld [vmem:[#allocation2 + $0xf1] ss:$2 sm:$0xff]  ;;  %v590_v6 = vpop.permute.xlu1 %589 }
 0x1a6   : > { %5365 = vmatmul.mubr.msk.f32.gmra.mrb[2].mxu1 %vm2963_vm0, %v3356_v33  ;;  %v7673_v2 = vmul.f32 %v6159_v28, %v720_v3  ;;  %v851_v60 = vmul.f32 %v6150_v23, %v715_v20  ;;  %v9399_v30 = vrot.slane %v7663_v50, 1  ;;  %v939_v5 = vmul.f32 %v6152_v24, %v715_v20 }
 0x1a7   : > { %v2755_v41 = vadd.f32 %v2555_v57, %v2273_v53  ;;  %v2756_v29 = vadd.f32 %v2557_v1, %v2274_v47  ;;  %5367 = vmatprep.mubr.msk.f32.mxu1 %vm5941_vm1, %v9462_v49  ;;  %v9398_v52 = vrot.slane %v7667_v45, 2  ;;  %v9397_v15 = vrot.slane %v7670_v44, 3 }
 0x1a8   : > { %v1421_v37 = vmul.f32 %v6154_v25, %v715_v20  ;;  %v1164_v40 = vrot.slane %v939_v5, 1  ;;  %v1903_v1 = vmul.f32 %v6157_v27, %v715_v20  ;;  %v2385_v47 = vmul.f32 %v6159_v28, %v715_v20 }
 0x1a9   : > { %v2841_v8 = vadd.f32 %v7549_v63, %v2755_v41  ;;  %v2842_v57 = vadd.f32 %v7549_v63, %v2756_v29  ;;  %v7688_v18 = vmax.f32 %v3074_v9, %v3154_v10  ;;  %v7691_v33 = vmul.f32 %v6150_v23, %v590_v6 }
 0x1aa   : > { %v1646_v53 = vrot.slane %v1421_v37, 2  ;;  %v9498_v31 = vrot.slane %v7524_v21, 1  ;;  %v1167_v41 = vsel %vm1034_vm2, %v1164_v40, %v9399_v30  ;;  %v9499_v20 = vrot.slane %v7528_v16, 2 }
 0x1ab   : > { %9497 = vst [vmem:[#allocation13_spill] sm:$0xff] %v7688_v18  ;;  %v2920_v36 = vmax.f32 %v2841_v8, 0.0  ;;  %v2921_v54 = vmax.f32 %v2842_v57, 0.0  ;;  %v1338_v5 = vadd.f32 %v1167_v41, %v851_v60  ;;  %v2128_v21 = vrot.slane %v1903_v1, 3  ;;  %v585_v57 = vpop.permute.xlu0 %584 }
 0x1ac   : > { %v1165_v3 = vsel %vm1034_vm2, %v9498_v31, %v1164_v40  ;;  %v1647_v9 = vsel %vm1516_vm3, %v9499_v20, %v1646_v53  ;;  %v1649_v10 = vsel %vm1516_vm3, %v1646_v53, %v9398_v52  ;;  %v2610_v31 = vrot.slane %v2385_v47, 4 }
 0x1ad   : > { %v1337_v29 = vadd.f32 %v1165_v3, %v7521_v35  ;;  %3000 = vst.msk [vmem:[#allocation2 + $0x120] sm:$0xff] %vm2963_vm0, %v2920_v36  ;;  %3001 = vst.msk [vmem:[#allocation2 + $0x128] sm:$0xff] %vm2963_vm0, %v2921_v54  ;;  %v9396_v37 = vrot.slane %v7688_v18, 1  ;;  %v7710_v8 = vmul.f32 %v6152_v24, %v590_v6  ;;  %v1820_v60 = vadd.f32 %v1649_v10, %v1338_v5  ;;  %v3102_v10 = vld [vmem:[#allocation2 + $0x1d0] ss:$2 sm:$0xff] }
 0x1ae   : > { %v7713_v16 = vmul.f32 %v6154_v25, %v590_v6  ;;  %v7716_v3 = vmul.f32 %v6157_v27, %v590_v6  ;;  %v9500_v36 = vrot.slane %v7531_v43, 3  ;;  %v2131_v40 = vsel %vm1998_vm4, %v2128_v21, %v9397_v15 }
 0x1af   : > { %v1819_v35 = vadd.f32 %v1647_v9, %v1337_v29  ;;  %v9501_v1 = vrot.slane %v7534_v55, 4  ;;  %v9502_v47 = vrot.slane %v7673_v2, 4  ;;  %v2302_v5 = vadd.f32 %v2131_v40, %v1820_v60 }
 0x1b0   : > { %v2129_v54 = vsel %vm1998_vm4, %v9500_v36, %v2128_v21  ;;  %v9503_v43 = vrot.slane %v7558_v46, 1  ;;  %v3182_v21 = vld [vmem:[#allocation2 + $0x1d1] ss:$2 sm:$0xff]  ;;  %v913_v40 = vmul.f32 %v6152_v24, %v585_v57  ;;  %v9505_v9 = vrot.slane %v7567_v26, 1 }
 0x1b1   : > { %v2611_v53 = vsel %vm2480_vm5, %v9501_v1, %v2610_v31  ;;  %v2613_v41 = vsel %vm2480_vm5, %v2610_v31, %v9502_v47  ;;  %v2301_v29 = vadd.f32 %v2129_v54, %v1819_v35  ;;  %v7740_v31 = vmul.f32 %v6159_v28, %v590_v6  ;;  %v730_v47 = vpop.permute.xlu1 %729 }
 0x1b2   : > { %v3330_v20 = vsel %vm1034_vm2, %v9503_v43, %v9396_v37  ;;  %v825_v35 = vmul.f32 %v6150_v23, %v585_v57  ;;  %v2784_v54 = vadd.f32 %v2613_v41, %v2302_v5  ;;  %v1395_v1 = vmul.f32 %v6154_v25, %v585_v57 }
 0x1b3   : > { %5326 = vmatmul.mubr.msk.f32.gmra.mrb[28].mxu0 %vm2963_vm0, %v3330_v20  ;;  %v2783_v60 = vadd.f32 %v2611_v53, %v2301_v29  ;;  %v1877_v20 = vmul.f32 %v6157_v27, %v585_v57  ;;  %v2359_v37 = vmul.f32 %v6159_v28, %v585_v57  ;;  %v7750_v6 = vmax.f32 %v3102_v10, %v3182_v21 }
 0x1b4   : > { %5328 = vmatprep.mubr.msk.f32.mxu0 %vm5941_vm1, %v9462_v49  ;;  %v2870_v53 = vadd.f32 %v7549_v63, %v2784_v54  ;;  %v1112_v41 = vrot.slane %v913_v40, 1  ;;  %v1594_v29 = vrot.slane %v1395_v1, 2  ;;  %v7756_v36 = vmul.f32 %v6150_v23, %v730_v47 }
 0x1b5   : > { %9504 = vst [vmem:[#allocation14_spill] sm:$0xff] %v7750_v6  ;;  %v2869_v15 = vadd.f32 %v7549_v63, %v2783_v60  ;;  %v2076_v5 = vrot.slane %v1877_v20, 3  ;;  %v2558_v52 = vrot.slane %v2359_v37, 4  ;;  %v9400_v30 = vrot.slane %v7750_v6, 1  ;;  %v725_v20 = vpop.permute.xlu0 %724 }
 0x1b6   : > { %v2949_v55 = vmax.f32 %v2870_v53, 0.0  ;;  %v1113_v57 = vsel %vm1034_vm2, %v9505_v9, %v1112_v41  ;;  %v9506_v10 = vrot.slane %v7710_v8, 1  ;;  %v9507_v37 = vrot.slane %v7604_v11, 2 }
 0x1b7   : > { %v2948_v43 = vmax.f32 %v2869_v15, 0.0  ;;  %v1311_v60 = vadd.f32 %v1113_v57, %v7561_v51  ;;  %v9508_v1 = vrot.slane %v7713_v16, 2  ;;  %v9509_v26 = vrot.slane %v7607_v13, 3 }
 0x1b8   : > { %v1115_v21 = vsel %vm1034_vm2, %v1112_v41, %v9506_v10  ;;  %v1595_v40 = vsel %vm1516_vm3, %v9507_v37, %v1594_v29  ;;  %3029 = vst.msk [vmem:[#allocation2 + $0x208] sm:$0xff] %vm2963_vm0, %v2949_v55  ;;  %v9510_v51 = vrot.slane %v7716_v3, 3  ;;  %v9511_v11 = vrot.slane %v7610_v48, 4 }
 0x1b9   : > { %v1312_v54 = vadd.f32 %v1115_v21, %v825_v35  ;;  %v1597_v15 = vsel %vm1516_vm3, %v1594_v29, %v9508_v1  ;;  %3028 = vst.msk [vmem:[#allocation2 + $0x200] sm:$0xff] %vm2963_vm0, %v2948_v43  ;;  %v2077_v9 = vsel %vm1998_vm4, %v9509_v26, %v2076_v5  ;;  %v9512_v41 = vrot.slane %v7740_v31, 4  ;;  %v3076_v1 = vld [vmem:[#allocation2 + $0x100] ss:$2 sm:$0xff]  ;;  %v600_v26 = vpop.permute.xlu1 %599 }
 0x1ba   : > { %v2079_v35 = vsel %vm1998_vm4, %v2076_v5, %v9510_v51  ;;  %v2559_v53 = vsel %vm2480_vm5, %v9511_v11, %v2558_v52  ;;  %v1793_v57 = vadd.f32 %v1595_v40, %v1311_v60  ;;  %v9513_v13 = vrot.slane %v7622_v59, 1 }
 0x1bb   : > { %v2561_v29 = vsel %vm2480_vm5, %v2558_v52, %v9512_v41  ;;  %v1794_v43 = vadd.f32 %v1597_v15, %v1312_v54  ;;  %v7791_v10 = vmul.f32 %v6152_v24, %v730_v47  ;;  %v7795_v48 = vmul.f32 %v6154_v25, %v730_v47  ;;  %v3156_v15 = vld [vmem:[#allocation2 + $0x101] ss:$2 sm:$0xff] }
 0x1bc   : > { %v3358_v55 = vsel %vm1034_vm2, %v9513_v13, %v9400_v30  ;;  %v7798_v5 = vmul.f32 %v6157_v27, %v730_v47  ;;  %v7801_v52 = vmul.f32 %v6159_v28, %v730_v47  ;;  %v853_v21 = vmul.f32 %v6150_v23, %v725_v20 }
 0x1bd   : > { %5368 = vmatmul.mubr.msk.f32.gmra.mrb[4].mxu1 %vm2963_vm0, %v3358_v55  ;;  %v2275_v60 = vadd.f32 %v2077_v9, %v1793_v57  ;;  %v2276_v54 = vadd.f32 %v2079_v35, %v1794_v43  ;;  %v941_v40 = vmul.f32 %v6152_v24, %v725_v20  ;;  %v1423_v41 = vmul.f32 %v6154_v25, %v725_v20 }
 0x1be   : > { %5370 = vmatprep.mubr.msk.f32.mxu1 %vm5941_vm1, %v9462_v49  ;;  %v1905_v43 = vmul.f32 %v6157_v27, %v725_v20  ;;  %v2387_v55 = vmul.f32 %v6159_v28, %v725_v20  ;;  %v7814_v30 = vmax.f32 %v3076_v1, %v3156_v15  ;;  %v7817_v37 = vmul.f32 %v6150_v23, %v600_v26 }
 0x1bf   : > { %v2757_v9 = vadd.f32 %v2559_v53, %v2275_v60  ;;  %v2758_v35 = vadd.f32 %v2561_v29, %v2276_v54  ;;  %v1168_v57 = vrot.slane %v941_v40, 1  ;;  %v1650_v13 = vrot.slane %v1423_v41, 2 }
 0x1c0   : > { %9514 = vst [vmem:[#allocation15_spill] sm:$0xff] %v7814_v30  ;;  %v9515_v47 = vrot.slane %v7663_v50, 1  ;;  %v9516_v29 = vrot.slane %v7791_v10, 1  ;;  %v9517_v40 = vrot.slane %v7667_v45, 2  ;;  %v9518_v15 = vrot.slane %v7795_v48, 2 }
 0x1c1   : > { %v2843_v51 = vadd.f32 %v7549_v63, %v2757_v9  ;;  %v2844_v11 = vadd.f32 %v7549_v63, %v2758_v35  ;;  %v2132_v50 = vrot.slane %v1905_v43, 3  ;;  %v2614_v59 = vrot.slane %v2387_v55, 4 }
 0x1c2   : > { %v1169_v53 = vsel %vm1034_vm2, %v9515_v47, %v1168_v57  ;;  %v1171_v60 = vsel %vm1034_vm2, %v1168_v57, %v9516_v29  ;;  %v1651_v1 = vsel %vm1516_vm3, %v9517_v40, %v1650_v13  ;;  %v1653_v41 = vsel %vm1516_vm3, %v1650_v13, %v9518_v15 }
 0x1c3   : > { %v1339_v54 = vadd.f32 %v1169_v53, %v7641_v4  ;;  %v1340_v20 = vadd.f32 %v1171_v60, %v853_v21  ;;  %v2922_v9 = vmax.f32 %v2843_v51, 0.0  ;;  %v2923_v35 = vmax.f32 %v2844_v11, 0.0  ;;  %v595_v4 = vpop.permute.xlu0 %594 }
 0x1c4   : > { %v9407_v46 = vrot.slane %v7814_v30, 1  ;;  %v7836_v57 = vmul.f32 %v6152_v24, %v600_v26  ;;  %v9519_v45 = vrot.slane %v7670_v44, 3  ;;  %v9520_v51 = vrot.slane %v7798_v5, 3 }
 0x1c5   : > { %v1821_v47 = vadd.f32 %v1651_v1, %v1339_v54  ;;  %v1822_v39 = vadd.f32 %v1653_v41, %v1340_v20  ;;  %3002 = vst.msk [vmem:[#allocation2 + $0x130] sm:$0xff] %vm2963_vm0, %v2922_v9  ;;  %3003 = vst.msk [vmem:[#allocation2 + $0x138] sm:$0xff] %vm2963_vm0, %v2923_v35  ;;  %v9521_v43 = vrot.slane %v7673_v2, 4  ;;  %v9522_v55 = vrot.slane %v7801_v52, 4  ;;  %v3104_v35 = vld [vmem:[#allocation2 + $0x1e0] ss:$2 sm:$0xff] }
 0x1c6   : > { %v2133_v21 = vsel %vm1998_vm4, %v9519_v45, %v2132_v50  ;;  %v2135_v11 = vsel %vm1998_vm4, %v2132_v50, %v9520_v51  ;;  %v9523_v44 = vrot.slane %v7688_v18, 1  ;;  %v9410_v20 = vrot.slane %v7836_v57, 1  ;;  %v3184_v50 = vld [vmem:[#allocation2 + $0x1e1] ss:$2 sm:$0xff] }
 0x1c7   : > { %v2615_v13 = vsel %vm2480_vm5, %v9521_v43, %v2614_v59  ;;  %v2617_v53 = vsel %vm2480_vm5, %v2614_v59, %v9522_v55  ;;  %v2303_v29 = vadd.f32 %v2133_v21, %v1821_v47  ;;  %v2304_v60 = vadd.f32 %v2135_v11, %v1822_v39  ;;  %v740_v47 = vpop.permute.xlu1 %739 }
 0x1c8   : > { %v3332_v54 = vsel %vm1034_vm2, %v9523_v44, %v9407_v46  ;;  %v7860_v2 = vmul.f32 %v6154_v25, %v600_v26  ;;  %v7863_v40 = vmul.f32 %v6157_v27, %v600_v26  ;;  %v7866_v59 = vmul.f32 %v6159_v28, %v600_v26 }
 0x1c9   : > { %5329 = vmatmul.mubr.msk.f32.gmra.mrb[30].mxu0 %vm2963_vm0, %v3332_v54  ;;  %v827_v39 = vmul.f32 %v6150_v23, %v595_v4  ;;  %v2785_v1 = vadd.f32 %v2615_v13, %v2303_v29  ;;  %v2786_v15 = vadd.f32 %v2617_v53, %v2304_v60  ;;  %v915_v41 = vmul.f32 %v6152_v24, %v595_v4 }
 0x1ca   : > { %v1397_v9 = vmul.f32 %v6154_v25, %v595_v4  ;;  %5331 = vmatprep.mubr.msk.f32.mxu0 %vm5941_vm1, %v9462_v49  ;;  %v9409_v45 = vrot.slane %v7860_v2, 2  ;;  %v1879_v51 = vmul.f32 %v6157_v27, %v595_v4  ;;  %v2361_v29 = vmul.f32 %v6159_v28, %v595_v4 }
 0x1cb   : > { %v2871_v11 = vadd.f32 %v7549_v63, %v2785_v1  ;;  %v2872_v43 = vadd.f32 %v7549_v63, %v2786_v15  ;;  %v1116_v13 = vrot.slane %v915_v41, 1  ;;  %v7880_v60 = vmax.f32 %v3104_v35, %v3184_v50 }
 0x1cc   : > { %v1598_v55 = vrot.slane %v1397_v9, 2  ;;  %v2080_v53 = vrot.slane %v1879_v51, 3  ;;  %v7883_v44 = vmul.f32 %v6150_v23, %v740_v47  ;;  %v9525_v26 = vrot.slane %v7710_v8, 1 }
 0x1cd   : > { %9524 = vst [vmem:[#allocation16_spill] sm:$0xff] %v7880_v60  ;;  %v2950_v54 = vmax.f32 %v2871_v11, 0.0  ;;  %v2951_v46 = vmax.f32 %v2872_v43, 0.0  ;;  %v1119_v1 = vsel %vm1034_vm2, %v1116_v13, %v9410_v20  ;;  %v9526_v4 = vrot.slane %v7713_v16, 2 }
 0x1ce   : > { %v1117_v21 = vsel %vm1034_vm2, %v9525_v26, %v1116_v13  ;;  %v1314_v41 = vadd.f32 %v1119_v1, %v827_v39  ;;  %v1601_v35 = vsel %vm1516_vm3, %v1598_v55, %v9409_v45  ;;  %v9527_v8 = vrot.slane %v7716_v3, 3 }
 0x1cf   : > { %v1313_v15 = vadd.f32 %v1117_v21, %v7691_v33  ;;  %v1599_v9 = vsel %vm1516_vm3, %v9526_v4, %v1598_v55  ;;  %3030 = vst.msk [vmem:[#allocation2 + $0x210] sm:$0xff] %vm2963_vm0, %v2950_v54  ;;  %3031 = vst.msk [vmem:[#allocation2 + $0x218] sm:$0xff] %vm2963_vm0, %v2951_v46  ;;  %v9528_v26 = vrot.slane %v7863_v40, 3  ;;  %v2562_v39 = vrot.slane %v2361_v29, 4  ;;  %v735_v46 = vpop.permute.xlu0 %734 }
 0x1d0   : > { %v2081_v50 = vsel %vm1998_vm4, %v9527_v8, %v2080_v53  ;;  %v9408_v16 = vrot.slane %v7880_v60, 1  ;;  %v1796_v51 = vadd.f32 %v1601_v35, %v1314_v41  ;;  %v7908_v11 = vmul.f32 %v6152_v24, %v740_v47  ;;  %v3158_v35 = vld [vmem:[#allocation2 + $0x111] ss:$2 sm:$0xff] }
 0x1d1   : > { %v2083_v33 = vsel %vm1998_vm4, %v2080_v53, %v9528_v26  ;;  %v1795_v21 = vadd.f32 %v1599_v9, %v1313_v15  ;;  %v7911_v43 = vmul.f32 %v6154_v25, %v740_v47  ;;  %v9529_v3 = vrot.slane %v7740_v31, 4  ;;  %v3078_v9 = vld [vmem:[#allocation2 + $0x110] ss:$2 sm:$0xff] }
 0x1d2   : > { %v9530_v55 = vrot.slane %v7866_v59, 4  ;;  %v9531_v29 = vrot.slane %v7750_v6, 1  ;;  %v7925_v1 = vmul.f32 %v6157_v27, %v740_v47  ;;  %v2278_v41 = vadd.f32 %v2083_v33, %v1796_v51 }
 0x1d3   : > { %v2563_v13 = vsel %vm2480_vm5, %v9529_v3, %v2562_v39  ;;  %v2277_v15 = vadd.f32 %v2081_v50, %v1795_v21  ;;  %v9413_v31 = vrot.slane %v7908_v11, 1  ;;  %v9412_v4 = vrot.slane %v7911_v43, 2 }
 0x1d4   : > { %v2565_v53 = vsel %vm2480_vm5, %v2562_v39, %v9530_v55  ;;  %v3360_v54 = vsel %vm1034_vm2, %v9531_v29, %v9408_v16  ;;  %v7932_v26 = vmul.f32 %v6159_v28, %v740_v47  ;;  %v855_v39 = vmul.f32 %v6150_v23, %v735_v46 }
 0x1d5   : > { %5371 = vmatmul.mubr.msk.f32.gmra.mrb[6].mxu1 %vm2963_vm0, %v3360_v54  ;;  %v943_v3 = vmul.f32 %v6152_v24, %v735_v46  ;;  %v2759_v50 = vadd.f32 %v2563_v13, %v2277_v15  ;;  %v2760_v33 = vadd.f32 %v2565_v53, %v2278_v41  ;;  %v1425_v21 = vmul.f32 %v6154_v25, %v735_v46 }
 0x1d6   : > { %5373 = vmatprep.mubr.msk.f32.mxu1 %vm5941_vm1, %v9462_v49  ;;  %v1907_v51 = vmul.f32 %v6157_v27, %v735_v46  ;;  %v2389_v54 = vmul.f32 %v6159_v28, %v735_v46  ;;  %v7942_v47 = vmax.f32 %v3078_v9, %v3158_v35  ;;  %v9533_v13 = vrot.slane %v7791_v10, 1  ;;  %v610_v46 = vpop.permute.xlu1 %609 }
 0x1d7   : > { %v1172_v29 = vrot.slane %v943_v3, 1  ;;  %v2845_v16 = vadd.f32 %v7549_v63, %v2759_v50  ;;  %v2846_v45 = vadd.f32 %v7549_v63, %v2760_v33  ;;  %v1654_v20 = vrot.slane %v1425_v21, 2 }
 0x1d8   : > { %9532 = vst [vmem:[#allocation17_spill] sm:$0xff] %v7942_v47  ;;  %v2136_v8 = vrot.slane %v1907_v51, 3  ;;  %v2618_v41 = vrot.slane %v2389_v54, 4  ;;  %v9411_v3 = vrot.slane %v7942_v47, 1  ;;  %v9534_v33 = vrot.slane %v7795_v48, 2 }
 0x1d9   : > { %v1173_v53 = vsel %vm1034_vm2, %v9533_v13, %v1172_v29  ;;  %v1175_v15 = vsel %vm1034_vm2, %v1172_v29, %v9413_v31  ;;  %v2924_v9 = vmax.f32 %v2845_v16, 0.0  ;;  %v2925_v35 = vmax.f32 %v2846_v45, 0.0  ;;  %v605_v13 = vpop.permute.xlu0 %604 }
 0x1da   : > { %v1341_v50 = vadd.f32 %v1173_v53, %v7756_v36  ;;  %v1342_v55 = vadd.f32 %v1175_v15, %v855_v39  ;;  %v1655_v21 = vsel %vm1516_vm3, %v9534_v33, %v1654_v20  ;;  %v1657_v10 = vsel %vm1516_vm3, %v1654_v20, %v9412_v4 }
 0x1db   : > { %v9535_v51 = vrot.slane %v7798_v5, 3  ;;  %v9536_v54 = vrot.slane %v7925_v1, 3  ;;  %3004 = vst.msk [vmem:[#allocation2 + $0x140] sm:$0xff] %vm2963_vm0, %v2924_v9  ;;  %3005 = vst.msk [vmem:[#allocation2 + $0x148] sm:$0xff] %vm2963_vm0, %v2925_v35  ;;  %v9537_v45 = vrot.slane %v7801_v52, 4  ;;  %v9538_v20 = vrot.slane %v7932_v26, 4 }
 0x1dc   : > { %v1823_v36 = vadd.f32 %v1655_v21, %v1341_v50  ;;  %v1824_v48 = vadd.f32 %v1657_v10, %v1342_v55  ;;  %v9539_v53 = vrot.slane %v7814_v30, 1  ;;  %v7980_v15 = vmul.f32 %v6150_v23, %v610_v46 }
 0x1dd   : > { %v2137_v29 = vsel %vm1998_vm4, %v9535_v51, %v2136_v8  ;;  %v2139_v16 = vsel %vm1998_vm4, %v2136_v8, %v9536_v54  ;;  %v2619_v39 = vsel %vm2480_vm5, %v9537_v45, %v2618_v41  ;;  %v2621_v5 = vsel %vm2480_vm5, %v2618_v41, %v9538_v20  ;;  %v3106_v54 = vld [vmem:[#allocation2 + $0x1f0] ss:$2 sm:$0xff]  ;;  %v3186_v45 = vld [vmem:[#allocation2 + $0x1f1] ss:$2 sm:$0xff] }
 0x1de   : > { %v3334_v8 = vsel %vm1034_vm2, %v9539_v53, %v9411_v3  ;;  %v7983_v55 = vmul.f32 %v6152_v24, %v610_v46  ;;  %v7986_v52 = vmul.f32 %v6154_v25, %v610_v46  ;;  %v2305_v9 = vadd.f32 %v2137_v29, %v1823_v36  ;;  %v750_v29 = vpop.permute.xlu1 %749 }
 0x1df   : > { %v2306_v35 = vadd.f32 %v2139_v16, %v1824_v48  ;;  %5332 = vmatmul.mubr.msk.f32.gmra.mrb[32].mxu0 %vm2963_vm0, %v3334_v8  ;;  %v7990_v41 = vmul.f32 %v6157_v27, %v610_v46  ;;  %v7993_v50 = vmul.f32 %v6159_v28, %v610_v46  ;;  %v829_v10 = vmul.f32 %v6150_v23, %v605_v13 }
 0x1e0   : > { %v9419_v33 = vrot.slane %v7983_v55, 1  ;;  %v917_v51 = vmul.f32 %v6152_v24, %v605_v13  ;;  %5334 = vmatprep.mubr.msk.f32.mxu0 %vm5941_vm1, %v9462_v49  ;;  %v2787_v16 = vadd.f32 %v2619_v39, %v2305_v9  ;;  %v1399_v53 = vmul.f32 %v6154_v25, %v605_v13 }
 0x1e1   : > { %v2788_v36 = vadd.f32 %v2621_v5, %v2306_v35  ;;  %v1881_v8 = vmul.f32 %v6157_v27, %v605_v13  ;;  %v2363_v3 = vmul.f32 %v6159_v28, %v605_v13  ;;  %v8008_v21 = vmax.f32 %v3106_v54, %v3186_v45 }
 0x1e2   : > { %v1120_v20 = vrot.slane %v917_v51, 1  ;;  %v2873_v4 = vadd.f32 %v7549_v63, %v2787_v16  ;;  %v8011_v39 = vmul.f32 %v6150_v23, %v750_v29  ;;  %v9541_v5 = vrot.slane %v7836_v57, 1 }
 0x1e3   : > { %v2874_v31 = vadd.f32 %v7549_v63, %v2788_v36  ;;  %9540 = vst [vmem:[#allocation18_spill] sm:$0xff] %v8008_v21  ;;  %v1602_v51 = vrot.slane %v1399_v53, 2  ;;  %v2084_v46 = vrot.slane %v1881_v8, 3  ;;  %v9542_v54 = vrot.slane %v7860_v2, 2  ;;  %v745_v8 = vpop.permute.xlu0 %744 }
 0x1e4   : > { %v1121_v9 = vsel %vm1034_vm2, %v9541_v5, %v1120_v20  ;;  %v1123_v35 = vsel %vm1034_vm2, %v1120_v20, %v9419_v33  ;;  %v2952_v13 = vmax.f32 %v2873_v4, 0.0  ;;  %v9543_v6 = vrot.slane %v7986_v52, 2 }
 0x1e5   : > { %v2953_v48 = vmax.f32 %v2874_v31, 0.0  ;;  %v1315_v16 = vadd.f32 %v1121_v9, %v7817_v37  ;;  %v1316_v36 = vadd.f32 %v1123_v35, %v829_v10  ;;  %v1603_v45 = vsel %vm1516_vm3, %v9542_v54, %v1602_v51 }
 0x1e6   : > { %v1605_v57 = vsel %vm1516_vm3, %v1602_v51, %v9543_v6  ;;  %v9544_v5 = vrot.slane %v7863_v40, 3  ;;  %v9545_v20 = vrot.slane %v7990_v41, 3  ;;  %3032 = vst.msk [vmem:[#allocation2 + $0x220] sm:$0xff] %vm2963_vm0, %v2952_v13  ;;  %v2566_v31 = vrot.slane %v2363_v3, 4 }
 0x1e7   : > { %3033 = vst.msk [vmem:[#allocation2 + $0x228] sm:$0xff] %vm2963_vm0, %v2953_v48  ;;  %v1797_v37 = vadd.f32 %v1603_v45, %v1315_v16  ;;  %v1798_v2 = vadd.f32 %v1605_v57, %v1316_v36  ;;  %v9418_v10 = vrot.slane %v8008_v21, 1  ;;  %v8036_v53 = vmul.f32 %v6152_v24, %v750_v29  ;;  %v3080_v16 = vld [vmem:[#allocation2 + $0x120] ss:$2 sm:$0xff]  ;;  %v620_v57 = vpop.permute.xlu1 %619 }
 0x1e8   : > { %v2085_v30 = vsel %vm1998_vm4, %v9544_v5, %v2084_v46  ;;  %v2087_v4 = vsel %vm1998_vm4, %v2084_v46, %v9545_v20  ;;  %v8039_v6 = vmul.f32 %v6154_v25, %v750_v29  ;;  %v8042_v40 = vmul.f32 %v6157_v27, %v750_v29 }
 0x1e9   : > { %v8045_v46 = vmul.f32 %v6159_v28, %v750_v29  ;;  %v2279_v9 = vadd.f32 %v2085_v30, %v1797_v37  ;;  %v2280_v48 = vadd.f32 %v2087_v4, %v1798_v2  ;;  %v9546_v35 = vrot.slane %v7866_v59, 4  ;;  %v3160_v59 = vld [vmem:[#allocation2 + $0x121] ss:$2 sm:$0xff] }
 0x1ea   : > { %v9547_v51 = vrot.slane %v7993_v50, 4  ;;  %v9548_v36 = vrot.slane %v7880_v60, 1  ;;  %v9421_v29 = vrot.slane %v8036_v53, 1  ;;  %v857_v37 = vmul.f32 %v6150_v23, %v745_v8 }
 0x1eb   : > { %v2567_v3 = vsel %vm2480_vm5, %v9546_v35, %v2566_v31  ;;  %v945_v2 = vmul.f32 %v6152_v24, %v745_v8  ;;  %v1909_v35 = vmul.f32 %v6157_v27, %v745_v8  ;;  %v8079_v30 = vmul.f32 %v6152_v24, %v620_v57  ;;  %v760_v18 = vpop.permute.xlu1 %759 }
 0x1ec   : > { %v2569_v13 = vsel %vm2480_vm5, %v2566_v31, %v9547_v51  ;;  %v3362_v54 = vsel %vm1034_vm2, %v9548_v36, %v9418_v10  ;;  %v2761_v5 = vadd.f32 %v2567_v3, %v2279_v9  ;;  %v1427_v31 = vmul.f32 %v6154_v25, %v745_v8 }
 0x1ed   : > { %v2762_v20 = vadd.f32 %v2569_v13, %v2280_v48  ;;  %5374 = vmatmul.mubr.msk.f32.gmra.mrb[8].mxu1 %vm2963_vm0, %v3362_v54  ;;  %v2391_v51 = vmul.f32 %v6159_v28, %v745_v8  ;;  %v8072_v3 = vmax.f32 %v3080_v16, %v3160_v59  ;;  %v8075_v13 = vmul.f32 %v6150_v23, %v620_v57 }
 0x1ee   : > { %5376 = vmatprep.mubr.msk.f32.mxu1 %vm5941_vm1, %v9462_v49  ;;  %v2847_v9 = vadd.f32 %v7549_v63, %v2761_v5  ;;  %v1176_v36 = vrot.slane %v945_v2, 1  ;;  %v1658_v54 = vrot.slane %v1427_v31, 2  ;;  %v2140_v10 = vrot.slane %v1909_v35, 3 }
 0x1ef   : > { %v2848_v48 = vadd.f32 %v7549_v63, %v2762_v20  ;;  %9549 = vst [vmem:[#allocation19_spill] sm:$0xff] %v8072_v3  ;;  %v2622_v33 = vrot.slane %v2391_v51, 4  ;;  %v9420_v8 = vrot.slane %v8072_v3, 1  ;;  %v9550_v5 = vrot.slane %v7908_v11, 1 }
 0x1f0   : > { %v2926_v4 = vmax.f32 %v2847_v9, 0.0  ;;  %v1179_v16 = vsel %vm1034_vm2, %v1176_v36, %v9421_v29  ;;  %v9551_v59 = vrot.slane %v7911_v43, 2  ;;  %v9552_v31 = vrot.slane %v8039_v6, 2 }
 0x1f1   : > { %v2927_v45 = vmax.f32 %v2848_v48, 0.0  ;;  %v1177_v20 = vsel %vm1034_vm2, %v9550_v5, %v1176_v36  ;;  %v1344_v51 = vadd.f32 %v1179_v16, %v857_v37  ;;  %v9553_v9 = vrot.slane %v7925_v1, 3  ;;  %v615_v5 = vpop.permute.xlu0 %614 }
 0x1f2   : > { %v1659_v2 = vsel %vm1516_vm3, %v9551_v59, %v1658_v54  ;;  %v1661_v35 = vsel %vm1516_vm3, %v1658_v54, %v9552_v31  ;;  %3006 = vst.msk [vmem:[#allocation2 + $0x150] sm:$0xff] %vm2963_vm0, %v2926_v4  ;;  %v1343_v11 = vadd.f32 %v1177_v20, %v7883_v44  ;;  %v9554_v36 = vrot.slane %v8042_v40, 3 }
 0x1f3   : > { %3007 = vst.msk [vmem:[#allocation2 + $0x158] sm:$0xff] %vm2963_vm0, %v2927_v45  ;;  %v2141_v48 = vsel %vm1998_vm4, %v9553_v9, %v2140_v10  ;;  %v9555_v59 = vrot.slane %v7932_v26, 4  ;;  %v9556_v4 = vrot.slane %v8045_v46, 4  ;;  %v9557_v44 = vrot.slane %v7942_v47, 1 }
 0x1f4   : > { %v2143_v43 = vsel %vm1998_vm4, %v2140_v10, %v9554_v36  ;;  %v1825_v20 = vadd.f32 %v1659_v2, %v1343_v11  ;;  %v1826_v16 = vadd.f32 %v1661_v35, %v1344_v51  ;;  %v8116_v26 = vmul.f32 %v6154_v25, %v620_v57  ;;  %v3188_v2 = vld [vmem:[#allocation2 + $0x201] ss:$2 sm:$0xff] }
 0x1f5   : > { %v2623_v54 = vsel %vm2480_vm5, %v9555_v59, %v2622_v33  ;;  %v2625_v45 = vsel %vm2480_vm5, %v2622_v33, %v9556_v4  ;;  %v3336_v1 = vsel %vm1034_vm2, %v9557_v44, %v9420_v8  ;;  %v8119_v10 = vmul.f32 %v6157_v27, %v620_v57  ;;  %v3108_v59 = vld [vmem:[#allocation2 + $0x200] ss:$2 sm:$0xff] }
 0x1f6   : > { %5335 = vmatmul.mubr.msk.f32.gmra.mrb[34].mxu0 %vm2963_vm0, %v3336_v1  ;;  %v8122_v33 = vmul.f32 %v6159_v28, %v620_v57  ;;  %v831_v31 = vmul.f32 %v6150_v23, %v615_v5  ;;  %v919_v9 = vmul.f32 %v6152_v24, %v615_v5  ;;  %v1401_v36 = vmul.f32 %v6154_v25, %v615_v5  ;;  %v755_v57 = vpop.permute.xlu0 %754 }
 0x1f7   : > { %5337 = vmatprep.mubr.msk.f32.mxu0 %vm5941_vm1, %v9462_v49  ;;  %v2307_v35 = vadd.f32 %v2141_v48, %v1825_v20  ;;  %v2308_v11 = vadd.f32 %v2143_v43, %v1826_v16  ;;  %v9430_v51 = vrot.slane %v8116_v26, 2  ;;  %v9429_v4 = vrot.slane %v8119_v10, 3 }
 0x1f8   : > { %v1124_v44 = vrot.slane %v919_v9, 1  ;;  %v1606_v1 = vrot.slane %v1401_v36, 2  ;;  %v1883_v8 = vmul.f32 %v6157_v27, %v615_v5  ;;  %v2365_v60 = vmul.f32 %v6159_v28, %v615_v5 }
 0x1f9   : > { %v2789_v29 = vadd.f32 %v2623_v54, %v2307_v35  ;;  %v2790_v37 = vadd.f32 %v2625_v45, %v2308_v11  ;;  %v8134_v47 = vmax.f32 %v3108_v59, %v3188_v2  ;;  %v9559_v48 = vrot.slane %v7983_v55, 1 }
 0x1fa   : > { %v9560_v20 = vrot.slane %v8079_v30, 1  ;;  %v9561_v9 = vrot.slane %v7986_v52, 2  ;;  %v1609_v54 = vsel %vm1516_vm3, %v1606_v1, %v9430_v51  ;;  %v2088_v2 = vrot.slane %v1883_v8, 3 }
 0x1fb   : > { %9558 = vst [vmem:[#allocation20_spill] sm:$0xff] %v8134_v47  ;;  %v1125_v43 = vsel %vm1034_vm2, %v9559_v48, %v1124_v44  ;;  %v2875_v5 = vadd.f32 %v7549_v63, %v2789_v29  ;;  %v2876_v45 = vadd.f32 %v7549_v63, %v2790_v37  ;;  %v2570_v35 = vrot.slane %v2365_v60, 4 }
 0x1fc   : > { %v1127_v16 = vsel %vm1034_vm2, %v1124_v44, %v9560_v20  ;;  %v1607_v36 = vsel %vm1516_vm3, %v9561_v9, %v1606_v1  ;;  %v1317_v55 = vadd.f32 %v1125_v43, %v7980_v15  ;;  %v9428_v11 = vrot.slane %v8134_v47, 1 }
 0x1fd   : > { %v1318_v59 = vadd.f32 %v1127_v16, %v831_v31  ;;  %v8153_v44 = vmul.f32 %v6150_v23, %v760_v18  ;;  %v2954_v52 = vmax.f32 %v2875_v5, 0.0  ;;  %v2955_v48 = vmax.f32 %v2876_v45, 0.0 }
 0x1fe   : > { %v1799_v20 = vadd.f32 %v1607_v36, %v1317_v55  ;;  %v9562_v1 = vrot.slane %v7990_v41, 3  ;;  %v2091_v15 = vsel %vm1998_vm4, %v2088_v2, %v9429_v4  ;;  %v9563_v60 = vrot.slane %v7993_v50, 4 }
 0x1ff   : > { %v1800_v9 = vadd.f32 %v1609_v54, %v1318_v59  ;;  %v9564_v37 = vrot.slane %v8122_v33, 4  ;;  %3034 = vst.msk [vmem:[#allocation2 + $0x230] sm:$0xff] %vm2963_vm0, %v2954_v52  ;;  %3035 = vst.msk [vmem:[#allocation2 + $0x238] sm:$0xff] %vm2963_vm0, %v2955_v48  ;;  %v9565_v16 = vrot.slane %v8008_v21, 1  ;;  %v8175_v50 = vmul.f32 %v6152_v24, %v760_v18  ;;  %v3082_v48 = vld [vmem:[#allocation2 + $0x130] ss:$2 sm:$0xff] }
 0x200   : > { %v2089_v29 = vsel %vm1998_vm4, %v9562_v1, %v2088_v2  ;;  %v2571_v8 = vsel %vm2480_vm5, %v9563_v60, %v2570_v35  ;;  %v8179_v54 = vmul.f32 %v6154_v25, %v760_v18  ;;  %v8182_v5 = vmul.f32 %v6157_v27, %v760_v18 }
 0x201   : > { %v2573_v31 = vsel %vm2480_vm5, %v2570_v35, %v9564_v37  ;;  %v2281_v43 = vadd.f32 %v2089_v29, %v1799_v20  ;;  %v2282_v41 = vadd.f32 %v2091_v15, %v1800_v9  ;;  %v3364_v36 = vsel %vm1034_vm2, %v9565_v16, %v9428_v11  ;;  %v3162_v20 = vld [vmem:[#allocation2 + $0x131] ss:$2 sm:$0xff]  ;;  %v630_v9 = vpop.permute.xlu1 %629 }
 0x202   : > { %5377 = vmatmul.mubr.msk.f32.gmra.mrb[10].mxu1 %vm2963_vm0, %v3364_v36  ;;  %v8185_v45 = vmul.f32 %v6159_v28, %v760_v18  ;;  %v859_v55 = vmul.f32 %v6150_v23, %v755_v57  ;;  %v9434_v35 = vrot.slane %v8175_v50, 1  ;;  %v947_v52 = vmul.f32 %v6152_v24, %v755_v57 }
 0x203   : > { %v2763_v59 = vadd.f32 %v2571_v8, %v2281_v43  ;;  %v2764_v2 = vadd.f32 %v2573_v31, %v2282_v41  ;;  %5379 = vmatprep.mubr.msk.f32.mxu1 %vm5941_vm1, %v9462_v49  ;;  %v9433_v1 = vrot.slane %v8179_v54, 2  ;;  %v9432_v29 = vrot.slane %v8182_v5, 3 }
 0x204   : > { %v1429_v15 = vmul.f32 %v6154_v25, %v755_v57  ;;  %v1180_v37 = vrot.slane %v947_v52, 1  ;;  %v1911_v31 = vmul.f32 %v6157_v27, %v755_v57  ;;  %v2393_v41 = vmul.f32 %v6159_v28, %v755_v57 }
 0x205   : > { %v2849_v60 = vadd.f32 %v7549_v63, %v2763_v59  ;;  %v2850_v8 = vadd.f32 %v7549_v63, %v2764_v2  ;;  %v8200_v16 = vmax.f32 %v3082_v48, %v3162_v20  ;;  %v8203_v36 = vmul.f32 %v6150_v23, %v630_v9 }
 0x206   : > { %v1662_v43 = vrot.slane %v1429_v15, 2  ;;  %v9566_v51 = vrot.slane %v8036_v53, 1  ;;  %v1183_v63 = vsel %vm1034_vm2, %v1180_v37, %v9434_v35  ;;  %v9567_v57 = vrot.slane %v8039_v6, 2 }
 0x207   : > { %v2928_v11 = vmax.f32 %v2849_v60, 0.0  ;;  %v2929_v4 = vmax.f32 %v2850_v8, 0.0  ;;  %v1346_v2 = vadd.f32 %v1183_v63, %v859_v55  ;;  %v2144_v53 = vrot.slane %v1911_v31, 3  ;;  %v625_v60 = vpop.permute.xlu0 %624 }
 0x208   : > { %v1181_v18 = vsel %vm1034_vm2, %v9566_v51, %v1180_v37  ;;  %v1663_v52 = vsel %vm1516_vm3, %v9567_v57, %v1662_v43  ;;  %v1665_v48 = vsel %vm1516_vm3, %v1662_v43, %v9433_v1  ;;  %v2626_v51 = vrot.slane %v2393_v41, 4 }
 0x209   : > { %v1345_v59 = vadd.f32 %v1181_v18, %v8011_v39  ;;  %3008 = vst.msk [vmem:[#allocation2 + $0x160] sm:$0xff] %vm2963_vm0, %v2928_v11  ;;  %3009 = vst.msk [vmem:[#allocation2 + $0x168] sm:$0xff] %vm2963_vm0, %v2929_v4  ;;  %v9431_v20 = vrot.slane %v8200_v16, 1  ;;  %v8222_v15 = vmul.f32 %v6152_v24, %v630_v9  ;;  %v1828_v55 = vadd.f32 %v1665_v48, %v1346_v2  ;;  %v3190_v48 = vld [vmem:[#allocation2 + $0x211] ss:$2 sm:$0xff] }
 0x20a   : > { %v8225_v6 = vmul.f32 %v6154_v25, %v630_v9  ;;  %v8228_v18 = vmul.f32 %v6157_v27, %v630_v9  ;;  %v9568_v11 = vrot.slane %v8042_v40, 3  ;;  %v2147_v8 = vsel %vm1998_vm4, %v2144_v53, %v9432_v29 }
 0x20b   : > { %v1827_v39 = vadd.f32 %v1663_v52, %v1345_v59  ;;  %v9569_v37 = vrot.slane %v8045_v46, 4  ;;  %v9570_v43 = vrot.slane %v8185_v45, 4  ;;  %v2310_v59 = vadd.f32 %v2147_v8, %v1828_v55  ;;  %v3110_v52 = vld [vmem:[#allocation2 + $0x210] ss:$2 sm:$0xff] }
 0x20c   : > { %v2145_v4 = vsel %vm1998_vm4, %v9568_v11, %v2144_v53  ;;  %v9571_v40 = vrot.slane %v8072_v3, 1  ;;  %v9435_v57 = vrot.slane %v8222_v15, 1  ;;  %v1403_v8 = vmul.f32 %v6154_v25, %v625_v60 }
 0x20d   : > { %v2627_v31 = vsel %vm2480_vm5, %v9569_v37, %v2626_v51  ;;  %v2629_v41 = vsel %vm2480_vm5, %v2626_v51, %v9570_v43  ;;  %v2309_v63 = vadd.f32 %v2145_v4, %v1827_v39  ;;  %v8252_v51 = vmul.f32 %v6159_v28, %v630_v9  ;;  %v770_v37 = vpop.permute.xlu1 %769 }
 0x20e   : > { %v3338_v2 = vsel %vm1034_vm2, %v9571_v40, %v9431_v20  ;;  %v833_v39 = vmul.f32 %v6150_v23, %v625_v60  ;;  %v2792_v11 = vadd.f32 %v2629_v41, %v2310_v59  ;;  %v921_v4 = vmul.f32 %v6152_v24, %v625_v60 }
 0x20f   : > { %5338 = vmatmul.mubr.msk.f32.gmra.mrb[36].mxu0 %vm2963_vm0, %v3338_v2  ;;  %v2791_v55 = vadd.f32 %v2627_v31, %v2309_v63  ;;  %v1885_v40 = vmul.f32 %v6157_v27, %v625_v60  ;;  %v2367_v2 = vmul.f32 %v6159_v28, %v625_v60  ;;  %v8262_v9 = vmax.f32 %v3110_v52, %v3190_v48  ;;  %v8267_v31 = vld [vmem:[%s9333_s2] ss:$0 sm:$0xff]  ;;  %v8275_v60 = vpop.f32.mrb[0].mxu0 }
 0x210   : > { %5340 = vmatprep.mubr.msk.f32.mxu0 %vm5941_vm1, %v9462_v49  ;;  %v2878_v63 = vadd.f32 %v8267_v31, %v2792_v11  ;;  %v1128_v59 = vrot.slane %v921_v4, 1  ;;  %v1610_v20 = vrot.slane %v1403_v8, 2  ;;  %v8273_v43 = vmul.f32 %v6150_v23, %v770_v37  ;;  %9572 = vst [vmem:[#allocation21_spill] sm:$0xff] %v8275_v60  ;;  %v5285_v11 = vpop.f32.mrb[1].mxu0 }
 0x211   : > { %v2877_v41 = vadd.f32 %v8267_v31, %v2791_v55  ;;  %v2092_v29 = vrot.slane %v1885_v40, 3  ;;  %v2574_v1 = vrot.slane %v2367_v2, 4  ;;  %v9573_v53 = vrot.slane %v8079_v30, 1 }
 0x212   : > { %v2957_v48 = vmax.f32 %v2878_v63, 0.0  ;;  %v1131_v55 = vsel %vm1034_vm2, %v1128_v59, %v9435_v57  ;;  %v9574_v40 = vrot.slane %v8116_v26, 2  ;;  %v9575_v35 = vrot.slane %v8225_v6, 2  ;;  %v765_v63 = vpop.permute.xlu0 %764 }
 0x213   : > { %v2956_v52 = vmax.f32 %v2877_v41, 0.0  ;;  %v1129_v46 = vsel %vm1034_vm2, %v9573_v53, %v1128_v59  ;;  %v1320_v8 = vadd.f32 %v1131_v55, %v833_v39  ;;  %v9576_v30 = vrot.slane %v8119_v10, 3 }
 0x214   : > { %v1319_v4 = vadd.f32 %v1129_v46, %v8075_v13  ;;  %v1611_v2 = vsel %vm1516_vm3, %v9574_v40, %v1610_v20  ;;  %v1613_v41 = vsel %vm1516_vm3, %v1610_v20, %v9575_v35  ;;  %3037 = vst.msk [vmem:[#allocation2 + $0x248] sm:$0xff] %vm2963_vm0, %v2957_v48  ;;  %v9577_v13 = vrot.slane %v8228_v18, 3 }
 0x215   : > { %3036 = vst.msk [vmem:[#allocation2 + $0x240] sm:$0xff] %vm2963_vm0, %v2956_v52  ;;  %v2093_v53 = vsel %vm1998_vm4, %v9576_v30, %v2092_v29  ;;  %v9578_v26 = vrot.slane %v8122_v33, 4  ;;  %v9579_v59 = vrot.slane %v8252_v51, 4  ;;  %v1802_v52 = vadd.f32 %v1613_v41, %v1320_v8 }
 0x216   : > { %v2095_v46 = vsel %vm1998_vm4, %v2092_v29, %v9577_v13  ;;  %v1801_v20 = vadd.f32 %v1611_v2, %v1319_v4  ;;  %v9580_v48 = vrot.slane %v8262_v9, 1  ;;  %v9581_v10 = vrot.slane %v8134_v47, 1  ;;  %v8312_v29 = vpop.f32.mrb[2].mxu0 }
 0x217   : > { %v2575_v39 = vsel %vm2480_vm5, %v9578_v26, %v2574_v1  ;;  %v2577_v35 = vsel %vm2480_vm5, %v2574_v1, %v9579_v59  ;;  %v8310_v11 = vmul.f32 %v6152_v24, %v770_v37  ;;  %9582 = vst [vmem:[#allocation22_spill] sm:$0xff] %v8312_v29  ;;  %v8316_v33 = vmul.f32 %v6154_v25, %v770_v37  ;;  %v5288_v40 = vpop.f32.mrb[3].mxu0  ;;  %v3084_v26 = vld [vmem:[#allocation2 + $0x140] ss:$2 sm:$0xff]  ;;  %v3164_v59 = vld [vmem:[#allocation2 + $0x141] ss:$2 sm:$0xff] }
 0x218   : > { %v3366_v55 = vsel %vm1034_vm2, %v9581_v10, %v9580_v48  ;;  %v8319_v1 = vmul.f32 %v6157_v27, %v770_v37  ;;  %v8322_v4 = vmul.f32 %v6159_v28, %v770_v37  ;;  %v861_v8 = vmul.f32 %v6150_v23, %v765_v63  ;;  %v640_v48 = vpop.permute.xlu1 %639  ;;  %v8334_v57 = vpop.f32.mrb[4].mxu0 }
 0x219   : > { %5380 = vmatmul.mubr.msk.f32.gmra.mrb[12].mxu1 %vm2963_vm0, %v3366_v55  ;;  %v2283_v2 = vadd.f32 %v2093_v53, %v1801_v20  ;;  %v2284_v41 = vadd.f32 %v2095_v46, %v1802_v52  ;;  %v949_v13 = vmul.f32 %v6152_v24, %v765_v63  ;;  %v1431_v40 = vmul.f32 %v6154_v25, %v765_v63  ;;  %v5291_v37 = vpop.f32.mrb[5].mxu0 }
 0x21a   : > { %5382 = vmatprep.mubr.msk.f32.mxu1 %vm5941_vm1, %v9462_v49  ;;  %v1913_v52 = vmul.f32 %v6157_v27, %v765_v63  ;;  %9583 = vst [vmem:[#allocation23_spill] sm:$0xff] %v8334_v57  ;;  %v2395_v29 = vmul.f32 %v6159_v28, %v765_v63  ;;  %v8337_v60 = vmax.f32 %v3084_v26, %v3164_v59  ;;  %v9586_v26 = vrot.slane %v8179_v54, 2  ;;  %v635_v54 = vpop.permute.xlu0 %634 }
 0x21b   : > { %v2765_v53 = vadd.f32 %v2575_v39, %v2283_v2  ;;  %v2766_v46 = vadd.f32 %v2577_v35, %v2284_v41  ;;  %v1184_v20 = vrot.slane %v949_v13, 1  ;;  %v1666_v30 = vrot.slane %v1431_v40, 2 }
 0x21c   : > { %v8340_v10 = vmul.f32 %v6150_v23, %v640_v48  ;;  %v9584_v39 = vrot.slane %v8175_v50, 1  ;;  %v9585_v2 = vrot.slane %v8310_v11, 1  ;;  %v9587_v37 = vrot.slane %v8316_v33, 2 }
 0x21d   : > { %v2851_v55 = vadd.f32 %v8267_v31, %v2765_v53  ;;  %v2852_v47 = vadd.f32 %v8267_v31, %v2766_v46  ;;  %v1667_v59 = vsel %vm1516_vm3, %v9586_v26, %v1666_v30  ;;  %v2148_v50 = vrot.slane %v1913_v52, 3 }
 0x21e   : > { %v1185_v35 = vsel %vm1034_vm2, %v9584_v39, %v1184_v20  ;;  %v1187_v41 = vsel %vm1034_vm2, %v1184_v20, %v9585_v2  ;;  %v1669_v40 = vsel %vm1516_vm3, %v1666_v30, %v9587_v37  ;;  %v2630_v57 = vrot.slane %v2395_v29, 4  ;;  %v8357_v39 = vpop.f32.mrb[6].mxu0 }
 0x21f   : > { %v1347_v63 = vadd.f32 %v1185_v35, %v8153_v44  ;;  %v1348_v13 = vadd.f32 %v1187_v41, %v861_v8  ;;  %v2930_v53 = vmax.f32 %v2851_v55, 0.0  ;;  %v2931_v46 = vmax.f32 %v2852_v47, 0.0  ;;  %v5294_v8 = vpop.f32.mrb[7].mxu0 }
 0x220   : > { %v9442_v20 = vrot.slane %v8337_v60, 1  ;;  %v8361_v44 = vmul.f32 %v6152_v24, %v640_v48  ;;  %v9588_v30 = vrot.slane %v8182_v5, 3  ;;  %v9589_v29 = vrot.slane %v8319_v1, 3  ;;  %v3112_v8 = vld [vmem:[#allocation2 + $0x220] ss:$2 sm:$0xff] }
 0x221   : > { %v1829_v21 = vadd.f32 %v1667_v59, %v1347_v63  ;;  %v1830_v3 = vadd.f32 %v1669_v40, %v1348_v13  ;;  %3010 = vst.msk [vmem:[#allocation2 + $0x170] sm:$0xff] %vm2963_vm0, %v2930_v53  ;;  %3011 = vst.msk [vmem:[#allocation2 + $0x178] sm:$0xff] %vm2963_vm0, %v2931_v46  ;;  %v9590_v52 = vrot.slane %v8185_v45, 4  ;;  %v9591_v2 = vrot.slane %v8322_v4, 4 }
 0x222   : > { %v2149_v47 = vsel %vm1998_vm4, %v9588_v30, %v2148_v50  ;;  %v2151_v55 = vsel %vm1998_vm4, %v2148_v50, %v9589_v29  ;;  %v9592_v5 = vrot.slane %v8200_v16, 1  ;;  %v8385_v45 = vmul.f32 %v6154_v25, %v640_v48  ;;  %v3192_v30 = vld [vmem:[#allocation2 + $0x221] ss:$2 sm:$0xff] }
 0x223   : > { %v2631_v35 = vsel %vm2480_vm5, %v9590_v52, %v2630_v57  ;;  %v2633_v41 = vsel %vm2480_vm5, %v2630_v57, %v9591_v2  ;;  %v2311_v63 = vadd.f32 %v2149_v47, %v1829_v21  ;;  %v2312_v13 = vadd.f32 %v2151_v55, %v1830_v3  ;;  %v8394_v3 = vpop.f32.mrb[8].mxu0  ;;  %v780_v47 = vpop.permute.xlu1 %779 }
 0x224   : > { %v3340_v26 = vsel %vm1034_vm2, %v9592_v5, %v9442_v20  ;;  %v8388_v37 = vmul.f32 %v6157_v27, %v640_v48  ;;  %v8391_v57 = vmul.f32 %v6159_v28, %v640_v48  ;;  %v835_v21 = vmul.f32 %v6150_v23, %v635_v54  ;;  %9593 = vst [vmem:[#allocation24_spill] sm:$0xff] %v8394_v3  ;;  %v5297_v29 = vpop.f32.mrb[9].mxu0 }
 0x225   : > { %5341 = vmatmul.mubr.msk.f32.gmra.mrb[38].mxu0 %vm2963_vm0, %v3340_v26  ;;  %v2793_v40 = vadd.f32 %v2631_v35, %v2311_v63  ;;  %v2794_v53 = vadd.f32 %v2633_v41, %v2312_v13  ;;  %v923_v46 = vmul.f32 %v6152_v24, %v635_v54  ;;  %v1405_v50 = vmul.f32 %v6154_v25, %v635_v54  ;;  %v8412_v48 = vpop.f32.mrb[10].mxu0 }
 0x226   : > { %5343 = vmatprep.mubr.msk.f32.mxu0 %vm5941_vm1, %v9462_v49  ;;  %v1887_v35 = vmul.f32 %v6157_v27, %v635_v54  ;;  %v2369_v26 = vmul.f32 %v6159_v28, %v635_v54  ;;  %v8407_v20 = vmax.f32 %v3112_v8, %v3192_v30  ;;  %v8410_v29 = vmul.f32 %v6150_v23, %v780_v47 }
 0x227   : > { %v2879_v2 = vadd.f32 %v8267_v31, %v2793_v40  ;;  %v2880_v41 = vadd.f32 %v8267_v31, %v2794_v53  ;;  %v1132_v63 = vrot.slane %v923_v46, 1  ;;  %v1614_v13 = vrot.slane %v1405_v50, 2  ;;  %9594 = vst [vmem:[#allocation25_spill] sm:$0xff] %v8412_v48  ;;  %v868_v3 = vpop.permute.xlu1 %867 }
 0x228   : > { %v2096_v5 = vrot.slane %v1887_v35, 3  ;;  %v9595_v59 = vrot.slane %v8222_v15, 1  ;;  %v9596_v53 = vrot.slane %v8361_v44, 1  ;;  %v9597_v8 = vrot.slane %v8225_v6, 2 }
 0x229   : > { %v2958_v55 = vmax.f32 %v2879_v2, 0.0  ;;  %v2959_v52 = vmax.f32 %v2880_v41, 0.0  ;;  %v9598_v35 = vrot.slane %v8385_v45, 2  ;;  %v5300_v41 = vpop.f32.mrb[11].mxu0  ;;  %v9599_v15 = vrot.slane %v8228_v18, 3 }
 0x22a   : > { %v1133_v40 = vsel %vm1034_vm2, %v9595_v59, %v1132_v63  ;;  %v1135_v46 = vsel %vm1034_vm2, %v1132_v63, %v9596_v53  ;;  %v1615_v30 = vsel %vm1516_vm3, %v9597_v8, %v1614_v13  ;;  %v2578_v6 = vrot.slane %v2369_v26, 4 }
 0x22b   : > { %v1321_v50 = vadd.f32 %v1133_v40, %v8203_v36  ;;  %v1322_v54 = vadd.f32 %v1135_v46, %v835_v21  ;;  %v1617_v2 = vsel %vm1516_vm3, %v1614_v13, %v9598_v35  ;;  %3038 = vst.msk [vmem:[#allocation2 + $0x250] sm:$0xff] %vm2963_vm0, %v2958_v55  ;;  %3039 = vst.msk [vmem:[#allocation2 + $0x258] sm:$0xff] %vm2963_vm0, %v2959_v52  ;;  %v9600_v36 = vrot.slane %v8388_v37, 3  ;;  %v775_v52 = vpop.permute.xlu0 %774  ;;  %v8442_v46 = vpop.f32.mrb[12].mxu0 }
 0x22c   : > { %v2097_v59 = vsel %vm1998_vm4, %v9599_v15, %v2096_v5  ;;  %v9443_v63 = vrot.slane %v8407_v20, 1  ;;  %v8437_v13 = vmul.f32 %v6152_v24, %v780_v47  ;;  %v8440_v55 = vmul.f32 %v6154_v25, %v780_v47  ;;  %9601 = vst [vmem:[#allocation26_spill] sm:$0xff] %v8442_v46  ;;  %v5303_v35 = vpop.f32.mrb[13].mxu0 }
 0x22d   : > { %v2099_v21 = vsel %vm1998_vm4, %v2096_v5, %v9600_v36  ;;  %v1803_v40 = vadd.f32 %v1615_v30, %v1321_v50  ;;  %v1804_v53 = vadd.f32 %v1617_v2, %v1322_v54  ;;  %v9602_v18 = vrot.slane %v8252_v51, 4  ;;  %v3086_v36 = vld [vmem:[#allocation2 + $0x150] ss:$2 sm:$0xff] }
 0x22e   : > { %v9603_v5 = vrot.slane %v8391_v57, 4  ;;  %v9604_v50 = vrot.slane %v8262_v9, 1  ;;  %v8456_v30 = vmul.f32 %v6157_v27, %v780_v47 }
 0x22f   : > { %v2579_v8 = vsel %vm2480_vm5, %v9602_v18, %v2578_v6  ;;  %v2285_v2 = vadd.f32 %v2097_v59, %v1803_v40  ;;  %v2286_v41 = vadd.f32 %v2099_v21, %v1804_v53  ;;  %v1433_v40 = vmul.f32 %v6154_v25, %v775_v52 }
 0x230   : > { %v2581_v26 = vsel %vm2480_vm5, %v2578_v6, %v9603_v5  ;;  %v3368_v54 = vsel %vm1034_vm2, %v9604_v50, %v9443_v63  ;;  %v3166_v6 = vld [vmem:[#allocation2 + $0x151] ss:$2 sm:$0xff]  ;;  %v2154_v18 = vrot.slane %v8456_v30, 3  ;;  %v8463_v5 = vmul.f32 %v6159_v28, %v780_v47 }
 0x231   : > { %5383 = vmatmul.mubr.msk.f32.gmra.mrb[14].mxu1 %vm2963_vm0, %v3368_v54  ;;  %v863_v50 = vmul.f32 %v6150_v23, %v775_v52  ;;  %v951_v63 = vmul.f32 %v6152_v24, %v775_v52  ;;  %v2767_v59 = vadd.f32 %v2579_v8, %v2285_v2  ;;  %v2768_v21 = vadd.f32 %v2581_v26, %v2286_v41  ;;  %v8471_v54 = vpop.f32.mrb[14].mxu0 }
 0x232   : > { %5385 = vmatprep.mubr.msk.f32.mxu1 %vm5941_vm1, %v9462_v49  ;;  %v1915_v53 = vmul.f32 %v6157_v27, %v775_v52  ;;  %9605 = vst [vmem:[#allocation27_spill] sm:$0xff] %v8471_v54  ;;  %v2636_v30 = vrot.slane %v8463_v5, 4  ;;  %v2397_v47 = vmul.f32 %v6159_v28, %v775_v52  ;;  %v8475_v15 = vmax.f32 %v3086_v36, %v3166_v6  ;;  %v5306_v51 = vpop.f32.mrb[15].mxu0 }
 0x233   : > { %v1188_v35 = vrot.slane %v951_v63, 1  ;;  %v2853_v46 = vadd.f32 %v8267_v31, %v2767_v59  ;;  %v2854_v48 = vadd.f32 %v8267_v31, %v2768_v21  ;;  %v1670_v8 = vrot.slane %v1433_v40, 2  ;;  %v8487_v21 = vpop.f32.mrb[16].mxu0 }
 0x234   : > { %v2152_v26 = vrot.slane %v1915_v53, 3  ;;  %v9606_v2 = vrot.slane %v8310_v11, 1  ;;  %v9607_v54 = vrot.slane %v8437_v13, 1  ;;  %v2634_v63 = vrot.slane %v2397_v47, 4 }
 0x235   : > { %v3341_v52 = vrot.slane %v8475_v15, 1  ;;  %v2932_v36 = vmax.f32 %v2853_v46, 0.0  ;;  %v2933_v6 = vmax.f32 %v2854_v48, 0.0  ;;  %v9608_v40 = vrot.slane %v8316_v33, 2  ;;  %v645_v46 = vpop.permute.xlu0 %644 }
 0x236   : > { %v1189_v41 = vsel %vm1034_vm2, %v9606_v2, %v1188_v35  ;;  %v1191_v5 = vsel %vm1034_vm2, %v1188_v35, %v9607_v54  ;;  %v9609_v53 = vrot.slane %v8440_v55, 2  ;;  %v9610_v54 = vrot.slane %v8319_v1, 3 }
 0x237   : > { %v1349_v51 = vadd.f32 %v1189_v41, %v8273_v43  ;;  %v1350_v59 = vadd.f32 %v1191_v5, %v863_v50  ;;  %v1671_v11 = vsel %vm1516_vm3, %v9608_v40, %v1670_v8  ;;  %v2155_v48 = vsel %vm1998_vm4, %v2152_v26, %v2154_v18  ;;  %v5309_v43 = vpop.f32.mrb[17].mxu0  ;;  %3012 = vst.msk [vmem:[#allocation2 + $0x180] sm:$0xff] %vm2963_vm0, %v2932_v36 }
 0x238   : > { %v1673_v2 = vsel %vm1516_vm3, %v1670_v8, %v9609_v53  ;;  %v2153_v35 = vsel %vm1998_vm4, %v9610_v54, %v2152_v26  ;;  %3013 = vst.msk [vmem:[#allocation2 + $0x188] sm:$0xff] %vm2963_vm0, %v2933_v6  ;;  %v9611_v47 = vrot.slane %v8322_v4, 4  ;;  %v2637_v8 = vsel %vm2480_vm5, %v2634_v63, %v2636_v30 }
 0x239   : > { %v1831_v50 = vadd.f32 %v1671_v11, %v1349_v51  ;;  %v1832_v33 = vadd.f32 %v1673_v2, %v1350_v59  ;;  %v9612_v1 = vrot.slane %v8337_v60, 1  ;;  %v953_v5 = vmul.f32 %v6152_v24, %v868_v3 }
 0x23a   : > { %v2635_v41 = vsel %vm2480_vm5, %v9611_v47, %v2634_v63  ;;  %v1435_v36 = vmul.f32 %v6154_v25, %v868_v3  ;;  %v1917_v6 = vmul.f32 %v6157_v27, %v868_v3  ;;  %v2399_v4 = vmul.f32 %v6159_v28, %v868_v3 }
 0x23b   : > { %v3342_v26 = vsel %vm1034_vm2, %v9612_v1, %v3341_v52  ;;  %v2313_v51 = vadd.f32 %v2153_v35, %v1831_v50  ;;  %v2314_v59 = vadd.f32 %v2155_v48, %v1832_v33  ;;  %v837_v63 = vmul.f32 %v6150_v23, %v645_v46 }
 0x23c   : > { %5344 = vmatmul.mubr.msk.f32.gmra.mrb[40].mxu0 %vm2963_vm0, %v3342_v26  ;;  %v1192_v40 = vrot.slane %v953_v5, 1  ;;  %v1674_v11 = vrot.slane %v1435_v36, 2  ;;  %v2156_v53 = vrot.slane %v1917_v6, 3  ;;  %v925_v2 = vmul.f32 %v6152_v24, %v645_v46  ;;  %v3114_v6 = vld [vmem:[#allocation2 + $0x230] ss:$2 sm:$0xff] }
 0x23d   : > { %5346 = vmatprep.mubr.msk.f32.mxu0 %vm5941_vm1, %v9462_v49  ;;  %v2795_v54 = vadd.f32 %v2635_v41, %v2313_v51  ;;  %v2796_v43 = vadd.f32 %v2637_v8, %v2314_v59  ;;  %v2638_v47 = vrot.slane %v2399_v4, 4  ;;  %v1407_v35 = vmul.f32 %v6154_v25, %v645_v46  ;;  %v3194_v51 = vld [vmem:[#allocation2 + $0x231] ss:$2 sm:$0xff] }
 0x23e   : > { %v9613_v48 = vrot.slane %v8437_v13, 1  ;;  %v9614_v3 = vrot.slane %v8440_v55, 2  ;;  %v2157_v33 = vsel %vm1998_vm4, %v2154_v18, %v2156_v53  ;;  %v1136_v1 = vrot.slane %v925_v2, 1 }
 0x23f   : > { %v2881_v24 = vadd.f32 %v8267_v31, %v2795_v54  ;;  %v2882_v26 = vadd.f32 %v8267_v31, %v2796_v43  ;;  %v2639_v8 = vsel %vm2480_vm5, %v2636_v30, %v2638_v47  ;;  %v9615_v25 = vrot.slane %v8361_v44, 1  ;;  %v3168_v30 = vld [vmem:[#allocation2 + $0x161] ss:$2 sm:$0xff] }
 0x240   : > { %v1193_v50 = vsel %vm1034_vm2, %v9613_v48, %v1192_v40  ;;  %v1675_v23 = vsel %vm1516_vm3, %v9614_v3, %v1674_v11  ;;  %v9616_v5 = vrot.slane %v6911_v14, 1  ;;  %v1618_v36 = vrot.slane %v1407_v35, 2  ;;  %v3088_v11 = vld [vmem:[#allocation2 + $0x160] ss:$2 sm:$0xff]  ;;  %v3196_v47 = vld [vmem:[#allocation2 + $0x241] ss:$2 sm:$0xff] }
 0x241   : > { %v1351_v41 = vadd.f32 %v1193_v50, %v8410_v29  ;;  %v1137_v13 = vsel %vm1034_vm2, %v9615_v25, %v1136_v1  ;;  %v1889_v18 = vmul.f32 %v6157_v27, %v645_v46  ;;  %v2960_v59 = vmax.f32 %v2881_v24, 0.0  ;;  %v3116_v27 = vld [vmem:[#allocation2 + $0x240] ss:$2 sm:$0xff]  ;;  %v3170_v50 = vld [vmem:[#allocation2 + $0x171] ss:$2 sm:$0xff]  ;;  %v8550_v3 = vpop.f32.mrb[18].mxu0 }
 0x242   : > { %v1139_v55 = vsel %vm1034_vm2, %v1136_v1, %v9616_v5  ;;  %v2961_v4 = vmax.f32 %v2882_v26, 0.0  ;;  %v1323_v29 = vadd.f32 %v1137_v13, %v8340_v10  ;;  %v9617_v44 = vrot.slane %v8385_v45, 2  ;;  %v3090_v45 = vld [vmem:[#allocation2 + $0x170] ss:$2 sm:$0xff]  ;;  %v3243_v5 = vld [vmem:[%s9334_s3] sm:$0xff] }
 0x243   : > { %v1833_v40 = vadd.f32 %v1675_v23, %v1351_v41  ;;  %v1324_v53 = vadd.f32 %v1139_v55, %v837_v63  ;;  %v9618_v14 = vrot.slane %v6914_v56, 2  ;;  %v2100_v43 = vrot.slane %v1889_v18, 3  ;;  %3040 = vst.msk [vmem:[#allocation2 + $0x260] sm:$0xff] %vm2963_vm0, %v2960_v59  ;;  %v3118_v18 = vld [vmem:[#allocation2 + $0x250] ss:$2 sm:$0xff] }
 0x244   : > { %v1619_v2 = vsel %vm1516_vm3, %v9617_v44, %v1618_v36  ;;  %3041 = vst.msk [vmem:[#allocation2 + $0x268] sm:$0xff] %vm2963_vm0, %v2961_v4  ;;  %v2371_v48 = vmul.f32 %v6159_v28, %v645_v46  ;;  %v8548_v63 = vmax.f32 %v3114_v6, %v3194_v51  ;;  %v9619_v23 = vrot.slane %v8388_v37, 3  ;;  %v3198_v6 = vld [vmem:[#allocation2 + $0x251] ss:$2 sm:$0xff]  ;;  %v5013_v44 = vld [vmem:[%s9334_s3 + $0x88] sm:$0xff] }
 0x245   : > { %v1621_v54 = vsel %vm1516_vm3, %v1618_v36, %v9618_v14  ;;  %v2315_v35 = vadd.f32 %v2157_v33, %v1833_v40  ;;  %v1805_v10 = vadd.f32 %v1619_v2, %v1323_v29  ;;  %v9620_v24 = vrot.slane %v6917_v12, 3  ;;  %v5312_v33 = vpop.f32.mrb[19].mxu0 }
 0x246   : > { %v1806_v56 = vadd.f32 %v1621_v54, %v1324_v53  ;;  %v2101_v1 = vsel %vm1998_vm4, %v9619_v23, %v2100_v43  ;;  %v8558_v41 = vmax.f32 %v3088_v11, %v3168_v30  ;;  %v2582_v46 = vrot.slane %v2371_v48, 4  ;;  %v5012_v53 = vld [vmem:[%s9334_s3 + $0x80] sm:$0xff] }
 0x247   : > { %v2103_v26 = vsel %vm1998_vm4, %v2100_v43, %v9620_v24  ;;  %v2797_v25 = vadd.f32 %v2639_v8, %v2315_v35  ;;  %v2287_v28 = vadd.f32 %v2101_v1, %v1805_v10  ;;  %v3369_v13 = vrot.slane %v8548_v63, 1  ;;  %v3244_v8 = vld [vmem:[%s9334_s3 + $0x8] sm:$0xff] }
 0x248   : > { %v2288_v55 = vadd.f32 %v2103_v26, %v1806_v56  ;;  %v3343_v37 = vrot.slane %v8558_v41, 1  ;;  %v8565_v36 = vmax.f32 %v3116_v27, %v3196_v47  ;;  %v8567_v12 = vmax.f32 %v3090_v45, %v3170_v50  ;;  %v3092_v43 = vld [vmem:[#allocation2 + $0x180] ss:$2 sm:$0xff]  ;;  %v3172_v27 = vld [vmem:[#allocation2 + $0x181] ss:$2 sm:$0xff]  ;;  %v3246_v47 = vld [vmem:[%s9334_s3 + $0x18] sm:$0xff] }
 0x249   : > { %v2883_v51 = vadd.f32 %v8267_v31, %v2797_v25  ;;  %v9621_v59 = vrot.slane %v8391_v57, 4  ;;  %v9622_v40 = vrot.slane %v6920_v17, 4  ;;  %v9623_v11 = vrot.slane %v8407_v20, 1  ;;  %v3245_v57 = vld [vmem:[%s9334_s3 + $0x10] sm:$0xff] }
 0x24a   : > { %v3344_v14 = vsel %vm1034_vm2, %v3341_v52, %v3343_v37  ;;  %v3371_v54 = vrot.slane %v8565_v36, 1  ;;  %v3345_v10 = vrot.slane %v8567_v12, 1  ;;  %v8603_v48 = vmax.f32 %v3118_v18, %v3198_v6  ;;  %v3247_v18 = vld [vmem:[%s9334_s3 + $0x20] sm:$0xff]  ;;  %v3248_v6 = vld [vmem:[%s9334_s3 + $0x28] sm:$0xff] }
 0x24b   : > { %v2583_v4 = vsel %vm2480_vm5, %v9621_v59, %v2582_v46  ;;  %v2585_v29 = vsel %vm2480_vm5, %v2582_v46, %v9622_v40  ;;  %v3370_v30 = vsel %vm1034_vm2, %v9623_v11, %v3369_v13  ;;  %v2962_v35 = vmax.f32 %v2883_v51, 0.0  ;;  %5347 = vmatmul.mubr.msk.f32.gmra.mrb[42].mxu0 %vm2963_vm0, %v3344_v14  ;;  %v3120_v1 = vld [vmem:[#allocation2 + $0x260] ss:$2 sm:$0xff]  ;;  %v3200_v24 = vld [vmem:[#allocation2 + $0x261] ss:$2 sm:$0xff]  ;;  %v5015_v46 = vld [vmem:[%s9334_s3 + $0x98] sm:$0xff] }
 0x24c   : > { %v2769_v2 = vadd.f32 %v2583_v4, %v2287_v28  ;;  %v2770_v17 = vadd.f32 %v2585_v29, %v2288_v55  ;;  %5386 = vmatmul.mubr.msk.f32.gmra.mrb[16].mxu1 %vm2963_vm0, %v3370_v30  ;;  %v5731_v45 = vpack.c.bf16 %v3244_v8, %v3243_v5  ;;  %v3372_v56 = vsel %vm1034_vm2, %v3369_v13, %v3371_v54  ;;  %v8621_v13 = vpop.f32.mrb[20].mxu0 }
 0x24d   : > { %5388 = vmatprep.mubr.msk.f32.mxu1 %vm5941_vm1, %v9462_v49  ;;  %5349 = vmatprep.mubr.msk.f32.mxu0 %vm5941_vm1, %v9462_v49  ;;  %v5743_v23 = vpack.c.bf16 %v5013_v44, %v5012_v53  ;;  %3042 = vst.msk [vmem:[#allocation2 + $0x270] sm:$0xff] %vm2963_vm0, %v2962_v35  ;;  %v3346_v26 = vsel %vm1034_vm2, %v3343_v37, %v3345_v10  ;;  %v3373_v33 = vrot.slane %v8603_v48, 1  ;;  %v5315_v8 = vpop.f32.mrb[21].mxu0  ;;  %v9624_v4 = vmov 0.0|0.0   ;;  %v5016_v53 = vld [vmem:[%s9334_s3 + $0xa0] sm:$0xff]  ;;  %v5017_v44 = vld [vmem:[%s9334_s3 + $0xa8] sm:$0xff] }
 0x24e   : > { %v2855_v52 = vadd.f32 %v8267_v31, %v2769_v2  ;;  %v2856_v50 = vadd.f32 %v8267_v31, %v2770_v17  ;;  %5732 = vmatpush3.bf16.msra.mxu1 %v5731_v45  ;;  %v8613_v25 = vmax.f32 %v3092_v43, %v3172_v27  ;;  %v5734_v28 = vpack.c.bf16 %v3246_v47, %v3245_v57  ;;  %v5014_v31 = vld [vmem:[%s9334_s3 + $0x90] sm:$0xff]  ;;  %v3250_v2 = vld [vmem:[%s9334_s3 + $0x38] sm:$0xff] }
 0x24f   : > { %5744 = vmatpush3.bf16.msra.mxu0 %v5743_v23  ;;  %v8624_v37 = vmax.f32 %v3120_v1, %v3200_v24  ;;  %v3374_v51 = vsel %vm1034_vm2, %v3371_v54, %v3373_v33  ;;  %5733 = vmatprep.subr.bf16.mxu1 %v9624_v4  ;;  %v5746_v29 = vpack.c.bf16 %v5015_v46, %v5014_v31  ;;  %v3249_v57 = vld [vmem:[%s9334_s3 + $0x30] sm:$0xff]  ;;  %v8681_v1 = vpop.f32.mrb[22].mxu0  ;;  %v9625_v31 = vrot.slane %v7492_v22, 1 }
 0x250   : > { %v2934_v5 = vmax.f32 %v2855_v52, 0.0  ;;  %v2935_v55 = vmax.f32 %v2856_v50, 0.0  ;;  %5389 = vmatmul.mubr.msk.f32.gmra.mrb[18].mxu1 %vm2963_vm0, %v3372_v56  ;;  %5350 = vmatmul.mubr.msk.f32.gmra.mrb[44].mxu0 %vm2963_vm0, %v3346_v26  ;;  %v3347_v59 = vrot.slane %v8613_v25, 1  ;;  %v5737_v30 = vpack.c.bf16 %v3248_v6, %v3247_v18  ;;  %v5018_v35 = vld [vmem:[%s9334_s3 + $0xb0] sm:$0xff]  ;;  %v5318_v26 = vpop.f32.mrb[23].mxu0 }
 0x251   : > { %5391 = vmatprep.mubr.msk.f32.mxu1 %vm5941_vm1, %v9462_v49  ;;  %5352 = vmatprep.mubr.msk.f32.mxu0 %vm5941_vm1, %v9462_v49  ;;  %v3375_v40 = vrot.slane %v8624_v37, 1  ;;  %v5749_v43 = vpack.c.bf16 %v5017_v44, %v5016_v53  ;;  %v5740_v47 = vpack.c.bf16 %v3250_v2, %v3249_v57  ;;  %v8709_v18 = vpop.f32.mrb[24].mxu0  ;;  %v4067_v8 = vrot.slane %v6688_v61, 2 }
 0x252   : > { %3014 = vst.msk [vmem:[#allocation2 + $0x190] sm:$0xff] %vm2963_vm0, %v2934_v5  ;;  %3015 = vst.msk [vmem:[#allocation2 + $0x198] sm:$0xff] %vm2963_vm0, %v2935_v55  ;;  %v3348_v11 = vsel %vm1034_vm2, %v3345_v10, %v3347_v59  ;;  %5735 = vmatpush3.bf16.msra.mxu1 %v5734_v28  ;;  %5745 = vmatprep.subr.bf16.mxu0 %v9624_v4  ;;  %v5019_v10 = vld [vmem:[%s9334_s3 + $0xb8] sm:$0xff]  ;;  %v4065_v5 = vrot.slane %v6625_v0, 2  ;;  %v4064_v55 = vrot.slane %v6623_v19, 2  ;;  %v4079_v44 = vrot.slane %v7061_v7, 2 }
 0x253   : > { %5736 = vmatprep.subr.bf16.mxu1 %v9624_v4  ;;  %v3376_v17 = vsel %vm1034_vm2, %v3373_v33, %v3375_v40  ;;  %5747 = vmatpush3.bf16.msra.mxu0 %v5746_v29  ;;  %v5752_v23 = vpack.c.bf16 %v5019_v10, %v5018_v35  ;;  %v4075_v29 = vrot.slane %v6946_v62, 2  ;;  %v4081_v57 = vrot.slane %v7119_v32, 2 }
 0x254   : > { %5392 = vmatmul.mubr.msk.f32.gmra.mrb[20].mxu1 %vm2963_vm0, %v3374_v51  ;;  %5353 = vmatmul.mubr.msk.f32.gmra.mrb[46].mxu0 %vm2963_vm0, %v3348_v11  ;;  %v3122_v14 = vld [vmem:[#allocation2 + $0x270] ss:$2 sm:$0xff]  ;;  %v3202_v54 = vld [vmem:[#allocation2 + $0x271] ss:$2 sm:$0xff]  ;;  %v4066_v6 = vsel %vm1516_vm3, %v4064_v55, %v4065_v5  ;;  %v5321_v51 = vpop.f32.mrb[25].mxu0  ;;  %v4077_v11 = vrot.slane %v7005_v42, 2 }
 0x255   : > { %5394 = vmatprep.mubr.msk.f32.mxu1 %vm5941_vm1, %v9462_v49  ;;  %5355 = vmatprep.mubr.msk.f32.mxu0 %vm5941_vm1, %v9462_v49  ;;  %v8665_v27 = vmax.f32 %v3122_v14, %v3202_v54  ;;  %v9626_v14 = vld [vmem:[#allocation6_spill] sm:$0xff] }
 0x256   : > { %5738 = vmatpush3.bf16.msra.mxu1 %v5737_v30  ;;  %5748 = vmatprep.subr.bf16.mxu0 %v9624_v4  ;;  %v4083_v54 = vrot.slane %v9626_v14, 2 }
 0x257   : > { %5739 = vmatprep.subr.bf16.mxu1 %v9624_v4  ;;  %v3377_v50 = vrot.slane %v8665_v27, 1  ;;  %5750 = vmatpush3.bf16.msra.mxu0 %v5749_v43  ;;  %v9627_v43 = vld [vmem:[#allocation7_spill] sm:$0xff] }
 0x258   : > { %5395 = vmatmul.mubr.msk.f32.gmra.mrb[22].mxu1 %vm2963_vm0, %v3376_v17  ;;  %5751 = vmatprep.subr.bf16.mxu0 %v9624_v4 }
 0x259   : > { %5397 = vmatprep.mubr.msk.f32.mxu1 %vm5941_vm1, %v9462_v49  ;;  %v3094_v45 = vld [vmem:[#allocation2 + $0x190] ss:$2 sm:$0xff]  ;;  %v3174_v52 = vld [vmem:[#allocation2 + $0x191] ss:$2 sm:$0xff]  ;;  %v3378_v24 = vsel %vm1034_vm2, %v3375_v40, %v3377_v50  ;;  %v4073_v40 = vrot.slane %v6870_v38, 2 }
 0x25a   : > { %v8679_v56 = vmax.f32 %v3094_v45, %v3174_v52  ;;  %5741 = vmatpush3.bf16.msra.mxu1 %v5740_v47  ;;  %v4085_v47 = vrot.slane %v9627_v43, 2  ;;  %v9628_v45 = vld [vmem:[#allocation8_spill] sm:$0xff] }
 0x25b   : > { %5753 = vmatpush3.bf16.msra.mxu0 %v5752_v23  ;;  %v4087_v52 = vrot.slane %v9628_v45, 2 }
 0x25c   : > { %v3349_v33 = vrot.slane %v8679_v56, 1  ;;  %5398 = vmatmul.mubr.msk.f32.gmra.mrb[24].mxu1 %vm2963_vm0, %v3378_v24  ;;  %v4086_v10 = vsel %vm1516_vm3, %v4083_v54, %v4085_v47  ;;  %v9629_v24 = vld [vmem:[#allocation9_spill] sm:$0xff] }
 0x25d   : > { %5416 = vmatprep.mubr.msk.f32.mxu1 %vm5941_vm1, %v9462_v49  ;;  %v4088_v23 = vsel %vm1516_vm3, %v4085_v47, %v4087_v52  ;;  %v4089_v26 = vrot.slane %v9629_v24, 2  ;;  %v4111_v47 = vrot.slane %v8613_v25, 2 }
 0x25e   : > { %v3350_v28 = vsel %vm1034_vm2, %v3347_v59, %v3349_v33  ;;  %v3352_v46 = vsel %vm1034_vm2, %v3349_v33, %v9625_v31  ;;  %v4071_v59 = vrot.slane %v6812_v58, 2 }
 0x25f   : > { %5356 = vmatmul.mubr.msk.f32.gmra.mrb[48].mxu0 %vm2963_vm0, %v3350_v28  ;;  %v4090_v33 = vsel %vm1516_vm3, %v4087_v52, %v4089_v26  ;;  %v9630_v28 = vld [vmem:[#allocation11_spill] sm:$0xff]  ;;  %v4113_v52 = vrot.slane %v8679_v56, 2 }
 0x260   : > { %5358 = vmatprep.mubr.msk.f32.mxu0 %vm5941_vm1, %v9462_v49  ;;  %5417 = vmatmul.mubr.msk.f32.vlgmr.msra.gmra.mrb[26].mxu1 %vm2963_vm0, %v6623_v19  ;;  %v4068_v19 = vsel %vm1516_vm3, %v4065_v5, %v4067_v8  ;;  %v4091_v31 = vrot.slane %v9630_v28, 2 }
 0x261   : > { %5419 = vmatprep.mubr.msk.f32.mxu1 %vm5941_vm1, %v9462_v49 }
 0x262   : > { %v4092_v55 = vsel %vm1516_vm3, %v4089_v26, %v4091_v31 }
 0x263   : > { %5359 = vmatmul.mubr.msk.f32.gmra.mrb[50].mxu0 %vm2963_vm0, %v3352_v46  ;;  %v8759_v30 = vpop.f32.mrb[0].mxu1 }
 0x264   : > { %5549 = vmatprep.mubr.msk.f32.mxu0 %vm5941_vm1, %v9462_v49  ;;  %5420 = vmatmul.mubr.msk.f32.gmra.mrb[28].mxu1 %vm2963_vm0, %v6625_v0  ;;  %v4069_v0 = vrot.slane %v6748_v34, 2  ;;  %v5363_v53 = vpop.f32.mrb[1].mxu1 }
 0x265   : > { %5422 = vmatprep.mubr.msk.f32.mxu1 %vm5941_vm1, %v9462_v49 }
 0x267   : > { %5550 = vmatmul.mubr.msk.f32.vlgmr.msra.gmra.mrb[52].mxu0 %vm2963_vm0, %v4066_v6  ;;  %v9631_v6 = vld [vmem:[#allocation13_spill] sm:$0xff] }
 0x268   : > { %5552 = vmatprep.mubr.msk.f32.mxu0 %vm5941_vm1, %v9462_v49  ;;  %5423 = vmatmul.mubr.msk.f32.gmra.mrb[30].mxu1 %vm2963_vm0, %v6688_v61  ;;  %v4070_v61 = vsel %vm1516_vm3, %v4067_v8, %v4069_v0  ;;  %v4093_v8 = vrot.slane %v9631_v6, 2 }
 0x269   : > { %5425 = vmatprep.mubr.msk.f32.mxu1 %vm5941_vm1, %v9462_v49 }
 0x26a   : > { %v4094_v51 = vsel %vm1516_vm3, %v4091_v31, %v4093_v8 }
 0x26b   : > { %5553 = vmatmul.mubr.msk.f32.gmra.mrb[54].mxu0 %vm2963_vm0, %v4068_v19  ;;  %v9632_v19 = vld [vmem:[#allocation15_spill] sm:$0xff] }
 0x26c   : > { %5555 = vmatprep.mubr.msk.f32.mxu0 %vm5941_vm1, %v9462_v49  ;;  %5426 = vmatmul.mubr.msk.f32.gmra.mrb[32].mxu1 %vm2963_vm0, %v6748_v34  ;;  %v4072_v34 = vsel %vm1516_vm3, %v4069_v0, %v4071_v59  ;;  %v4095_v0 = vrot.slane %v9632_v19, 2 }
 0x26d   : > { %5428 = vmatprep.mubr.msk.f32.mxu1 %vm5941_vm1, %v9462_v49 }
 0x26e   : > { %v8778_v2 = vpop.f32.mrb[26].mxu0 }
 0x26f   : > { %5556 = vmatmul.mubr.msk.f32.gmra.mrb[56].mxu0 %vm2963_vm0, %v4070_v61  ;;  %v5324_v17 = vpop.f32.mrb[27].mxu0 }
 0x270   : > { %5558 = vmatprep.mubr.msk.f32.mxu0 %vm5941_vm1, %v9462_v49  ;;  %5429 = vmatmul.mubr.msk.f32.gmra.mrb[34].mxu1 %vm2963_vm0, %v6812_v58  ;;  %v4074_v58 = vsel %vm1516_vm3, %v4071_v59, %v4073_v40  ;;  %v4096_v59 = vsel %vm1516_vm3, %v4093_v8, %v4095_v0  ;;  %v4103_v17 = vrot.slane %v8337_v60, 2 }
 0x271   : > { %5431 = vmatprep.mubr.msk.f32.mxu1 %vm5941_vm1, %v9462_v49 }
 0x273   : > { %5559 = vmatmul.mubr.msk.f32.gmra.mrb[58].mxu0 %vm2963_vm0, %v4072_v34  ;;  %v9633_v34 = vld [vmem:[#allocation17_spill] sm:$0xff] }
 0x274   : > { %5561 = vmatprep.mubr.msk.f32.mxu0 %vm5941_vm1, %v9462_v49  ;;  %5432 = vmatmul.mubr.msk.f32.gmra.mrb[36].mxu1 %vm2963_vm0, %v6870_v38  ;;  %v4076_v38 = vsel %vm1516_vm3, %v4073_v40, %v4075_v29  ;;  %v4097_v40 = vrot.slane %v9633_v34, 2 }
 0x275   : > { %5434 = vmatprep.mubr.msk.f32.mxu1 %vm5941_vm1, %v9462_v49 }
 0x277   : > { %5562 = vmatmul.mubr.msk.f32.gmra.mrb[60].mxu0 %vm2963_vm0, %v4074_v58 }
 0x278   : > { %5564 = vmatprep.mubr.msk.f32.mxu0 %vm5941_vm1, %v9462_v49  ;;  %5435 = vmatmul.mubr.msk.f32.gmra.mrb[38].mxu1 %vm2963_vm0, %v6946_v62  ;;  %v4078_v62 = vsel %vm1516_vm3, %v4075_v29, %v4077_v11  ;;  %v4098_v29 = vsel %vm1516_vm3, %v4095_v0, %v4097_v40  ;;  %v9638_v0 = vld [vmem:[#allocation16_spill] sm:$0xff] }
 0x279   : > { %5437 = vmatprep.mubr.msk.f32.mxu1 %vm5941_vm1, %v9462_v49  ;;  %v8805_v35 = vpop.f32.mrb[2].mxu1 }
 0x27a   : > { %v5366_v50 = vpop.f32.mrb[3].mxu1 }
 0x27b   : > { %5565 = vmatmul.mubr.msk.f32.gmra.mrb[62].mxu0 %vm2963_vm0, %v4076_v38  ;;  %v9634_v38 = vld [vmem:[#allocation19_spill] sm:$0xff]  ;;  %v4115_v50 = vrot.slane %v7492_v22, 2 }
 0x27c   : > { %5567 = vmatprep.mubr.msk.f32.mxu0 %vm5941_vm1, %v9462_v49  ;;  %5438 = vmatmul.mubr.msk.f32.gmra.mrb[40].mxu1 %vm2963_vm0, %v7005_v42  ;;  %v4080_v42 = vsel %vm1516_vm3, %v4077_v11, %v4079_v44  ;;  %v4099_v11 = vrot.slane %v9634_v38, 2 }
 0x27d   : > { %5440 = vmatprep.mubr.msk.f32.mxu1 %vm5941_vm1, %v9462_v49 }
 0x27e   : > { %v4100_v53 = vsel %vm1516_vm3, %v4097_v40, %v4099_v11  ;;  %v9639_v40 = vld [vmem:[#allocation18_spill] sm:$0xff] }
 0x27f   : > { %5568 = vmatmul.mubr.msk.f32.gmra.mrb[64].mxu0 %vm2963_vm0, %v4078_v62  ;;  %v4101_v62 = vrot.slane %v8200_v16, 2 }
 0x280   : > { %5570 = vmatprep.mubr.msk.f32.mxu0 %vm5941_vm1, %v9462_v49  ;;  %5441 = vmatmul.mubr.msk.f32.gmra.mrb[42].mxu1 %vm2963_vm0, %v7061_v7  ;;  %v4082_v7 = vsel %vm1516_vm3, %v4079_v44, %v4081_v57 }
 0x281   : > { %5443 = vmatprep.mubr.msk.f32.mxu1 %vm5941_vm1, %v9462_v49 }
 0x283   : > { %5571 = vmatmul.mubr.msk.f32.gmra.mrb[66].mxu0 %vm2963_vm0, %v4080_v42 }
 0x284   : > { %5573 = vmatprep.mubr.msk.f32.mxu0 %vm5941_vm1, %v9462_v49  ;;  %5444 = vmatmul.mubr.msk.f32.gmra.mrb[44].mxu1 %vm2963_vm0, %v7119_v32  ;;  %v4084_v32 = vsel %vm1516_vm3, %v4081_v57, %v4083_v54  ;;  %v4102_v57 = vsel %vm1516_vm3, %v4099_v11, %v4101_v62 }
 0x285   : > { %5446 = vmatprep.mubr.msk.f32.mxu1 %vm5941_vm1, %v9462_v49 }
 0x286   : > { %v8832_v46 = vpop.f32.mrb[28].mxu0 }
 0x287   : > { %5574 = vmatmul.mubr.msk.f32.gmra.mrb[68].mxu0 %vm2963_vm0, %v4082_v7  ;;  %v5327_v5 = vpop.f32.mrb[29].mxu0  ;;  %v4105_v7 = vrot.slane %v8475_v15, 2 }
 0x288   : > { %5576 = vmatprep.mubr.msk.f32.mxu0 %vm5941_vm1, %v9462_v49  ;;  %5447 = vmatmul.mubr.msk.f32.gmra.mrb[46].mxu1 %vm2963_vm0, %v9626_v14  ;;  %v4107_v14 = vrot.slane %v8558_v41, 2 }
 0x289   : > { %5449 = vmatprep.mubr.msk.f32.mxu1 %vm5941_vm1, %v9462_v49 }
 0x28b   : > { %5577 = vmatmul.mubr.msk.f32.gmra.mrb[70].mxu0 %vm2963_vm0, %v4084_v32 }
 0x28c   : > { %5579 = vmatprep.mubr.msk.f32.mxu0 %vm5941_vm1, %v9462_v49  ;;  %5450 = vmatmul.mubr.msk.f32.gmra.mrb[48].mxu1 %vm2963_vm0, %v9627_v43  ;;  %v4109_v43 = vrot.slane %v8567_v12, 2 }
 0x28d   : > { %5452 = vmatprep.mubr.msk.f32.mxu1 %vm5941_vm1, %v9462_v49 }
 0x28f   : > { %5580 = vmatmul.mubr.msk.f32.gmra.mrb[72].mxu0 %vm2963_vm0, %v4086_v10 }
 0x290   : > { %5582 = vmatprep.mubr.msk.f32.mxu0 %vm5941_vm1, %v9462_v49  ;;  %5453 = vmatmul.mubr.msk.f32.gmra.mrb[50].mxu1 %vm2963_vm0, %v9628_v45  ;;  %v8854_v61 = vpop.f32.mrb[4].mxu1  ;;  %v4112_v45 = vsel %vm1516_vm3, %v4109_v43, %v4111_v47 }
 0x291   : > { %5455 = vmatprep.mubr.msk.f32.mxu1 %vm5941_vm1, %v9462_v49  ;;  %v5369_v58 = vpop.f32.mrb[5].mxu1 }
 0x292   : > { %v4125_v58 = vrot.slane %v9639_v40, 2 }
 0x293   : > { %5583 = vmatmul.mubr.msk.f32.gmra.mrb[74].mxu0 %vm2963_vm0, %v4088_v23  ;;  %v9635_v23 = vld [vmem:[#allocation10_spill] sm:$0xff] }
 0x294   : > { %5585 = vmatprep.mubr.msk.f32.mxu0 %vm5941_vm1, %v9462_v49  ;;  %5456 = vmatmul.mubr.msk.f32.gmra.mrb[52].mxu1 %vm2963_vm0, %v9629_v24  ;;  %v4117_v24 = vrot.slane %v9635_v23, 2 }
 0x295   : > { %5458 = vmatprep.mubr.msk.f32.mxu1 %vm5941_vm1, %v9462_v49 }
 0x297   : > { %5586 = vmatmul.mubr.msk.f32.gmra.mrb[76].mxu0 %vm2963_vm0, %v4090_v33  ;;  %v4118_v33 = vsel %vm1516_vm3, %v4115_v50, %v4117_v24 }
 0x298   : > { %5588 = vmatprep.mubr.msk.f32.mxu0 %vm5941_vm1, %v9462_v49  ;;  %5459 = vmatmul.mubr.msk.f32.gmra.mrb[54].mxu1 %vm2963_vm0, %v9630_v28  ;;  %v9636_v28 = vld [vmem:[#allocation12_spill] sm:$0xff] }
 0x299   : > { %5461 = vmatprep.mubr.msk.f32.mxu1 %vm5941_vm1, %v9462_v49  ;;  %v4119_v31 = vrot.slane %v9636_v28, 2 }
 0x29b   : > { %5589 = vmatmul.mubr.msk.f32.gmra.mrb[78].mxu0 %vm2963_vm0, %v4092_v55  ;;  %v4120_v5 = vsel %vm1516_vm3, %v4117_v24, %v4119_v31  ;;  %v9637_v55 = vld [vmem:[#allocation14_spill] sm:$0xff] }
 0x29c   : > { %5591 = vmatprep.mubr.msk.f32.mxu0 %vm5941_vm1, %v9462_v49  ;;  %5462 = vmatmul.mubr.msk.f32.gmra.mrb[56].mxu1 %vm2963_vm0, %v9631_v6  ;;  %v8881_v44 = vpop.f32.mrb[30].mxu0  ;;  %v4121_v6 = vrot.slane %v9637_v55, 2 }
 0x29d   : > { %5464 = vmatprep.mubr.msk.f32.mxu1 %vm5941_vm1, %v9462_v49  ;;  %v5330_v42 = vpop.f32.mrb[31].mxu0 }
 0x29f   : > { %5592 = vmatmul.mubr.msk.f32.gmra.mrb[80].mxu0 %vm2963_vm0, %v4094_v51 }
 0x2a0   : > { %5594 = vmatprep.mubr.msk.f32.mxu0 %vm5941_vm1, %v9462_v49  ;;  %5465 = vmatmul.mubr.msk.f32.gmra.mrb[58].mxu1 %vm2963_vm0, %v9632_v19  ;;  %v4122_v19 = vsel %vm1516_vm3, %v4119_v31, %v4121_v6 }
 0x2a1   : > { %5467 = vmatprep.mubr.msk.f32.mxu1 %vm5941_vm1, %v9462_v49 }
 0x2a3   : > { %5595 = vmatmul.mubr.msk.f32.gmra.mrb[82].mxu0 %vm2963_vm0, %v4096_v59  ;;  %v4123_v59 = vrot.slane %v9638_v0, 2 }
 0x2a4   : > { %5597 = vmatprep.mubr.msk.f32.mxu0 %vm5941_vm1, %v9462_v49  ;;  %5468 = vmatmul.mubr.msk.f32.gmra.mrb[60].mxu1 %vm2963_vm0, %v9633_v34 }
 0x2a5   : > { %5470 = vmatprep.mubr.msk.f32.mxu1 %vm5941_vm1, %v9462_v49  ;;  %v4124_v34 = vsel %vm1516_vm3, %v4121_v6, %v4123_v59 }
 0x2a7   : > { %5598 = vmatmul.mubr.msk.f32.gmra.mrb[84].mxu0 %vm2963_vm0, %v4098_v29  ;;  %v4126_v29 = vsel %vm1516_vm3, %v4123_v59, %v4125_v58 }
 0x2a8   : > { %5600 = vmatprep.mubr.msk.f32.mxu0 %vm5941_vm1, %v9462_v49  ;;  %5471 = vmatmul.mubr.msk.f32.gmra.mrb[62].mxu1 %vm2963_vm0, %v9634_v38  ;;  %v8905_v54 = vpop.f32.mrb[6].mxu1  ;;  %v9640_v38 = vld [vmem:[#allocation20_spill] sm:$0xff] }
 0x2a9   : > { %5473 = vmatprep.mubr.msk.f32.mxu1 %vm5941_vm1, %v9462_v49  ;;  %v5372_v32 = vpop.f32.mrb[7].mxu1  ;;  %v4127_v11 = vrot.slane %v9640_v38, 2 }
 0x2aa   : > { %v4135_v32 = vrot.slane %v8565_v36, 2 }
 0x2ab   : > { %5601 = vmatmul.mubr.msk.f32.gmra.mrb[86].mxu0 %vm2963_vm0, %v4100_v53  ;;  %v4128_v42 = vsel %vm1516_vm3, %v4125_v58, %v4127_v11 }
 0x2ac   : > { %5603 = vmatprep.mubr.msk.f32.mxu0 %vm5941_vm1, %v9462_v49  ;;  %5474 = vmatmul.mubr.msk.f32.gmra.mrb[64].mxu1 %vm2963_vm0, %v8200_v16  ;;  %v4104_v16 = vsel %vm1516_vm3, %v4101_v62, %v4103_v17 }
 0x2ad   : > { %5476 = vmatprep.mubr.msk.f32.mxu1 %vm5941_vm1, %v9462_v49 }
 0x2af   : > { %5604 = vmatmul.mubr.msk.f32.gmra.mrb[88].mxu0 %vm2963_vm0, %v4102_v57  ;;  %v4129_v57 = vrot.slane %v8262_v9, 2 }
 0x2b0   : > { %5606 = vmatprep.mubr.msk.f32.mxu0 %vm5941_vm1, %v9462_v49  ;;  %5477 = vmatmul.mubr.msk.f32.gmra.mrb[66].mxu1 %vm2963_vm0, %v8337_v60  ;;  %v4106_v60 = vsel %vm1516_vm3, %v4103_v17, %v4105_v7 }
 0x2b1   : > { %5479 = vmatprep.mubr.msk.f32.mxu1 %vm5941_vm1, %v9462_v49  ;;  %v4130_v17 = vsel %vm1516_vm3, %v4127_v11, %v4129_v57 }
 0x2b2   : > { %v8930_v10 = vpop.f32.mrb[32].mxu0 }
 0x2b3   : > { %5607 = vmatmul.mubr.msk.f32.gmra.mrb[90].mxu0 %vm2963_vm0, %v4104_v16  ;;  %v4131_v16 = vrot.slane %v8407_v20, 2 }
 0x2b4   : > { %5609 = vmatprep.mubr.msk.f32.mxu0 %vm5941_vm1, %v9462_v49  ;;  %5480 = vmatmul.mubr.msk.f32.gmra.mrb[68].mxu1 %vm2963_vm0, %v8475_v15  ;;  %v4108_v15 = vsel %vm1516_vm3, %v4105_v7, %v4107_v14  ;;  %v4133_v7 = vrot.slane %v8548_v63, 2 }
 0x2b5   : > { %5482 = vmatprep.mubr.msk.f32.mxu1 %vm5941_vm1, %v9462_v49 }
 0x2b7   : > { %5610 = vmatmul.mubr.msk.f32.gmra.mrb[92].mxu0 %vm2963_vm0, %v4106_v60 }
 0x2b8   : > { %5612 = vmatprep.mubr.msk.f32.mxu0 %vm5941_vm1, %v9462_v49  ;;  %5483 = vmatmul.mubr.msk.f32.gmra.mrb[70].mxu1 %vm2963_vm0, %v8558_v41  ;;  %v4110_v41 = vsel %vm1516_vm3, %v4107_v14, %v4109_v43 }
 0x2b9   : > { %5485 = vmatprep.mubr.msk.f32.mxu1 %vm5941_vm1, %v9462_v49 }
 0x2bb   : > { %5613 = vmatmul.mubr.msk.f32.gmra.mrb[94].mxu0 %vm2963_vm0, %v4108_v15  ;;  %v4137_v15 = vrot.slane %v8603_v48, 2 }
 0x2bc   : > { %5615 = vmatprep.mubr.msk.f32.mxu0 %vm5941_vm1, %v9462_v49  ;;  %5486 = vmatmul.mubr.msk.f32.gmra.mrb[72].mxu1 %vm2963_vm0, %v8567_v12  ;;  %v5333_v12 = vpop.f32.mrb[33].mxu0 }
 0x2bd   : > { %5488 = vmatprep.mubr.msk.f32.mxu1 %vm5941_vm1, %v9462_v49 }
 0x2bf   : > { %5616 = vmatmul.mubr.msk.f32.gmra.mrb[96].mxu0 %vm2963_vm0, %v4110_v41 }
 0x2c0   : > { %5618 = vmatprep.mubr.msk.f32.mxu0 %vm5941_vm1, %v9462_v49  ;;  %5489 = vmatmul.mubr.msk.f32.gmra.mrb[74].mxu1 %vm2963_vm0, %v8613_v25  ;;  %v4114_v25 = vsel %vm1516_vm3, %v4111_v47, %v4113_v52  ;;  %v8959_v26 = vpop.f32.mrb[8].mxu1  ;;  %v4139_v47 = vrot.slane %v8624_v37, 2 }
 0x2c1   : > { %5491 = vmatprep.mubr.msk.f32.mxu1 %vm5941_vm1, %v9462_v49 }
 0x2c2   : > { %v4140_v12 = vsel %vm1516_vm3, %v4137_v15, %v4139_v47 }
 0x2c3   : > { %5619 = vmatmul.mubr.msk.f32.gmra.mrb[98].mxu0 %vm2963_vm0, %v4112_v45 }
 0x2c4   : > { %5621 = vmatprep.mubr.msk.f32.mxu0 %vm5941_vm1, %v9462_v49  ;;  %5492 = vmatmul.mubr.msk.f32.gmra.mrb[76].mxu1 %vm2963_vm0, %v8679_v56  ;;  %v4116_v56 = vsel %vm1516_vm3, %v4113_v52, %v4115_v50 }
 0x2c5   : > { %5494 = vmatprep.mubr.msk.f32.mxu1 %vm5941_vm1, %v9462_v49 }
 0x2c7   : > { %5622 = vmatmul.mubr.msk.f32.gmra.mrb[100].mxu0 %vm2963_vm0, %v4114_v25 }
 0x2c8   : > { %5624 = vmatprep.mubr.msk.f32.mxu0 %vm5941_vm1, %v9462_v49  ;;  %5495 = vmatmul.mubr.msk.f32.gmra.mrb[78].mxu1 %vm2963_vm0, %v7492_v22  ;;  %v5375_v22 = vpop.f32.mrb[9].mxu1 }
 0x2c9   : > { %5497 = vmatprep.mubr.msk.f32.mxu1 %vm5941_vm1, %v9462_v49  ;;  %v8979_v8 = vpop.f32.mrb[34].mxu0 }
 0x2ca   : > { %v5336_v51 = vpop.f32.mrb[35].mxu0 }
 0x2cb   : > { %5625 = vmatmul.mubr.msk.f32.gmra.mrb[102].mxu0 %vm2963_vm0, %v4116_v56 }
 0x2cc   : > { %5627 = vmatprep.mubr.msk.f32.mxu0 %vm5941_vm1, %v9462_v49  ;;  %5498 = vmatmul.mubr.msk.f32.gmra.mrb[80].mxu1 %vm2963_vm0, %v9635_v23 }
 0x2cd   : > { %5500 = vmatprep.mubr.msk.f32.mxu1 %vm5941_vm1, %v9462_v49 }
 0x2cf   : > { %5628 = vmatmul.mubr.msk.f32.gmra.mrb[104].mxu0 %vm2963_vm0, %v4118_v33 }
 0x2d0   : > { %5630 = vmatprep.mubr.msk.f32.mxu0 %vm5941_vm1, %v9462_v49  ;;  %5501 = vmatmul.mubr.msk.f32.gmra.mrb[82].mxu1 %vm2963_vm0, %v9636_v28 }
 0x2d1   : > { %5503 = vmatprep.mubr.msk.f32.mxu1 %vm5941_vm1, %v9462_v49 }
 0x2d3   : > { %5631 = vmatmul.mubr.msk.f32.gmra.mrb[106].mxu0 %vm2963_vm0, %v4120_v5 }
 0x2d4   : > { %5633 = vmatprep.mubr.msk.f32.mxu0 %vm5941_vm1, %v9462_v49  ;;  %5504 = vmatmul.mubr.msk.f32.gmra.mrb[84].mxu1 %vm2963_vm0, %v9637_v55 }
 0x2d5   : > { %5506 = vmatprep.mubr.msk.f32.mxu1 %vm5941_vm1, %v9462_v49  ;;  %v9004_v53 = vpop.f32.mrb[10].mxu1 }
 0x2d6   : > { %v5378_v62 = vpop.f32.mrb[11].mxu1 }
 0x2d7   : > { %5634 = vmatmul.mubr.msk.f32.gmra.mrb[108].mxu0 %vm2963_vm0, %v4122_v19  ;;  %v9641_v62 = vld [vmem:[#allocation21_spill] sm:$0xff] }
 0x2d8   : > { %5636 = vmatprep.mubr.msk.f32.mxu0 %vm5941_vm1, %v9462_v49  ;;  %5507 = vmatmul.mubr.msk.f32.gmra.mrb[86].mxu1 %vm2963_vm0, %v9638_v0 }
 0x2d9   : > { %5509 = vmatprep.mubr.msk.f32.mxu1 %vm5941_vm1, %v9462_v49 }
 0x2db   : > { %5637 = vmatmul.mubr.msk.f32.gmra.mrb[110].mxu0 %vm2963_vm0, %v4124_v34 }
 0x2dc   : > { %5639 = vmatprep.mubr.msk.f32.mxu0 %vm5941_vm1, %v9462_v49  ;;  %5510 = vmatmul.mubr.msk.f32.gmra.mrb[88].mxu1 %vm2963_vm0, %v9639_v40 }
 0x2dd   : > { %5512 = vmatprep.mubr.msk.f32.mxu1 %vm5941_vm1, %v9462_v49 }
 0x2df   : > { %5640 = vmatmul.mubr.msk.f32.gmra.mrb[112].mxu0 %vm2963_vm0, %v4126_v29 }
 0x2e0   : > { %5642 = vmatprep.mubr.msk.f32.mxu0 %vm5941_vm1, %v9462_v49  ;;  %5513 = vmatmul.mubr.msk.f32.gmra.mrb[90].mxu1 %vm2963_vm0, %v9640_v38 }
 0x2e1   : > { %5515 = vmatprep.mubr.msk.f32.mxu1 %vm5941_vm1, %v9462_v49 }
 0x2e2   : > { %v9032_v60 = vpop.f32.mrb[36].mxu0 }
 0x2e3   : > { %5643 = vmatmul.mubr.msk.f32.gmra.mrb[114].mxu0 %vm2963_vm0, %v4128_v42  ;;  %v5339_v14 = vpop.f32.mrb[37].mxu0 }
 0x2e4   : > { %5645 = vmatprep.mubr.msk.f32.mxu0 %vm5941_vm1, %v9462_v49  ;;  %5516 = vmatmul.mubr.msk.f32.gmra.mrb[92].mxu1 %vm2963_vm0, %v8262_v9  ;;  %v4132_v9 = vsel %vm1516_vm3, %v4129_v57, %v4131_v16 }
 0x2e5   : > { %5518 = vmatprep.mubr.msk.f32.mxu1 %vm5941_vm1, %v9462_v49 }
 0x2e7   : > { %5646 = vmatmul.mubr.msk.f32.gmra.mrb[116].mxu0 %vm2963_vm0, %v4130_v17 }
 0x2e8   : > { %5648 = vmatprep.mubr.msk.f32.mxu0 %vm5941_vm1, %v9462_v49  ;;  %5519 = vmatmul.mubr.msk.f32.gmra.mrb[94].mxu1 %vm2963_vm0, %v8407_v20  ;;  %v4134_v20 = vsel %vm1516_vm3, %v4131_v16, %v4133_v7 }
 0x2e9   : > { %5521 = vmatprep.mubr.msk.f32.mxu1 %vm5941_vm1, %v9462_v49 }
 0x2eb   : > { %5649 = vmatmul.mubr.msk.f32.gmra.mrb[118].mxu0 %vm2963_vm0, %v4132_v9 }
 0x2ec   : > { %5651 = vmatprep.mubr.msk.f32.mxu0 %vm5941_vm1, %v9462_v49  ;;  %5522 = vmatmul.mubr.msk.f32.gmra.mrb[96].mxu1 %vm2963_vm0, %v8548_v63  ;;  %v4136_v63 = vsel %vm1516_vm3, %v4133_v7, %v4135_v32  ;;  %v9053_v43 = vpop.f32.mrb[12].mxu1  ;;  %v9642_v7 = vld [vmem:[#allocation22_spill] sm:$0xff] }
 0x2ed   : > { %5524 = vmatprep.mubr.msk.f32.mxu1 %vm5941_vm1, %v9462_v49  ;;  %v5381_v41 = vpop.f32.mrb[13].mxu1 }
 0x2ef   : > { %5652 = vmatmul.mubr.msk.f32.gmra.mrb[120].mxu0 %vm2963_vm0, %v4134_v20 }
 0x2f0   : > { %5654 = vmatprep.mubr.msk.f32.mxu0 %vm5941_vm1, %v9462_v49  ;;  %5525 = vmatmul.mubr.msk.f32.gmra.mrb[98].mxu1 %vm2963_vm0, %v8565_v36  ;;  %v4138_v36 = vsel %vm1516_vm3, %v4135_v32, %v4137_v15 }
 0x2f1   : > { %5527 = vmatprep.mubr.msk.f32.mxu1 %vm5941_vm1, %v9462_v49 }
 0x2f3   : > { %5655 = vmatmul.mubr.msk.f32.gmra.mrb[122].mxu0 %vm2963_vm0, %v4136_v63 }
 0x2f4   : > { %5657 = vmatprep.mubr.msk.f32.mxu0 %vm5941_vm1, %v9462_v49  ;;  %5528 = vmatmul.mubr.msk.f32.gmra.mrb[100].mxu1 %vm2963_vm0, %v8603_v48  ;;  %v4141_v48 = vrot.slane %v8665_v27, 2 }
 0x2f5   : > { %5530 = vmatprep.mubr.msk.f32.mxu1 %vm5941_vm1, %v9462_v49 }
 0x2f6   : > { %v4142_v45 = vsel %vm1516_vm3, %v4139_v47, %v4141_v48  ;;  %v9643_v47 = vld [vmem:[#allocation23_spill] sm:$0xff] }
 0x2f7   : > { %5658 = vmatmul.mubr.msk.f32.gmra.mrb[124].mxu0 %vm2963_vm0, %v4138_v36  ;;  %v9106_v36 = vld [vmem:[%s9335_s4] ss:$0 sm:$0xff] }
 0x2f8   : > { %5660 = vmatprep.mubr.msk.f32.mxu0 %vm5941_vm1, %v9462_v49  ;;  %5531 = vmatmul.mubr.msk.f32.gmra.mrb[102].mxu1 %vm2963_vm0, %v8624_v37  ;;  %v9074_v52 = vpop.f32.mrb[38].mxu0 }
 0x2f9   : > { %v5342_v25 = vpop.f32.mrb[39].mxu0 }
 0x2fb   : > { %5661 = vmatmul.mubr.msk.f32.gmra.mrb[126].mxu0 %vm2963_vm0, %v4140_v12 }
 0x2fc   : > { %5663 = vmatprep.mubr.msk.f32.mxu0 %vm5941_vm1, %v9462_v49 }
 0x2ff   : > { %5664 = vmatmul.mubr.msk.f32.gmra.mrb[128].mxu0 %vm2963_vm0, %v4142_v45 }
 0x304   : > { %v9077_v50 = vpop.f32.mrb[14].mxu1 }
 0x305   : > { %v5384_v56 = vpop.f32.mrb[15].mxu1 }
 0x30f   : > { %v9079_v37 = vpop.f32.mrb[40].mxu0 }
 0x310   : > { %v5345_v23 = vpop.f32.mrb[41].mxu0 }
 0x31e   : > { %v9083_v22 = vpop.f32.mrb[42].mxu0 }
 0x31f   : > { %v9081_v24 = vpop.f32.mrb[16].mxu1  ;;  %v5348_v33 = vpop.f32.mrb[43].mxu0 }
 0x320   : > { %v5387_v27 = vpop.f32.mrb[17].mxu1 }
 0x323   : > { %v9085_v28 = vpop.f32.mrb[18].mxu1  ;;  %v9087_v5 = vpop.f32.mrb[44].mxu0 }
 0x324   : > { %v5390_v31 = vpop.f32.mrb[19].mxu1  ;;  %v5351_v55 = vpop.f32.mrb[45].mxu0 }
 0x327   : > { %v9089_v6 = vpop.f32.mrb[20].mxu1  ;;  %v9091_v19 = vpop.f32.mrb[46].mxu0 }
 0x328   : > { %v5393_v51 = vpop.f32.mrb[21].mxu1  ;;  %v5354_v0 = vpop.f32.mrb[47].mxu0 }
 0x32b   : > { %v9093_v59 = vpop.f32.mrb[22].mxu1 }
 0x32c   : > { %v5396_v34 = vpop.f32.mrb[23].mxu1 }
 0x32f   : > { %v9095_v40 = vpop.f32.mrb[24].mxu1 }
 0x330   : > { %v5399_v58 = vpop.f32.mrb[25].mxu1 }
 0x332   : > { %v9097_v29 = vpop.f32.mrb[48].mxu0 }
 0x333   : > { %v5357_v38 = vpop.f32.mrb[49].mxu0  ;;  %v3861_v11 = vpop.f32.mrb[26].mxu1 }
 0x334   : > { %v3862_v42 = vadd.f32 %v3861_v11, %v9641_v62  ;;  %v5418_v57 = vpop.f32.mrb[27].mxu1  ;;  %v9644_v62 = vld [vmem:[#allocation24_spill] sm:$0xff] }
 0x336   : > { %v9100_v17 = vpop.f32.mrb[50].mxu0 }
 0x337   : > { %v5360_v16 = vpop.f32.mrb[51].mxu0  ;;  %v3866_v9 = vpop.f32.mrb[28].mxu1 }
 0x338   : > { %v3867_v14 = vadd.f32 %v3866_v9, %v9642_v7  ;;  %v5421_v20 = vpop.f32.mrb[29].mxu1 }
 0x33a   : > { %v4287_v32 = vpop.f32.mrb[52].mxu0 }
 0x33b   : > { %v4481_v63 = vadd.f32 %v4287_v32, %v3862_v42  ;;  %v5551_v15 = vpop.f32.mrb[53].mxu0  ;;  %v3871_v41 = vpop.f32.mrb[30].mxu1  ;;  %v9645_v32 = vld [vmem:[#allocation25_spill] sm:$0xff] }
 0x33c   : > { %v3872_v12 = vadd.f32 %v3871_v41, %v9643_v47  ;;  %v5424_v48 = vpop.f32.mrb[31].mxu1 }
 0x33d   : > { %v4527_v25 = vadd.f32 %v9106_v36, %v4481_v63 }
 0x33e   : > { %v4292_v45 = vpop.f32.mrb[54].mxu0 }
 0x33f   : > { %v4482_v56 = vadd.f32 %v4292_v45, %v3867_v14  ;;  %v5554_v23 = vpop.f32.mrb[55].mxu0  ;;  %v3876_v27 = vpop.f32.mrb[32].mxu1  ;;  %v4566_v0 = vmax.f32 %v4527_v25, 0.0 }
 0x340   : > { %v3877_v33 = vadd.f32 %v3876_v27, %v8357_v39  ;;  %v5427_v31 = vpop.f32.mrb[33].mxu1  ;;  %v9646_v23 = vld [vmem:[#allocation26_spill] sm:$0xff] }
 0x341   : > { %v4528_v55 = vadd.f32 %v9106_v36, %v4482_v56 }
 0x342   : > { %v4297_v51 = vpop.f32.mrb[56].mxu0 }
 0x343   : > { %v4567_v34 = vmax.f32 %v4528_v55, 0.0  ;;  %v4483_v58 = vadd.f32 %v4297_v51, %v3872_v12  ;;  %v5557_v38 = vpop.f32.mrb[57].mxu0  ;;  %v3881_v11 = vpop.f32.mrb[34].mxu1 }
 0x344   : > { %v3882_v42 = vadd.f32 %v3881_v11, %v9644_v62  ;;  %v5430_v57 = vpop.f32.mrb[35].mxu1  ;;  %v9647_v11 = vld [vmem:[#allocation27_spill] sm:$0xff] }
 0x345   : > { %v9113_v16 = vpack.c.bf16 %v4567_v34, %v4566_v0  ;;  %v4529_v7 = vadd.f32 %v9106_v36, %v4483_v58 }
 0x346   : > { %v4302_v9 = vpop.f32.mrb[58].mxu0 }
 0x347   : > { %v4484_v14 = vadd.f32 %v4302_v9, %v3877_v33  ;;  %v5560_v20 = vpop.f32.mrb[59].mxu0  ;;  %v3886_v39 = vpop.f32.mrb[36].mxu1  ;;  %v4568_v12 = vmax.f32 %v4529_v7, 0.0  ;;  %v4606_v33 = vld [vmem:[%s9338_s7 + $0x8] sm:$0xff] }
 0x348   : > { %v3887_v63 = vadd.f32 %v3886_v39, %v9645_v32  ;;  %v5433_v15 = vpop.f32.mrb[37].mxu1  ;;  %4676 = vmatprep.mubr.f32.mxu1 %v4606_v33 }
 0x349   : > { %v4530_v41 = vadd.f32 %v9106_v36, %v4484_v14 }
 0x34a   : > { %v4307_v47 = vpop.f32.mrb[60].mxu0 }
 0x34b   : > { %v4569_v48 = vmax.f32 %v4530_v41, 0.0  ;;  %v4485_v45 = vadd.f32 %v4307_v47, %v3882_v42  ;;  %v5563_v25 = vpop.f32.mrb[61].mxu0  ;;  %v3891_v56 = vpop.f32.mrb[38].mxu1 }
 0x34c   : > { %v3892_v27 = vadd.f32 %v3891_v56, %v9646_v23  ;;  %v5436_v31 = vpop.f32.mrb[39].mxu1 }
 0x34d   : > { %v9119_v55 = vpack.c.bf16 %v4569_v48, %v4568_v12  ;;  %v4531_v0 = vadd.f32 %v9106_v36, %v4485_v45 }
 0x34e   : > { %v4312_v51 = vpop.f32.mrb[62].mxu0 }
 0x34f   : > { %v4486_v34 = vadd.f32 %v4312_v51, %v3887_v63  ;;  %v5566_v58 = vpop.f32.mrb[63].mxu0  ;;  %v3896_v38 = vpop.f32.mrb[40].mxu1  ;;  %v4570_v7 = vmax.f32 %v4531_v0, 0.0 }
 0x350   : > { %v3897_v62 = vadd.f32 %v3896_v38, %v9647_v11  ;;  %v5439_v42 = vpop.f32.mrb[41].mxu1 }
 0x351   : > { %v4532_v57 = vadd.f32 %v9106_v36, %v4486_v34 }
 0x352   : > { %v4317_v9 = vpop.f32.mrb[64].mxu0 }
 0x353   : > { %v4571_v14 = vmax.f32 %v4532_v57, 0.0  ;;  %v4487_v20 = vadd.f32 %v4317_v9, %v3892_v27  ;;  %v5569_v39 = vpop.f32.mrb[65].mxu0  ;;  %v3901_v32 = vpop.f32.mrb[42].mxu1 }
 0x354   : > { %v3902_v15 = vadd.f32 %v3901_v32, %v8487_v21  ;;  %v5442_v41 = vpop.f32.mrb[43].mxu1 }
 0x355   : > { %v9128_v47 = vpack.c.bf16 %v4571_v14, %v4570_v7  ;;  %v4533_v63 = vadd.f32 %v9106_v36, %v4487_v20 }
 0x356   : > { %v4322_v12 = vpop.f32.mrb[66].mxu0 }
 0x357   : > { %v4488_v48 = vadd.f32 %v4322_v12, %v3897_v62  ;;  %v5572_v45 = vpop.f32.mrb[67].mxu0  ;;  %v3906_v25 = vpop.f32.mrb[44].mxu1  ;;  %v4572_v27 = vmax.f32 %v4533_v63, 0.0 }
 0x358   : > { %v3907_v56 = vadd.f32 %v3906_v25, %v8550_v3  ;;  %v5445_v23 = vpop.f32.mrb[45].mxu1 }
 0x359   : > { %v4534_v31 = vadd.f32 %v9106_v36, %v4488_v48 }
 0x35a   : > { %v4327_v33 = vpop.f32.mrb[68].mxu0 }
 0x35b   : > { %v4573_v51 = vmax.f32 %v4534_v31, 0.0  ;;  %v4489_v0 = vadd.f32 %v4327_v33, %v3902_v15  ;;  %v5575_v34 = vpop.f32.mrb[69].mxu0  ;;  %v3911_v21 = vpop.f32.mrb[46].mxu1 }
 0x35c   : > { %v3912_v58 = vadd.f32 %v3911_v21, %v8621_v13  ;;  %v5448_v38 = vpop.f32.mrb[47].mxu1 }
 0x35d   : > { %v9134_v11 = vpack.c.bf16 %v4573_v51, %v4572_v27  ;;  %v4535_v62 = vadd.f32 %v9106_v36, %v4489_v0 }
 0x35e   : > { %v4332_v42 = vpop.f32.mrb[70].mxu0 }
 0x35f   : > { %v4490_v57 = vadd.f32 %v4332_v42, %v3907_v56  ;;  %v5578_v9 = vpop.f32.mrb[71].mxu0  ;;  %v3916_v3 = vpop.f32.mrb[48].mxu1  ;;  %v4574_v32 = vmax.f32 %v4535_v62, 0.0 }
 0x360   : > { %v3917_v7 = vadd.f32 %v3916_v3, %v8681_v1  ;;  %v5451_v14 = vpop.f32.mrb[49].mxu1 }
 0x361   : > { %v4536_v20 = vadd.f32 %v9106_v36, %v4490_v57 }
 0x362   : > { %v4337_v39 = vpop.f32.mrb[72].mxu0 }
 0x363   : > { %v4575_v15 = vmax.f32 %v4536_v20, 0.0  ;;  %v4491_v41 = vadd.f32 %v4337_v39, %v3912_v58  ;;  %v5581_v12 = vpop.f32.mrb[73].mxu0  ;;  %v3921_v13 = vpop.f32.mrb[50].mxu1 }
 0x364   : > { %v3922_v63 = vadd.f32 %v3921_v13, %v8709_v18  ;;  %v5454_v48 = vpop.f32.mrb[51].mxu1 }
 0x365   : > { %v9140_v45 = vpack.c.bf16 %v4575_v15, %v4574_v32  ;;  %v4537_v56 = vadd.f32 %v9106_v36, %v4491_v41 }
 0x366   : > { %v4342_v25 = vpop.f32.mrb[74].mxu0 }
 0x367   : > { %v4492_v23 = vadd.f32 %v4342_v25, %v3917_v7  ;;  %v5584_v31 = vpop.f32.mrb[75].mxu0  ;;  %v3926_v1 = vpop.f32.mrb[52].mxu1  ;;  %v4576_v34 = vmax.f32 %v4537_v56, 0.0 }
 0x368   : > { %v3927_v33 = vadd.f32 %v3926_v1, %v8778_v2  ;;  %v5457_v27 = vpop.f32.mrb[53].mxu1 }
 0x369   : > { %v4538_v51 = vadd.f32 %v9106_v36, %v4492_v23 }
 0x36a   : > { %v4347_v0 = vpop.f32.mrb[76].mxu0 }
 0x36b   : > { %v4577_v21 = vmax.f32 %v4538_v51, 0.0  ;;  %v4493_v58 = vadd.f32 %v4347_v0, %v3922_v63  ;;  %v5587_v38 = vpop.f32.mrb[77].mxu0  ;;  %v3931_v18 = vpop.f32.mrb[54].mxu1 }
 0x36c   : > { %v3932_v42 = vadd.f32 %v3931_v18, %v8832_v46  ;;  %v5460_v62 = vpop.f32.mrb[55].mxu1 }
 0x36d   : > { %v9146_v57 = vpack.c.bf16 %v4577_v21, %v4576_v34  ;;  %v4539_v3 = vadd.f32 %v9106_v36, %v4493_v58 }
 0x36e   : > { %v4352_v9 = vpop.f32.mrb[78].mxu0 }
 0x36f   : > { %v4494_v7 = vadd.f32 %v4352_v9, %v3927_v33  ;;  %v5590_v14 = vpop.f32.mrb[79].mxu0  ;;  %v3936_v2 = vpop.f32.mrb[56].mxu1  ;;  %v4578_v41 = vmax.f32 %v4539_v3, 0.0 }
 0x370   : > { %v3937_v20 = vadd.f32 %v3936_v2, %v8881_v44  ;;  %v5463_v39 = vpop.f32.mrb[57].mxu1 }
 0x371   : > { %v4540_v32 = vadd.f32 %v9106_v36, %v4494_v7 }
 0x372   : > { %v4357_v15 = vpop.f32.mrb[80].mxu0 }
 0x373   : > { %v4579_v12 = vmax.f32 %v4540_v32, 0.0  ;;  %v4495_v13 = vadd.f32 %v4357_v15, %v3932_v42  ;;  %v5593_v63 = vpop.f32.mrb[81].mxu0  ;;  %v3941_v46 = vpop.f32.mrb[58].mxu1 }
 0x374   : > { %v3942_v48 = vadd.f32 %v3941_v46, %v8930_v10  ;;  %v5466_v25 = vpop.f32.mrb[59].mxu1 }
 0x375   : > { %v9152_v56 = vpack.c.bf16 %v4579_v12, %v4578_v41  ;;  %v4541_v31 = vadd.f32 %v9106_v36, %v4495_v13 }
 0x376   : > { %v4362_v23 = vpop.f32.mrb[82].mxu0 }
 0x377   : > { %v4496_v1 = vadd.f32 %v4362_v23, %v3937_v20  ;;  %v5596_v33 = vpop.f32.mrb[83].mxu0  ;;  %v3946_v44 = vpop.f32.mrb[60].mxu1  ;;  %v4580_v21 = vmax.f32 %v4541_v31, 0.0 }
 0x378   : > { %v3947_v27 = vadd.f32 %v3946_v44, %v8979_v8  ;;  %v5469_v51 = vpop.f32.mrb[61].mxu1 }
 0x379   : > { %v4542_v0 = vadd.f32 %v9106_v36, %v4496_v1 }
 0x37a   : > { %v4367_v34 = vpop.f32.mrb[84].mxu0 }
 0x37b   : > { %v4581_v58 = vmax.f32 %v4542_v0, 0.0  ;;  %v4497_v38 = vadd.f32 %v4367_v34, %v3942_v48  ;;  %v5599_v18 = vpop.f32.mrb[85].mxu0  ;;  %v3951_v10 = vpop.f32.mrb[62].mxu1 }
 0x37c   : > { %v3952_v42 = vadd.f32 %v3951_v10, %v9032_v60  ;;  %v5472_v62 = vpop.f32.mrb[63].mxu1 }
 0x37d   : > { %v9158_v9 = vpack.c.bf16 %v4581_v58, %v4580_v21  ;;  %v4543_v7 = vadd.f32 %v9106_v36, %v4497_v38 }
 0x37e   : > { %v4372_v3 = vpop.f32.mrb[86].mxu0 }
 0x37f   : > { %v4498_v14 = vadd.f32 %v4372_v3, %v3947_v27  ;;  %v5602_v2 = vpop.f32.mrb[87].mxu0  ;;  %v3956_v8 = vpop.f32.mrb[64].mxu1  ;;  %v4582_v41 = vmax.f32 %v4543_v7, 0.0 }
 0x380   : > { %v3957_v20 = vadd.f32 %v3956_v8, %v9074_v52  ;;  %v5475_v39 = vpop.f32.mrb[65].mxu1 }
 0x381   : > { %v4544_v32 = vadd.f32 %v9106_v36, %v4498_v14 }
 0x382   : > { %v4377_v15 = vpop.f32.mrb[88].mxu0 }
 0x383   : > { %v4583_v12 = vmax.f32 %v4544_v32, 0.0  ;;  %v4499_v13 = vadd.f32 %v4377_v15, %v3952_v42  ;;  %v5605_v63 = vpop.f32.mrb[89].mxu0  ;;  %v3961_v60 = vpop.f32.mrb[66].mxu1 }
 0x384   : > { %v3962_v46 = vadd.f32 %v3961_v60, %v9079_v37  ;;  %v5478_v48 = vpop.f32.mrb[67].mxu1 }
 0x385   : > { %v5754_v25 = vpack.c.bf16 %v4583_v12, %v4582_v41  ;;  %v4545_v31 = vadd.f32 %v9106_v36, %v4499_v13 }
 0x386   : > { %v4382_v23 = vpop.f32.mrb[90].mxu0 }
 0x387   : > { %v4500_v1 = vadd.f32 %v4382_v23, %v3957_v20  ;;  %v5608_v33 = vpop.f32.mrb[91].mxu0  ;;  %5755 = vmatprep.subr.bf16.mxu1 %v5754_v25  ;;  %v3966_v52 = vpop.f32.mrb[68].mxu1  ;;  %v4584_v34 = vmax.f32 %v4545_v31, 0.0 }
 0x388   : > { %5757 = vmatpush3.bf16.msra.mxu1 %v9113_v16  ;;  %v3967_v44 = vadd.f32 %v3966_v52, %v9083_v22  ;;  %v5481_v27 = vpop.f32.mrb[69].mxu1 }
 0x389   : > { %v4546_v51 = vadd.f32 %v9106_v36, %v4500_v1 }
 0x38a   : > { %v4387_v0 = vpop.f32.mrb[92].mxu0 }
 0x38b   : > { %v4585_v21 = vmax.f32 %v4546_v51, 0.0  ;;  %v4501_v37 = vadd.f32 %v4387_v0, %v3962_v46  ;;  %v5611_v58 = vpop.f32.mrb[93].mxu0  ;;  %v3971_v38 = vpop.f32.mrb[70].mxu1 }
 0x38c   : > { %v3972_v18 = vadd.f32 %v3971_v38, %v9087_v5  ;;  %v5484_v10 = vpop.f32.mrb[71].mxu1 }
 0x38d   : > { %v5758_v42 = vpack.c.bf16 %v4585_v21, %v4584_v34  ;;  %v4547_v3 = vadd.f32 %v9106_v36, %v4501_v37 }
 0x38e   : > { %v4392_v62 = vpop.f32.mrb[94].mxu0 }
 0x38f   : > { %v4502_v7 = vadd.f32 %v4392_v62, %v3967_v44  ;;  %v5614_v16 = vpop.f32.mrb[95].mxu0  ;;  %5759 = vmatprep.subr.bf16.mxu1 %v5758_v42  ;;  %v3976_v22 = vpop.f32.mrb[72].mxu1  ;;  %v4586_v39 = vmax.f32 %v4547_v3, 0.0 }
 0x390   : > { %5761 = vmatpush3.bf16.msra.mxu1 %v9119_v55  ;;  %v3977_v14 = vadd.f32 %v3976_v22, %v9091_v19  ;;  %v5487_v2 = vpop.f32.mrb[73].mxu1 }
 0x391   : > { %v4548_v8 = vadd.f32 %v9106_v36, %v4502_v7 }
 0x392   : > { %v4397_v20 = vpop.f32.mrb[96].mxu0 }
 0x393   : > { %v4587_v32 = vmax.f32 %v4548_v8, 0.0  ;;  %v4503_v5 = vadd.f32 %v4397_v20, %v3972_v18  ;;  %v5617_v15 = vpop.f32.mrb[97].mxu0  ;;  %v3981_v41 = vpop.f32.mrb[74].mxu1 }
 0x394   : > { %v3982_v12 = vadd.f32 %v3981_v41, %v9097_v29  ;;  %v5490_v13 = vpop.f32.mrb[75].mxu1 }
 0x395   : > { %v5762_v63 = vpack.c.bf16 %v4587_v32, %v4586_v39  ;;  %v4549_v46 = vadd.f32 %v9106_v36, %v4503_v5 }
 0x396   : > { %v4402_v60 = vpop.f32.mrb[98].mxu0 }
 0x397   : > { %v4504_v48 = vadd.f32 %v4402_v60, %v3977_v14  ;;  %v5620_v55 = vpop.f32.mrb[99].mxu0  ;;  %5763 = vmatprep.subr.bf16.mxu1 %v5762_v63  ;;  %v3986_v19 = vpop.f32.mrb[76].mxu1  ;;  %v4588_v33 = vmax.f32 %v4549_v46, 0.0 }
 0x398   : > { %5765 = vmatpush3.bf16.msra.mxu1 %v9128_v47  ;;  %v3987_v25 = vadd.f32 %v3986_v19, %v9100_v17  ;;  %v5493_v23 = vpop.f32.mrb[77].mxu1 }
 0x399   : > { %v4550_v31 = vadd.f32 %v9106_v36, %v4504_v48 }
 0x39a   : > { %v4407_v1 = vpop.f32.mrb[100].mxu0 }
 0x39b   : > { %v4589_v52 = vmax.f32 %v4550_v31, 0.0  ;;  %v4505_v29 = vadd.f32 %v4407_v1, %v3982_v12  ;;  %v5623_v44 = vpop.f32.mrb[101].mxu0  ;;  %v3991_v27 = vpop.f32.mrb[78].mxu1 }
 0x39c   : > { %v3992_v51 = vadd.f32 %v3991_v27, %v8759_v30  ;;  %v5496_v0 = vpop.f32.mrb[79].mxu1 }
 0x39d   : > { %v5766_v34 = vpack.c.bf16 %v4589_v52, %v4588_v33  ;;  %v4551_v37 = vadd.f32 %v9106_v36, %v4505_v29 }
 0x39e   : > { %v4412_v21 = vpop.f32.mrb[102].mxu0 }
 0x39f   : > { %v4506_v58 = vadd.f32 %v4412_v21, %v3987_v25  ;;  %v5626_v47 = vpop.f32.mrb[103].mxu0  ;;  %5767 = vmatprep.subr.bf16.mxu1 %v5766_v34  ;;  %v3996_v17 = vpop.f32.mrb[80].mxu1  ;;  %v4590_v62 = vmax.f32 %v4551_v37, 0.0 }
 0x3a0   : > { %5769 = vmatpush3.bf16.msra.mxu1 %v9134_v11  ;;  %v3997_v38 = vadd.f32 %v3996_v17, %v8805_v35  ;;  %v5499_v18 = vpop.f32.mrb[81].mxu1 }
 0x3a1   : > { %v4552_v10 = vadd.f32 %v9106_v36, %v4506_v58 }
 0x3a2   : > { %v4417_v42 = vpop.f32.mrb[104].mxu0 }
 0x3a3   : > { %v4591_v3 = vmax.f32 %v4552_v10, 0.0  ;;  %v4507_v30 = vadd.f32 %v4417_v42, %v3992_v51  ;;  %v5629_v7 = vpop.f32.mrb[105].mxu0  ;;  %v4001_v16 = vpop.f32.mrb[82].mxu1 }
 0x3a4   : > { %v4002_v22 = vadd.f32 %v4001_v16, %v8854_v61  ;;  %v5502_v14 = vpop.f32.mrb[83].mxu1 }
 0x3a5   : > { %v5770_v2 = vpack.c.bf16 %v4591_v3, %v4590_v62  ;;  %v4553_v20 = vadd.f32 %v9106_v36, %v4507_v30 }
 0x3a6   : > { %v4422_v8 = vpop.f32.mrb[106].mxu0 }
 0x3a7   : > { %v4508_v39 = vadd.f32 %v4422_v8, %v3997_v38  ;;  %v5632_v11 = vpop.f32.mrb[107].mxu0  ;;  %5771 = vmatprep.subr.bf16.mxu1 %v5770_v2  ;;  %v4006_v35 = vpop.f32.mrb[84].mxu1  ;;  %v4592_v12 = vmax.f32 %v4553_v20, 0.0 }
 0x3a8   : > { %5773 = vmatpush3.bf16.msra.mxu1 %v9140_v45  ;;  %v4007_v32 = vadd.f32 %v4006_v35, %v8905_v54  ;;  %v5505_v5 = vpop.f32.mrb[85].mxu1  ;;  %v4605_v11 = vld [vmem:[%s9338_s7] sm:$0xff] }
 0x3a9   : > { %v4554_v15 = vadd.f32 %v9106_v36, %v4508_v39 }
 0x3aa   : > { %v4427_v41 = vpop.f32.mrb[108].mxu0 }
 0x3ab   : > { %v4593_v13 = vmax.f32 %v4554_v15, 0.0  ;;  %v4509_v61 = vadd.f32 %v4427_v41, %v4002_v22  ;;  %v5635_v63 = vpop.f32.mrb[109].mxu0  ;;  %v4011_v60 = vpop.f32.mrb[86].mxu1 }
 0x3ac   : > { %v4012_v46 = vadd.f32 %v4011_v60, %v8959_v26  ;;  %v5508_v48 = vpop.f32.mrb[87].mxu1 }
 0x3ad   : > { %v5774_v55 = vpack.c.bf16 %v4593_v13, %v4592_v12  ;;  %v4555_v25 = vadd.f32 %v9106_v36, %v4509_v61 }
 0x3ae   : > { %v4432_v19 = vpop.f32.mrb[110].mxu0 }
 0x3af   : > { %v4510_v23 = vadd.f32 %v4432_v19, %v4007_v32  ;;  %v5638_v45 = vpop.f32.mrb[111].mxu0  ;;  %5775 = vmatprep.subr.bf16.mxu1 %v5774_v55  ;;  %v4016_v54 = vpop.f32.mrb[88].mxu1  ;;  %v4594_v29 = vmax.f32 %v4555_v25, 0.0 }
 0x3b0   : > { %5777 = vmatpush3.bf16.msra.mxu1 %v9146_v57  ;;  %v4017_v31 = vadd.f32 %v4016_v54, %v9004_v53  ;;  %v5511_v1 = vpop.f32.mrb[89].mxu1 }
 0x3b1   : > { %v4556_v33 = vadd.f32 %v9106_v36, %v4510_v23 }
 0x3b2   : > { %v4437_v52 = vpop.f32.mrb[112].mxu0 }
 0x3b3   : > { %v4595_v44 = vmax.f32 %v4556_v33, 0.0  ;;  %v4511_v26 = vadd.f32 %v4437_v52, %v4012_v46  ;;  %v5641_v27 = vpop.f32.mrb[113].mxu0  ;;  %v4021_v51 = vpop.f32.mrb[90].mxu1 }
 0x3b4   : > { %v4022_v0 = vadd.f32 %v4021_v51, %v9053_v43  ;;  %v5514_v34 = vpop.f32.mrb[91].mxu1 }
 0x3b5   : > { %v5778_v21 = vpack.c.bf16 %v4595_v44, %v4594_v29  ;;  %v4557_v58 = vadd.f32 %v9106_v36, %v4511_v26 }
 0x3b6   : > { %v4442_v37 = vpop.f32.mrb[114].mxu0 }
 0x3b7   : > { %v4512_v47 = vadd.f32 %v4442_v37, %v4017_v31  ;;  %v5644_v57 = vpop.f32.mrb[115].mxu0  ;;  %5779 = vmatprep.subr.bf16.mxu1 %v5778_v21  ;;  %v4026_v53 = vpop.f32.mrb[92].mxu1  ;;  %v4596_v42 = vmax.f32 %v4557_v58, 0.0 }
 0x3b8   : > { %5781 = vmatpush3.bf16.msra.mxu1 %v9152_v56  ;;  %v4027_v17 = vadd.f32 %v4026_v53, %v9077_v50  ;;  %v5517_v38 = vpop.f32.mrb[93].mxu1  ;;  %v4752_v57 = vld [vmem:[%s9336_s5] sm:$0xff]  ;;  %v4753_v53 = vld [vmem:[%s9336_s5 + $0x8] sm:$0xff] }
 0x3b9   : > { %v4558_v18 = vadd.f32 %v9106_v36, %v4512_v47  ;;  %v4607_v38 = vld [vmem:[%s9338_s7 + $0x10] sm:$0xff] }
 0x3ba   : > { %v4447_v10 = vpop.f32.mrb[116].mxu0 }
 0x3bb   : > { %v4597_v62 = vmax.f32 %v4558_v18, 0.0  ;;  %v4513_v43 = vadd.f32 %v4447_v10, %v4022_v0  ;;  %v5647_v3 = vpop.f32.mrb[117].mxu0  ;;  %v4031_v30 = vpop.f32.mrb[94].mxu1  ;;  %v5796_v18 = vpack.c.bf16 %v4753_v53, %v4752_v57  ;;  %v4755_v10 = vld [vmem:[%s9336_s5 + $0x18] sm:$0xff] }
 0x3bc   : > { %v4032_v7 = vadd.f32 %v4031_v30, %v9081_v24  ;;  %v5520_v16 = vpop.f32.mrb[95].mxu1  ;;  %v4758_v30 = vld [vmem:[%s9336_s5 + $0x30] sm:$0xff] }
 0x3bd   : > { %v5782_v22 = vpack.c.bf16 %v4597_v62, %v4596_v42  ;;  %v4559_v2 = vadd.f32 %v9106_v36, %v4513_v43  ;;  %v4756_v62 = vld [vmem:[%s9336_s5 + $0x20] sm:$0xff]  ;;  %v4757_v43 = vld [vmem:[%s9336_s5 + $0x28] sm:$0xff] }
 0x3be   : > { %v4452_v14 = vpop.f32.mrb[118].mxu0  ;;  %v5802_v3 = vpack.c.bf16 %v4757_v43, %v4756_v62  ;;  %v4760_v16 = vld [vmem:[%s9336_s5 + $0x40] sm:$0xff] }
 0x3bf   : > { %v4514_v8 = vadd.f32 %v4452_v14, %v4027_v17  ;;  %v5650_v56 = vpop.f32.mrb[119].mxu0  ;;  %5783 = vmatprep.subr.bf16.mxu1 %v5782_v22  ;;  %v4036_v50 = vpop.f32.mrb[96].mxu1  ;;  %v4598_v32 = vmax.f32 %v4559_v2, 0.0  ;;  %v4761_v22 = vld [vmem:[%s9336_s5 + $0x48] sm:$0xff]  ;;  %v4762_v2 = vld [vmem:[%s9336_s5 + $0x50] sm:$0xff] }
 0x3c0   : > { %5785 = vmatpush3.bf16.msra.mxu1 %v9158_v9  ;;  %v4037_v20 = vadd.f32 %v4036_v50, %v9085_v28  ;;  %v5523_v39 = vpop.f32.mrb[97].mxu1  ;;  %v5808_v14 = vpack.c.bf16 %v4761_v22, %v4760_v16  ;;  %v4764_v50 = vld [vmem:[%s9336_s5 + $0x60] sm:$0xff] }
 0x3c1   : > { %v4560_v24 = vadd.f32 %v9106_v36, %v4514_v8  ;;  %5786 = vmatprep.subr.bf16.mxu1 %v9624_v4  ;;  %v4763_v8 = vld [vmem:[%s9336_s5 + $0x58] sm:$0xff] }
 0x3c2   : > { %v4457_v35 = vpop.f32.mrb[120].mxu0  ;;  %v5811_v56 = vpack.c.bf16 %v4763_v8, %v4762_v2 }
 0x3c3   : > { %v4599_v5 = vmax.f32 %v4560_v24, 0.0  ;;  %v4515_v15 = vadd.f32 %v4457_v35, %v4032_v7  ;;  %v5653_v41 = vpop.f32.mrb[121].mxu0  ;;  %v4041_v12 = vpop.f32.mrb[98].mxu1  ;;  %4677 = vmatmul.mubr.f32.vlgmr.msra.gmra.mrb[104].mxu1 %v4605_v11  ;;  %v4766_v11 = vld [vmem:[%s9336_s5 + $0x70] sm:$0xff]  ;;  %v4767_v24 = vld [vmem:[%s9336_s5 + $0x78] sm:$0xff] }
 0x3c4   : > { %v4042_v9 = vadd.f32 %v4041_v12, %v9089_v6  ;;  %v5526_v13 = vpop.f32.mrb[99].mxu1  ;;  %5680 = vmatprep.mubr.msk.f32.mxu1 %vm5941_vm1, %v9462_v49  ;;  %v5817_v35 = vpack.c.bf16 %v4767_v24, %v4766_v11 }
 0x3c5   : > { %v5787_v28 = vpack.c.bf16 %v4599_v5, %v4598_v32  ;;  %v4561_v63 = vadd.f32 %v9106_v36, %v4515_v15 }
 0x3c6   : > { %v4462_v61 = vpop.f32.mrb[122].mxu0 }
 0x3c7   : > { %v4516_v60 = vadd.f32 %v4462_v61, %v4037_v20  ;;  %v5656_v46 = vpop.f32.mrb[123].mxu0  ;;  %5788 = vmatpush3.bf16.msra.mxu1 %v5787_v28  ;;  %v4046_v48 = vpop.f32.mrb[100].mxu1  ;;  %v4600_v23 = vmax.f32 %v4561_v63, 0.0  ;;  %v4765_v20 = vld [vmem:[%s9336_s5 + $0x68] sm:$0xff] }
 0x3c8   : > { %v4047_v55 = vadd.f32 %v4046_v48, %v9093_v59  ;;  %v5529_v19 = vpop.f32.mrb[101].mxu1  ;;  %5789 = vmatprep.subr.bf16.mxu1 %v9624_v4  ;;  %v5814_v39 = vpack.c.bf16 %v4765_v20, %v4764_v50 }
 0x3c9   : > { %v4562_v25 = vadd.f32 %v9106_v36, %v4516_v60 }
 0x3ca   : > { %v4467_v6 = vpop.f32.mrb[124].mxu0 }
 0x3cb   : > { %v4601_v45 = vmax.f32 %v4562_v25, 0.0  ;;  %v4517_v54 = vadd.f32 %v4467_v6, %v4042_v9  ;;  %v5659_v31 = vpop.f32.mrb[125].mxu0  ;;  %v4051_v1 = vpop.f32.mrb[102].mxu1 }
 0x3cc   : > { %v4052_v33 = vadd.f32 %v4051_v1, %v9095_v40  ;;  %v5532_v52 = vpop.f32.mrb[103].mxu1 }
 0x3cd   : > { %v5790_v29 = vpack.c.bf16 %v4601_v45, %v4600_v23  ;;  %v4563_v26 = vadd.f32 %v9106_v36, %v4517_v54 }
 0x3ce   : > { %v4472_v44 = vpop.f32.mrb[126].mxu0 }
 0x3cf   : > { %v4518_v27 = vadd.f32 %v4472_v44, %v4047_v55  ;;  %v5662_v59 = vpop.f32.mrb[127].mxu0  ;;  %5791 = vmatpush3.bf16.msra.mxu1 %v5790_v29  ;;  %v4602_v34 = vmax.f32 %v4563_v26, 0.0 }
 0x3d0   : > { %5792 = vmatprep.subr.bf16.mxu1 %v9624_v4 }
 0x3d1   : > { %v4564_v51 = vadd.f32 %v9106_v36, %v4518_v27 }
 0x3d2   : > { %v4477_v0 = vpop.f32.mrb[128].mxu0 }
 0x3d3   : > { %v4603_v21 = vmax.f32 %v4564_v51, 0.0  ;;  %v4519_v37 = vadd.f32 %v4477_v0, %v4052_v33  ;;  %v5665_v58 = vpop.f32.mrb[129].mxu0 }
 0x3d5   : > { %v5793_v47 = vpack.c.bf16 %v4603_v21, %v4602_v34  ;;  %v4565_v40 = vadd.f32 %v9106_v36, %v4519_v37  ;;  %v4754_v36 = vld [vmem:[%s9336_s5 + $0x10] sm:$0xff] }
 0x3d6   : > { %v5799_v42 = vpack.c.bf16 %v4755_v10, %v4754_v36 }
 0x3d7   : > { %5794 = vmatpush3.bf16.msra.mxu1 %v5793_v47  ;;  %v4604_v17 = vmax.f32 %v4565_v40, 0.0 }
 0x3d8   : > { %5678 = vmatprep.subr.mxu1 %v9462_v49 }
 0x3db   : > { %5679 = vmatpush3.msra.mxu1 %v4604_v17 }
 0x3dc   : > { %5681 = vmatmul.mubr.msk.f32.vlgmr.msra.gmra.mrb[106].mxu1 %vm4608_vm6, %v4607_v38  ;;  %5795 = vmatprep.subr.bf16.mxu1 %v9624_v4 }
 0x3dd   : > { %5797 = vmatpush3.bf16.msra.mxu1 %v5796_v18  ;;  %5715 = vmatprep.mubr.msk.f32.mxu1 %vm5941_vm1, %v9462_v49  ;;  %v4759_v49 = vld [vmem:[%s9336_s5 + $0x38] sm:$0xff] }
 0x3de   : > { %5798 = vmatprep.subr.bf16.mxu1 %v9624_v4  ;;  %v5805_v7 = vpack.c.bf16 %v4759_v49, %v4758_v30 }
 0x3e1   : > { %5800 = vmatpush3.bf16.msra.mxu1 %v5799_v42 }
 0x3e2   : > { %5801 = vmatprep.subr.bf16.mxu1 %v9624_v4 }
 0x3e5   : > { %5803 = vmatpush3.bf16.msra.mxu1 %v5802_v3 }
 0x3e6   : > { %5804 = vmatprep.subr.bf16.mxu1 %v9624_v4 }
 0x3e9   : > { %5806 = vmatpush3.bf16.msra.mxu1 %v5805_v7 }
 0x3ea   : > { %5807 = vmatprep.subr.bf16.mxu1 %v9624_v4 }
 0x3ed   : > { %5809 = vmatpush3.bf16.msra.mxu1 %v5808_v14 }
 0x3ee   : > { %5810 = vmatprep.subr.bf16.mxu1 %v9624_v4 }
 0x3f1   : > { %5812 = vmatpush3.bf16.msra.mxu1 %v5811_v56 }
 0x3f2   : > { %5813 = vmatprep.subr.bf16.mxu1 %v9624_v4 }
 0x3f5   : > { %5815 = vmatpush3.bf16.msra.mxu1 %v5814_v39 }
 0x3f6   : > { %5816 = vmatprep.subr.bf16.mxu1 %v9624_v4  ;;  %v5061_v4 = vld [vmem:[%s9337_s6] ss:$0 sm:$0xff] }
 0x3f9   : > { %5818 = vmatpush3.bf16.msra.mxu1 %v5817_v35 }
 0x496   : > { %v5239_v32 = vpop.f32.mrb[104].mxu1 }
 0x497   : > { %v5240_v5 = vpop.f32.mrb[105].mxu1 }
 0x498   : > { %v5241_v15 = vadd.f32 %v5240_v5, %v5239_v32 }
 0x4af   : > { %v4748_v41 = vpop.f32.mrb[106].mxu1 }
 0x4b0   : > { %v4749_v12 = vadd.f32 %v5241_v15, %v4748_v41  ;;  %v5682_v9 = vpop.f32.mrb[107].mxu1 }
 0x4b2   : > { %5716 = vmatmul.mubr.f32.vlgmr.msra.gmra.mrb[108].mxu1 %v4749_v12 }
 0x585   : > { %v4841_v13 = vpop.f32.mrb[108].mxu1 }
 0x586   : > { %v4842_v28 = vadd.f32 %v5061_v4, %v4841_v13  ;;  %v5717_v61 = vpop.f32.mrb[109].mxu1 }
 0x588   : > { %4845 = vst [vmem:[%s299_s22] sm:$0xff] %v4842_v28 }
 0x589   : > { %5888 = shalt.err (!%p5885_p3)
}
 0x58a   : > { %s5889_s21 = scalar_lea.hbm %s9289_s26, 128  ;;  %s5893_s20 = scalar_lea.hbm %s9339_s8, 256 }
 0x58b   : > { %p5890_p4 = scmp.ne.s32.totalorder %s9289_s26, %s5889_s21  ;;  %p5894_p9 = scmp.lt.u32.totalorder %s9289_s26, %s9339_s8 }
 0x58c   : > { %p5895_p10 = scmp.lt.u32.totalorder %s5893_s20, %s5889_s21  ;;  %p5897_p12 = scmp.lt.u32.totalorder %s5889_s21, %s9289_s26 }
 0x58d   : > { %p5891_p7 = pnand %p5890_p4, %p6027_p5 }
 0x58e   : > { %p5896_p11 = por %p5895_p10, %p5894_p9 }
 0x58f   : > { %p5892_p8 = pneg %p5891_p7 }
 0x590   : > { %p5898_p13 = por %p5897_p12, %p5896_p11 }
 0x592   : > { %p5899_p0 = pnand %p5898_p13, %p5892_p8 }
 0x594   : > { %5902 = shalt.err (!%p5899_p0)
}
 0x595   : > { %5827 = dma.vmem_to_hbm [thread:$0]  (%p6027_p5), %s9291_s23, 128, %s9289_s26, %s4847_s10  }
 0x596 PF: > { %p5833_p1 = scmp.ge.s32.totalorder %s5937_s30, 2  ;;  %s4872_s25 = sand.u32 1, %s5925_s27  }
 0x597   : > { %s4873_s12 = scalar_lea.sflag [#allocation4], %s4872_s25 }
 0x598   : > { %p5830_p2 = pnand %p5833_p1, %p6031_p6 }
 0x59a   : > { %5920 = dma.done.wait (!%p5830_p2), %s4873_s12, 128  }
 0x59b   : > { %5922 = vsyncadd (!%p5830_p2), %s4873_s12, 4294967168  ;;  %p18_p3 = scmp.ge.s32.totalorder %s6014_s11, 4   ;;  %s9648_s27 = smov %s5929_s28 }
 0x59c   : > { %s9649_s28 = smov %s5933_s29  ;;  %s9650_s29 = smov %s6025_s14 }
 0x59d   : > { %s9651_s30 = smov %s6014_s11  ;;  %20 = sbr.rel (!%p18_p3) target bundleno = 3 (0x3), region = 168 }
 0x5a4   :  { %4878 = vsyncpa [#allocation4], 1 }
 0x5a5   :  { %4880 = vsyncpa [#allocation4 + $0x1], 1 }

</bundles_post_ra>
